<compile_context>
chip_gen: v7x
topology: tpu7x:2x2x1
jax: 0.10.0
libtpu: 0.0.40
codegen_flags: <defaults>
</compile_context>

<pallas_src>
import math
import functools

import numpy as np
import jax
import jax.numpy as jnp
from jax import lax
from jax.experimental import pallas as pl
from jax.experimental.pallas import tpu as pltpu

_BF16 = jnp.bfloat16
FEAT_DIM = 64                      # VGG_s emits 64 channels -> feat_dim must be 64
N_HEAD = 8
TILE_M = 4096                      # rows per tile for M-tiled kernels
VMEM_LIMIT = 32 * 1024 * 1024      # explicit scoped-VMEM cap (safe on v5e/v6e/v7x)


def _cp(*sem):
    return pltpu.CompilerParams(dimension_semantics=sem,
                                vmem_limit_bytes=VMEM_LIMIT)


def _tiling(m, target=TILE_M):
    """Even M tiling: (tile rows, padded M, num tiles); tile is a multiple of 8."""
    nt = max(1, -(-m // target))
    tm = -(-m // nt)
    tm = ((tm + 7) // 8) * 8
    return tm, nt * tm, nt


# --------------------------- stem conv kernel --------------------------------

def _conv3x3_kernel(xp_ref, w_ref, b_ref, o_ref, *, H, W, C, O):
    """3x3 conv (pad=1, stride=1) + bias + ReLU as 9 accumulated matmuls."""
    acc = jnp.zeros((H * W, O), jnp.float32)
    for dy in range(3):
        for dx in range(3):
            patch = xp_ref[0, dy:dy + H, dx:dx + W, :]          # (H, W, C)
            patch = patch.reshape(H * W, C).astype(_BF16)
            acc = acc + jnp.dot(patch, w_ref[dy * 3 + dx],
                                preferred_element_type=jnp.float32)
    acc = jnp.maximum(acc + b_ref[...], 0.0)
    o_ref[0] = acc.astype(o_ref.dtype)


def conv3x3_relu(x, w_torch, b):
    """x: (B,H,W,C) f32, w: torch (O,C,3,3). Returns (B,H,W,O) f32."""
    B, H, W, C = x.shape
    O = w_torch.shape[0]
    xp = jnp.pad(x, ((0, 0), (1, 1), (1, 1), (0, 0)))
    w9 = jnp.transpose(w_torch, (2, 3, 1, 0)).reshape(9, C, O).astype(_BF16)
    y = pl.pallas_call(
        functools.partial(_conv3x3_kernel, H=H, W=W, C=C, O=O),
        out_shape=jax.ShapeDtypeStruct((B, H * W, O), jnp.float32),
        grid=(B,),
        in_specs=[pl.BlockSpec((1, H + 2, W + 2, C), lambda bi: (bi, 0, 0, 0)),
                  pl.BlockSpec((9, C, O), lambda bi: (0, 0, 0)),
                  pl.BlockSpec((1, O), lambda bi: (0, 0))],
        out_specs=pl.BlockSpec((1, H * W, O), lambda bi: (bi, 0, 0)),
        compiler_params=_cp("parallel"),
    )(xp, w9, b.reshape(1, O).astype(jnp.float32))
    return y.reshape(B, H, W, O)


def maxpool2x2_nhwc(x):
    B, H, W, C = x.shape
    return x.reshape(B, H // 2, 2, W // 2, 2, C).max(axis=(2, 4))


# ------------------ fused QKV + attention + fc + residual --------------------

def _attn_block_kernel(x_ref, pb_ref, wqkv_ref, wfc_ref,
                       y_ref, s_ref, q_ref, *, n_head, d_k, d_v):
    x = x_ref[0]                                              # (L, C) f32
    qkv = jnp.dot(x.astype(_BF16), wqkv_ref[...],
                  preferred_element_type=jnp.float32)         # (L, 3C)
    cqk = n_head * d_k
    pb = pb_ref[...]                                          # (L, 2*cqk) pos @ [Wq|Wk]
    q_all = (qkv[:, :cqk] + pb[:, :cqk]).astype(_BF16)        # 1/sqrt(d_k) folded in Wq
    k_all = (qkv[:, cqk:2 * cqk] + pb[:, cqk:]).astype(_BF16)
    v_all = qkv[:, 2 * cqk:].astype(_BF16)
    outs = []
    for h in range(n_head):                                   # heads looped in-kernel
        qh = q_all[:, h * d_k:(h + 1) * d_k]
        kh = k_all[:, h * d_k:(h + 1) * d_k]
        vh = v_all[:, h * d_v:(h + 1) * d_v]
        sc = lax.dot_general(qh, kh, (((1,), (1,)), ((), ())),
                             preferred_element_type=jnp.float32)   # (L, L)
        sc = sc - jnp.max(sc, axis=-1, keepdims=True)
        p = jnp.exp(sc)
        p = p * pl.reciprocal(jnp.sum(p, axis=-1, keepdims=True), approx=True)
        outs.append(jnp.dot(p.astype(_BF16), vh,
                            preferred_element_type=jnp.float32))
    attn = jnp.concatenate(outs, axis=-1).astype(_BF16)       # (L, n_head*d_v)
    y1 = jnp.dot(attn, wfc_ref[...],
                 preferred_element_type=jnp.float32) + x      # fc (no bias) + residual
    y_ref[0] = y1.astype(y_ref.dtype)
    # per-batch partial BN1 statistics (reduced to (1,C) in plain JAX outside)
    s_ref[0] = jnp.sum(y1, axis=0, keepdims=True)
    q_ref[0] = jnp.sum(y1 * y1, axis=0, keepdims=True)


def pallas_attn_block(x_seq, pos_bias, w_qkv, w_fc, *, n_head, d_k, d_v):
    B, L, C = x_seq.shape
    c3 = w_qkv.shape[1]
    return pl.pallas_call(
        functools.partial(_attn_block_kernel, n_head=n_head, d_k=d_k, d_v=d_v),
        out_shape=(jax.ShapeDtypeStruct((B, L, C), _BF16),
                   jax.ShapeDtypeStruct((B, 1, C), jnp.float32),
                   jax.ShapeDtypeStruct((B, 1, C), jnp.float32)),
        grid=(B,),
        in_specs=[pl.BlockSpec((1, L, C), lambda bi: (bi, 0, 0)),
                  pl.BlockSpec((L, 2 * n_head * d_k), lambda bi: (0, 0)),
                  pl.BlockSpec((C, c3), lambda bi: (0, 0)),
                  pl.BlockSpec((n_head * d_v, C), lambda bi: (0, 0))],
        out_specs=(pl.BlockSpec((1, L, C), lambda bi: (bi, 0, 0)),
                   pl.BlockSpec((1, 1, C), lambda bi: (bi, 0, 0)),
                   pl.BlockSpec((1, 1, C), lambda bi: (bi, 0, 0))),
        compiler_params=_cp("parallel"),
    )(x_seq, pos_bias, w_qkv, w_fc)


# ------------------ BN1-apply + FFN + residual (+ BN2 partials) --------------

def _bn_ffn_kernel(x_ref, scl_ref, sft_ref, w1_ref, b1_ref, w2_ref, b2_ref,
                   y_ref, s_ref, q_ref, *, m_real, tm):
    n = x_ref[...].astype(jnp.float32) * scl_ref[...] + sft_ref[...]   # BN1(y1)
    h = jnp.dot(n.astype(_BF16), w1_ref[...],
                preferred_element_type=jnp.float32) + b1_ref[...]
    h = jnp.maximum(h, 0.0)
    z = jnp.dot(h.astype(_BF16), w2_ref[...],
                preferred_element_type=jnp.float32) + b2_ref[...]
    y = n + z                                                           # residual
    y_ref[...] = y.astype(y_ref.dtype)
    # mask padded tail rows out of the BN2 partial statistics
    row0 = pl.program_id(0) * tm
    rid = lax.broadcasted_iota(jnp.int32, y.shape, 0) + row0
    ym = jnp.where(rid < m_real, y, 0.0)
    s_ref[0] = jnp.sum(ym, axis=0, keepdims=True)
    q_ref[0] = jnp.sum(ym * ym, axis=0, keepdims=True)


def pallas_bn_ffn(y1, scl, sft, w1_bf16, b1, w2_bf16, b2):
    M, C = y1.shape
    tm, Mp, nt = _tiling(M)
    if Mp != M:
        y1 = jnp.pad(y1, ((0, Mp - M), (0, 0)))
    row = lambda a: a.reshape(1, -1).astype(jnp.float32)
    y2, s_p, q_p = pl.pallas_call(
        functools.partial(_bn_ffn_kernel, m_real=M, tm=tm),
        out_shape=(jax.ShapeDtypeStruct((Mp, C), _BF16),
                   jax.ShapeDtypeStruct((nt, 1, C), jnp.float32),
                   jax.ShapeDtypeStruct((nt, 1, C), jnp.float32)),
        grid=(nt,),
        in_specs=[pl.BlockSpec((tm, C), lambda i: (i, 0)),
                  pl.BlockSpec((1, C), lambda i: (0, 0)),
                  pl.BlockSpec((1, C), lambda i: (0, 0)),
                  pl.BlockSpec((C, C), lambda i: (0, 0)),
                  pl.BlockSpec((1, C), lambda i: (0, 0)),
                  pl.BlockSpec((C, C), lambda i: (0, 0)),
                  pl.BlockSpec((1, C), lambda i: (0, 0))],
        out_specs=(pl.BlockSpec((tm, C), lambda i: (i, 0)),
                   pl.BlockSpec((1, 1, C), lambda i: (i, 0, 0)),
                   pl.BlockSpec((1, 1, C), lambda i: (i, 0, 0))),
        compiler_params=_cp("parallel"),
    )(y1, scl, sft, w1_bf16, row(b1), w2_bf16, row(b2))
    return y2, jnp.sum(s_p, axis=0), jnp.sum(q_p, axis=0)


# ------------------------ BN2-apply + final 1x1 conv -------------------------

def _bn_proj_kernel(x_ref, scl_ref, sft_ref, wc_ref, bc_ref, o_ref):
    n = x_ref[...].astype(jnp.float32) * scl_ref[...] + sft_ref[...]   # BN2(y2)
    y = jnp.dot(n.astype(_BF16), wc_ref[...],
                preferred_element_type=jnp.float32) + bc_ref[...]
    # 8-lane store is a known (small) masked-vst cost; data volume is tiny.
    o_ref[...] = y.astype(o_ref.dtype)


def pallas_bn_proj(y2p, scl, sft, wc_bf16, bc):
    Mp, C = y2p.shape
    N = wc_bf16.shape[1]
    tm, Mp2, nt = _tiling(Mp)
    if Mp2 != Mp:                                   # defensive; normally equal
        y2p = jnp.pad(y2p, ((0, Mp2 - Mp), (0, 0)))
    row = lambda a: a.reshape(1, -1).astype(jnp.float32)
    return pl.pallas_call(
        _bn_proj_kernel,
        out_shape=jax.ShapeDtypeStruct((Mp2, N), jnp.float32),
        grid=(nt,),
        in_specs=[pl.BlockSpec((tm, C), lambda i: (i, 0)),
                  pl.BlockSpec((1, C), lambda i: (0, 0)),
                  pl.BlockSpec((1, C), lambda i: (0, 0)),
                  pl.BlockSpec((C, N), lambda i: (0, 0)),
                  pl.BlockSpec((1, N), lambda i: (0, 0))],
        out_specs=pl.BlockSpec((tm, N), lambda i: (i, 0)),
        compiler_params=_cp("parallel"),
    )(y2p, scl, sft, wc_bf16, row(bc))


# ------------------------------- JAX glue ------------------------------------

def pos_en_sine_flat_np(h, w, num_pos_feats):
    """DETR-style sinusoidal pos-enc, channel-last, numpy (h*w, 2*npf) constant."""
    temperature = 10000.0
    scale = 2.0 * math.pi
    eps = 1e-6
    ones = np.ones((1, h, w), np.float32)
    y_embed = np.cumsum(ones, axis=1)
    x_embed = np.cumsum(ones, axis=2)
    y_embed = y_embed / (y_embed[:, -1:, :] + eps) * scale
    x_embed = x_embed / (x_embed[:, :, -1:] + eps) * scale
    dim_t = np.arange(num_pos_feats, dtype=np.float32)
    dim_t = temperature ** (2.0 * (dim_t // 2) / num_pos_feats)
    pos_x = x_embed[:, :, :, None] / dim_t
    pos_y = y_embed[:, :, :, None] / dim_t
    pos_x = np.stack((np.sin(pos_x[:, :, :, 0::2]),
                      np.cos(pos_x[:, :, :, 1::2])), axis=4).reshape(1, h, w, -1)
    pos_y = np.stack((np.sin(pos_y[:, :, :, 0::2]),
                      np.cos(pos_y[:, :, :, 1::2])), axis=4).reshape(1, h, w, -1)
    pos = np.concatenate((pos_y, pos_x), axis=3)
    return pos.reshape(h * w, 2 * num_pos_feats).astype(np.float32)


def _to_w(w_torch):
    """torch (O, C, 1, 1) conv weight -> (C, O) matmul weight (f32)."""
    O, C = w_torch.shape[0], w_torch.shape[1]
    return w_torch.reshape(O, C).T


def _bn_scale_shift(s, q, count, gamma, beta, eps=1e-5):
    """Training-mode BN scale/shift from channel sum / sum-of-squares (1,C)."""
    mean = s / count
    var = q / count - mean * mean            # biased variance (training forward)
    scl = gamma.reshape(1, -1) * lax.rsqrt(var + eps)
    sft = beta.reshape(1, -1) - mean * scl
    return scl.astype(jnp.float32), sft.astype(jnp.float32)


# ----------------------------- module forward --------------------------------

def transformer_encoder_unit(src, params):
    n_head, feat_dim = N_HEAD, FEAT_DIM
    d_k = d_v = feat_dim // n_head

    # ---- VGG_s stem (NHWC internally; maxpool is a free XLA reshape+max) ----
    x = jnp.transpose(src, (0, 2, 3, 1))
    x = conv3x3_relu(x, params['vgg_w1'], params['vgg_b1'])
    x = maxpool2x2_nhwc(x)
    x = conv3x3_relu(x, params['vgg_w2'], params['vgg_b2'])
    x = maxpool2x2_nhwc(x)                           # (B, H/4, W/4, 64) f32
    B, Hs, Ws, C = x.shape
    assert C == feat_dim
    L = Hs * Ws
    M = B * L

    # ---- weight prep: fold 1/sqrt(d_k) into Wq, fuse [Wq|Wk|Wv], fold pos ----
    scale = 1.0 / math.sqrt(d_k)
    wq = _to_w(params['w_qs']) * scale
    wk = _to_w(params['w_ks'])
    wv = _to_w(params['w_vs'])
    w_qkv = jnp.concatenate([wq, wk, wv], axis=1).astype(_BF16)        # (C, 3C)
    pos = jnp.asarray(pos_en_sine_flat_np(Hs, Ws, feat_dim // 2))      # (L, C)
    pos_bias = pos @ jnp.concatenate([wq, wk], axis=1)                 # (L, 2C) f32
    w_fc = _to_w(params['fc']).astype(_BF16)

    # ---- fused QKV + attention + fc + residual, per-batch, with BN1 partials
    y1, s1p, q1p = pallas_attn_block(x.reshape(B, L, C), pos_bias, w_qkv, w_fc,
                                     n_head=n_head, d_k=d_k, d_v=d_v)
    s1 = jnp.sum(s1p, axis=0)                        # (1, C)
    q1 = jnp.sum(q1p, axis=0)
    scl1, sft1 = _bn_scale_shift(s1, q1, float(M), params['bn1_g'], params['bn1_b'])

    # ---- BN1-apply + FFN + residual (emits BN2 partials) ----
    y2, s2, q2 = pallas_bn_ffn(y1.reshape(M, C), scl1, sft1,
                               _to_w(params['lin1_w']).astype(_BF16), params['lin1_b'],
                               _to_w(params['lin2_w']).astype(_BF16), params['lin2_b'])
    scl2, sft2 = _bn_scale_shift(s2, q2, float(M), params['bn2_g'], params['bn2_b'])

    # ---- BN2-apply + final 64->8 conv ----
    out = pallas_bn_proj(y2, scl2, sft2,
                         _to_w(params['conv_w']).astype(_BF16), params['conv_b'])
    out = out[:M]

    # back to NCHW only at the module boundary
    return out.reshape(B, Hs, Ws, -1).transpose(0, 3, 1, 2)


# -------------------------------- parameters ---------------------------------

def init_params(key):
    ks = jax.random.split(key, 14)

    def w(k, shape, fan_in):
        return jax.random.normal(k, shape, jnp.float32) / math.sqrt(float(fan_in))

    p = {}
    p['vgg_w1'] = w(ks[0], (32, 3, 3, 3), 3 * 9)
    p['vgg_b1'] = w(ks[1], (32,), 3 * 9)
    p['vgg_w2'] = w(ks[2], (64, 32, 3, 3), 32 * 9)
    p['vgg_b2'] = w(ks[3], (64,), 32 * 9)
    p['w_qs'] = w(ks[4], (64, 64, 1, 1), 64)     # bias=False (matches nn.Conv2d)
    p['w_ks'] = w(ks[5], (64, 64, 1, 1), 64)
    p['w_vs'] = w(ks[6], (64, 64, 1, 1), 64)
    p['fc'] = w(ks[7], (64, 64, 1, 1), 64)       # bias=False
    p['lin1_w'] = w(ks[8], (64, 64, 1, 1), 64)
    p['lin1_b'] = w(ks[9], (64,), 64)
    p['lin2_w'] = w(ks[10], (64, 64, 1, 1), 64)
    p['lin2_b'] = w(ks[11], (64,), 64)
    p['bn1_g'] = jnp.ones((64,), jnp.float32)    # BatchNorm2d default affine init
    p['bn1_b'] = jnp.zeros((64,), jnp.float32)
    p['bn2_g'] = jnp.ones((64,), jnp.float32)
    p['bn2_b'] = jnp.zeros((64,), jnp.float32)
    p['conv_w'] = w(ks[12], (8, 64, 1, 1), 64)
    p['conv_b'] = w(ks[13], (8,), 64)
    return p


if __name__ == "__main__":
    key = jax.random.PRNGKey(0)
    k_in, k_par = jax.random.split(key)
    # input: NCHW, batch=2, 3 channels (VGG_s expects RGB), 16x16 spatial
    x = jax.random.normal(k_in, (2, 3, 16, 16), jnp.float32)
    params = init_params(k_par)

    fwd = jax.jit(transformer_encoder_unit)
    out = jax.block_until_ready(fwd(x, params))
    assert out.shape == (2, 8, 4, 4), out.shape
    assert bool(jnp.all(jnp.isfinite(out)))
    print("KERNEL_OK")
</pallas_src>

<mosaic_0001>
module attributes {stable_mosaic.version = 11 : i64} {
  func.func @_conv3x3_kernel(%arg0: i32, %arg1: memref<1x18x18x3xf32, #tpu.memory_space<vmem>>, %arg2: memref<9x3x32xbf16, #tpu.memory_space<vmem>>, %arg3: memref<1x32xf32, #tpu.memory_space<vmem>>, %arg4: memref<1x256x32xf32, #tpu.memory_space<vmem>>) attributes {dimension_semantics = [#tpu.dimension_semantics<parallel>], iteration_bounds = array<i64: 2>, scalar_prefetch = 0 : i64, scratch_operands = 0 : i64, tpu.core_type = #tpu.core_type<tc>, window_params = [{transform_indices = @transform_0, window_bounds = array<i64: 1, 18, 18, 3>}, {pipeline_mode = #tpu.pipeline_mode<synchronous>, transform_indices = @transform_1, window_bounds = array<i64: 9, 3, 32>}, {pipeline_mode = #tpu.pipeline_mode<synchronous>, transform_indices = @transform_2, window_bounds = array<i64: 1, 32>}, {transform_indices = @transform_3, window_bounds = array<i64: 1, 256, 32>}]} {
    %cst = arith.constant 0.000000e+00 : f32
    %0 = vector.broadcast %cst : f32 to vector<256x32xf32>
    %c0 = arith.constant 0 : index
    %c0_0 = arith.constant 0 : index
    %c0_1 = arith.constant 0 : index
    %c0_2 = arith.constant 0 : index
    %1 = vector.load %arg1[%c0, %c0_0, %c0_1, %c0_2] : memref<1x18x18x3xf32, #tpu.memory_space<vmem>>, vector<1x16x16x3xf32>
    %2 = vector.shape_cast %1 : vector<1x16x16x3xf32> to vector<16x16x3xf32>
    %3 = vector.shape_cast %2 : vector<16x16x3xf32> to vector<256x3xf32>
    %4 = arith.truncf %3 : vector<256x3xf32> to vector<256x3xbf16>
    %c0_3 = arith.constant 0 : index
    %c0_4 = arith.constant 0 : index
    %c0_5 = arith.constant 0 : index
    %5 = vector.load %arg2[%c0_3, %c0_4, %c0_5] : memref<9x3x32xbf16, #tpu.memory_space<vmem>>, vector<1x3x32xbf16>
    %6 = vector.shape_cast %5 : vector<1x3x32xbf16> to vector<3x32xbf16>
    %cst_6 = arith.constant dense<0.000000e+00> : vector<256x32xf32>
    %7 = tpu.matmul %4, %6, %cst_6 {dimension_numbers = #tpu.dot_dimension_numbers<[1], [0], [0], [1], [0, 0, 1, 1], [], []>} : vector<256x3xbf16>, vector<3x32xbf16>, vector<256x32xf32> -> vector<256x32xf32>
    %8 = arith.addf %0, %7 : vector<256x32xf32>
    %c0_7 = arith.constant 0 : index
    %c0_8 = arith.constant 0 : index
    %c1 = arith.constant 1 : index
    %c0_9 = arith.constant 0 : index
    %9 = vector.load %arg1[%c0_7, %c0_8, %c1, %c0_9] : memref<1x18x18x3xf32, #tpu.memory_space<vmem>>, vector<1x16x16x3xf32>
    %10 = vector.shape_cast %9 : vector<1x16x16x3xf32> to vector<16x16x3xf32>
    %11 = vector.shape_cast %10 : vector<16x16x3xf32> to vector<256x3xf32>
    %12 = arith.truncf %11 : vector<256x3xf32> to vector<256x3xbf16>
    %c1_10 = arith.constant 1 : index
    %c0_11 = arith.constant 0 : index
    %c0_12 = arith.constant 0 : index
    %13 = vector.load %arg2[%c1_10, %c0_11, %c0_12] : memref<9x3x32xbf16, #tpu.memory_space<vmem>>, vector<1x3x32xbf16>
    %14 = vector.shape_cast %13 : vector<1x3x32xbf16> to vector<3x32xbf16>
    %cst_13 = arith.constant dense<0.000000e+00> : vector<256x32xf32>
    %15 = tpu.matmul %12, %14, %cst_13 {dimension_numbers = #tpu.dot_dimension_numbers<[1], [0], [0], [1], [0, 0, 1, 1], [], []>} : vector<256x3xbf16>, vector<3x32xbf16>, vector<256x32xf32> -> vector<256x32xf32>
    %16 = arith.addf %8, %15 : vector<256x32xf32>
    %c0_14 = arith.constant 0 : index
    %c0_15 = arith.constant 0 : index
    %c2 = arith.constant 2 : index
    %c0_16 = arith.constant 0 : index
    %17 = vector.load %arg1[%c0_14, %c0_15, %c2, %c0_16] : memref<1x18x18x3xf32, #tpu.memory_space<vmem>>, vector<1x16x16x3xf32>
    %18 = vector.shape_cast %17 : vector<1x16x16x3xf32> to vector<16x16x3xf32>
    %19 = vector.shape_cast %18 : vector<16x16x3xf32> to vector<256x3xf32>
    %20 = arith.truncf %19 : vector<256x3xf32> to vector<256x3xbf16>
    %c2_17 = arith.constant 2 : index
    %c0_18 = arith.constant 0 : index
    %c0_19 = arith.constant 0 : index
    %21 = vector.load %arg2[%c2_17, %c0_18, %c0_19] : memref<9x3x32xbf16, #tpu.memory_space<vmem>>, vector<1x3x32xbf16>
    %22 = vector.shape_cast %21 : vector<1x3x32xbf16> to vector<3x32xbf16>
    %cst_20 = arith.constant dense<0.000000e+00> : vector<256x32xf32>
    %23 = tpu.matmul %20, %22, %cst_20 {dimension_numbers = #tpu.dot_dimension_numbers<[1], [0], [0], [1], [0, 0, 1, 1], [], []>} : vector<256x3xbf16>, vector<3x32xbf16>, vector<256x32xf32> -> vector<256x32xf32>
    %24 = arith.addf %16, %23 : vector<256x32xf32>
    %c0_21 = arith.constant 0 : index
    %c1_22 = arith.constant 1 : index
    %c0_23 = arith.constant 0 : index
    %c0_24 = arith.constant 0 : index
    %25 = vector.load %arg1[%c0_21, %c1_22, %c0_23, %c0_24] : memref<1x18x18x3xf32, #tpu.memory_space<vmem>>, vector<1x16x16x3xf32>
    %26 = vector.shape_cast %25 : vector<1x16x16x3xf32> to vector<16x16x3xf32>
    %27 = vector.shape_cast %26 : vector<16x16x3xf32> to vector<256x3xf32>
    %28 = arith.truncf %27 : vector<256x3xf32> to vector<256x3xbf16>
    %c3 = arith.constant 3 : index
    %c0_25 = arith.constant 0 : index
    %c0_26 = arith.constant 0 : index
    %29 = vector.load %arg2[%c3, %c0_25, %c0_26] : memref<9x3x32xbf16, #tpu.memory_space<vmem>>, vector<1x3x32xbf16>
    %30 = vector.shape_cast %29 : vector<1x3x32xbf16> to vector<3x32xbf16>
    %cst_27 = arith.constant dense<0.000000e+00> : vector<256x32xf32>
    %31 = tpu.matmul %28, %30, %cst_27 {dimension_numbers = #tpu.dot_dimension_numbers<[1], [0], [0], [1], [0, 0, 1, 1], [], []>} : vector<256x3xbf16>, vector<3x32xbf16>, vector<256x32xf32> -> vector<256x32xf32>
    %32 = arith.addf %24, %31 : vector<256x32xf32>
    %c0_28 = arith.constant 0 : index
    %c1_29 = arith.constant 1 : index
    %c1_30 = arith.constant 1 : index
    %c0_31 = arith.constant 0 : index
    %33 = vector.load %arg1[%c0_28, %c1_29, %c1_30, %c0_31] : memref<1x18x18x3xf32, #tpu.memory_space<vmem>>, vector<1x16x16x3xf32>
    %34 = vector.shape_cast %33 : vector<1x16x16x3xf32> to vector<16x16x3xf32>
    %35 = vector.shape_cast %34 : vector<16x16x3xf32> to vector<256x3xf32>
    %36 = arith.truncf %35 : vector<256x3xf32> to vector<256x3xbf16>
    %c4 = arith.constant 4 : index
    %c0_32 = arith.constant 0 : index
    %c0_33 = arith.constant 0 : index
    %37 = vector.load %arg2[%c4, %c0_32, %c0_33] : memref<9x3x32xbf16, #tpu.memory_space<vmem>>, vector<1x3x32xbf16>
    %38 = vector.shape_cast %37 : vector<1x3x32xbf16> to vector<3x32xbf16>
    %cst_34 = arith.constant dense<0.000000e+00> : vector<256x32xf32>
    %39 = tpu.matmul %36, %38, %cst_34 {dimension_numbers = #tpu.dot_dimension_numbers<[1], [0], [0], [1], [0, 0, 1, 1], [], []>} : vector<256x3xbf16>, vector<3x32xbf16>, vector<256x32xf32> -> vector<256x32xf32>
    %40 = arith.addf %32, %39 : vector<256x32xf32>
    %c0_35 = arith.constant 0 : index
    %c1_36 = arith.constant 1 : index
    %c2_37 = arith.constant 2 : index
    %c0_38 = arith.constant 0 : index
    %41 = vector.load %arg1[%c0_35, %c1_36, %c2_37, %c0_38] : memref<1x18x18x3xf32, #tpu.memory_space<vmem>>, vector<1x16x16x3xf32>
    %42 = vector.shape_cast %41 : vector<1x16x16x3xf32> to vector<16x16x3xf32>
    %43 = vector.shape_cast %42 : vector<16x16x3xf32> to vector<256x3xf32>
    %44 = arith.truncf %43 : vector<256x3xf32> to vector<256x3xbf16>
    %c5 = arith.constant 5 : index
    %c0_39 = arith.constant 0 : index
    %c0_40 = arith.constant 0 : index
    %45 = vector.load %arg2[%c5, %c0_39, %c0_40] : memref<9x3x32xbf16, #tpu.memory_space<vmem>>, vector<1x3x32xbf16>
    %46 = vector.shape_cast %45 : vector<1x3x32xbf16> to vector<3x32xbf16>
    %cst_41 = arith.constant dense<0.000000e+00> : vector<256x32xf32>
    %47 = tpu.matmul %44, %46, %cst_41 {dimension_numbers = #tpu.dot_dimension_numbers<[1], [0], [0], [1], [0, 0, 1, 1], [], []>} : vector<256x3xbf16>, vector<3x32xbf16>, vector<256x32xf32> -> vector<256x32xf32>
    %48 = arith.addf %40, %47 : vector<256x32xf32>
    %c0_42 = arith.constant 0 : index
    %c2_43 = arith.constant 2 : index
    %c0_44 = arith.constant 0 : index
    %c0_45 = arith.constant 0 : index
    %49 = vector.load %arg1[%c0_42, %c2_43, %c0_44, %c0_45] : memref<1x18x18x3xf32, #tpu.memory_space<vmem>>, vector<1x16x16x3xf32>
    %50 = vector.shape_cast %49 : vector<1x16x16x3xf32> to vector<16x16x3xf32>
    %51 = vector.shape_cast %50 : vector<16x16x3xf32> to vector<256x3xf32>
    %52 = arith.truncf %51 : vector<256x3xf32> to vector<256x3xbf16>
    %c6 = arith.constant 6 : index
    %c0_46 = arith.constant 0 : index
    %c0_47 = arith.constant 0 : index
    %53 = vector.load %arg2[%c6, %c0_46, %c0_47] : memref<9x3x32xbf16, #tpu.memory_space<vmem>>, vector<1x3x32xbf16>
    %54 = vector.shape_cast %53 : vector<1x3x32xbf16> to vector<3x32xbf16>
    %cst_48 = arith.constant dense<0.000000e+00> : vector<256x32xf32>
    %55 = tpu.matmul %52, %54, %cst_48 {dimension_numbers = #tpu.dot_dimension_numbers<[1], [0], [0], [1], [0, 0, 1, 1], [], []>} : vector<256x3xbf16>, vector<3x32xbf16>, vector<256x32xf32> -> vector<256x32xf32>
    %56 = arith.addf %48, %55 : vector<256x32xf32>
    %c0_49 = arith.constant 0 : index
    %c2_50 = arith.constant 2 : index
    %c1_51 = arith.constant 1 : index
    %c0_52 = arith.constant 0 : index
    %57 = vector.load %arg1[%c0_49, %c2_50, %c1_51, %c0_52] : memref<1x18x18x3xf32, #tpu.memory_space<vmem>>, vector<1x16x16x3xf32>
    %58 = vector.shape_cast %57 : vector<1x16x16x3xf32> to vector<16x16x3xf32>
    %59 = vector.shape_cast %58 : vector<16x16x3xf32> to vector<256x3xf32>
    %60 = arith.truncf %59 : vector<256x3xf32> to vector<256x3xbf16>
    %c7 = arith.constant 7 : index
    %c0_53 = arith.constant 0 : index
    %c0_54 = arith.constant 0 : index
    %61 = vector.load %arg2[%c7, %c0_53, %c0_54] : memref<9x3x32xbf16, #tpu.memory_space<vmem>>, vector<1x3x32xbf16>
    %62 = vector.shape_cast %61 : vector<1x3x32xbf16> to vector<3x32xbf16>
    %cst_55 = arith.constant dense<0.000000e+00> : vector<256x32xf32>
    %63 = tpu.matmul %60, %62, %cst_55 {dimension_numbers = #tpu.dot_dimension_numbers<[1], [0], [0], [1], [0, 0, 1, 1], [], []>} : vector<256x3xbf16>, vector<3x32xbf16>, vector<256x32xf32> -> vector<256x32xf32>
    %64 = arith.addf %56, %63 : vector<256x32xf32>
    %c0_56 = arith.constant 0 : index
    %c2_57 = arith.constant 2 : index
    %c2_58 = arith.constant 2 : index
    %c0_59 = arith.constant 0 : index
    %65 = vector.load %arg1[%c0_56, %c2_57, %c2_58, %c0_59] : memref<1x18x18x3xf32, #tpu.memory_space<vmem>>, vector<1x16x16x3xf32>
    %66 = vector.shape_cast %65 : vector<1x16x16x3xf32> to vector<16x16x3xf32>
    %67 = vector.shape_cast %66 : vector<16x16x3xf32> to vector<256x3xf32>
    %68 = arith.truncf %67 : vector<256x3xf32> to vector<256x3xbf16>
    %c8 = arith.constant 8 : index
    %c0_60 = arith.constant 0 : index
    %c0_61 = arith.constant 0 : index
    %69 = vector.load %arg2[%c8, %c0_60, %c0_61] : memref<9x3x32xbf16, #tpu.memory_space<vmem>>, vector<1x3x32xbf16>
    %70 = vector.shape_cast %69 : vector<1x3x32xbf16> to vector<3x32xbf16>
    %cst_62 = arith.constant dense<0.000000e+00> : vector<256x32xf32>
    %71 = tpu.matmul %68, %70, %cst_62 {dimension_numbers = #tpu.dot_dimension_numbers<[1], [0], [0], [1], [0, 0, 1, 1], [], []>} : vector<256x3xbf16>, vector<3x32xbf16>, vector<256x32xf32> -> vector<256x32xf32>
    %72 = arith.addf %64, %71 : vector<256x32xf32>
    %c0_63 = arith.constant 0 : index
    %c0_64 = arith.constant 0 : index
    %73 = vector.load %arg3[%c0_63, %c0_64] : memref<1x32xf32, #tpu.memory_space<vmem>>, vector<1x32xf32>
    %74 = vector.broadcast %73 : vector<1x32xf32> to vector<256x32xf32>
    %75 = arith.addf %72, %74 : vector<256x32xf32>
    %cst_65 = arith.constant 0.000000e+00 : f32
    %76 = vector.broadcast %cst_65 : f32 to vector<256x32xf32>
    %77 = arith.maximumf %75, %76 : vector<256x32xf32>
    %c0_66 = arith.constant 0 : index
    %c0_67 = arith.constant 0 : index
    %c0_68 = arith.constant 0 : index
    %78 = vector.load %arg4[%c0_66, %c0_67, %c0_68] : memref<1x256x32xf32, #tpu.memory_space<vmem>>, vector<1x256x32xf32>
    %79 = vector.shape_cast %78 : vector<1x256x32xf32> to vector<256x32xf32>
    %80 = vector.shape_cast %77 : vector<256x32xf32> to vector<1x256x32xf32>
    tpu.vector_store %arg4[%c0_66, %c0_67, %c0_68], %80 {strides = array<i32>} : memref<1x256x32xf32, #tpu.memory_space<vmem>>, vector<1x256x32xf32>,
    return
  }
  func.func @transform_0(%arg0: i32) -> (i32, i32, i32, i32) {
    %c0_i32 = arith.constant 0 : i32
    %c0_i32_0 = arith.constant 0 : i32
    %c0_i32_1 = arith.constant 0 : i32
    %c0_i32_2 = arith.constant 0 : i32
    return %arg0, %c0_i32, %c0_i32_0, %c0_i32_1 : i32, i32, i32, i32
  }
  func.func @transform_1(%arg0: i32) -> (i32, i32, i32) {
    %c0_i32 = arith.constant 0 : i32
    %c0_i32_0 = arith.constant 0 : i32
    %c0_i32_1 = arith.constant 0 : i32
    %c0_i32_2 = arith.constant 0 : i32
    return %c0_i32, %c0_i32_0, %c0_i32_1 : i32, i32, i32
  }
  func.func @transform_2(%arg0: i32) -> (i32, i32) {
    %c0_i32 = arith.constant 0 : i32
    %c0_i32_0 = arith.constant 0 : i32
    %c0_i32_1 = arith.constant 0 : i32
    return %c0_i32, %c0_i32_0 : i32, i32
  }
  func.func @transform_3(%arg0: i32) -> (i32, i32, i32) {
    %c0_i32 = arith.constant 0 : i32
    %c0_i32_0 = arith.constant 0 : i32
    %c0_i32_1 = arith.constant 0 : i32
    return %arg0, %c0_i32, %c0_i32_0 : i32, i32, i32
  }
}

module attributes {stable_mosaic.version = 11 : i64} {
  func.func @_conv3x3_kernel(%arg0: i32, %arg1: memref<1x10x10x32xf32, #tpu.memory_space<vmem>>, %arg2: memref<9x32x64xbf16, #tpu.memory_space<vmem>>, %arg3: memref<1x64xf32, #tpu.memory_space<vmem>>, %arg4: memref<1x64x64xf32, #tpu.memory_space<vmem>>) attributes {dimension_semantics = [#tpu.dimension_semantics<parallel>], iteration_bounds = array<i64: 2>, scalar_prefetch = 0 : i64, scratch_operands = 0 : i64, tpu.core_type = #tpu.core_type<tc>, window_params = [{transform_indices = @transform_0, window_bounds = array<i64: 1, 10, 10, 32>}, {pipeline_mode = #tpu.pipeline_mode<synchronous>, transform_indices = @transform_1, window_bounds = array<i64: 9, 32, 64>}, {pipeline_mode = #tpu.pipeline_mode<synchronous>, transform_indices = @transform_2, window_bounds = array<i64: 1, 64>}, {transform_indices = @transform_3, window_bounds = array<i64: 1, 64, 64>}]} {
    %cst = arith.constant 0.000000e+00 : f32
    %0 = vector.broadcast %cst : f32 to vector<64x64xf32>
    %c0 = arith.constant 0 : index
    %c0_0 = arith.constant 0 : index
    %c0_1 = arith.constant 0 : index
    %c0_2 = arith.constant 0 : index
    %1 = vector.load %arg1[%c0, %c0_0, %c0_1, %c0_2] : memref<1x10x10x32xf32, #tpu.memory_space<vmem>>, vector<1x8x8x32xf32>
    %2 = vector.shape_cast %1 : vector<1x8x8x32xf32> to vector<8x8x32xf32>
    %3 = vector.shape_cast %2 : vector<8x8x32xf32> to vector<64x32xf32>
    %4 = arith.truncf %3 : vector<64x32xf32> to vector<64x32xbf16>
    %c0_3 = arith.constant 0 : index
    %c0_4 = arith.constant 0 : index
    %c0_5 = arith.constant 0 : index
    %5 = vector.load %arg2[%c0_3, %c0_4, %c0_5] : memref<9x32x64xbf16, #tpu.memory_space<vmem>>, vector<1x32x64xbf16>
    %6 = vector.shape_cast %5 : vector<1x32x64xbf16> to vector<32x64xbf16>
    %cst_6 = arith.constant dense<0.000000e+00> : vector<64x64xf32>
    %7 = tpu.matmul %4, %6, %cst_6 {dimension_numbers = #tpu.dot_dimension_numbers<[1], [0], [0], [1], [0, 0, 1, 1], [], []>} : vector<64x32xbf16>, vector<32x64xbf16>, vector<64x64xf32> -> vector<64x64xf32>
    %8 = arith.addf %0, %7 : vector<64x64xf32>
    %c0_7 = arith.constant 0 : index
    %c0_8 = arith.constant 0 : index
    %c1 = arith.constant 1 : index
    %c0_9 = arith.constant 0 : index
    %9 = vector.load %arg1[%c0_7, %c0_8, %c1, %c0_9] : memref<1x10x10x32xf32, #tpu.memory_space<vmem>>, vector<1x8x8x32xf32>
    %10 = vector.shape_cast %9 : vector<1x8x8x32xf32> to vector<8x8x32xf32>
    %11 = vector.shape_cast %10 : vector<8x8x32xf32> to vector<64x32xf32>
    %12 = arith.truncf %11 : vector<64x32xf32> to vector<64x32xbf16>
    %c1_10 = arith.constant 1 : index
    %c0_11 = arith.constant 0 : index
    %c0_12 = arith.constant 0 : index
    %13 = vector.load %arg2[%c1_10, %c0_11, %c0_12] : memref<9x32x64xbf16, #tpu.memory_space<vmem>>, vector<1x32x64xbf16>
    %14 = vector.shape_cast %13 : vector<1x32x64xbf16> to vector<32x64xbf16>
    %cst_13 = arith.constant dense<0.000000e+00> : vector<64x64xf32>
    %15 = tpu.matmul %12, %14, %cst_13 {dimension_numbers = #tpu.dot_dimension_numbers<[1], [0], [0], [1], [0, 0, 1, 1], [], []>} : vector<64x32xbf16>, vector<32x64xbf16>, vector<64x64xf32> -> vector<64x64xf32>
    %16 = arith.addf %8, %15 : vector<64x64xf32>
    %c0_14 = arith.constant 0 : index
    %c0_15 = arith.constant 0 : index
    %c2 = arith.constant 2 : index
    %c0_16 = arith.constant 0 : index
    %17 = vector.load %arg1[%c0_14, %c0_15, %c2, %c0_16] : memref<1x10x10x32xf32, #tpu.memory_space<vmem>>, vector<1x8x8x32xf32>
    %18 = vector.shape_cast %17 : vector<1x8x8x32xf32> to vector<8x8x32xf32>
    %19 = vector.shape_cast %18 : vector<8x8x32xf32> to vector<64x32xf32>
    %20 = arith.truncf %19 : vector<64x32xf32> to vector<64x32xbf16>
    %c2_17 = arith.constant 2 : index
    %c0_18 = arith.constant 0 : index
    %c0_19 = arith.constant 0 : index
    %21 = vector.load %arg2[%c2_17, %c0_18, %c0_19] : memref<9x32x64xbf16, #tpu.memory_space<vmem>>, vector<1x32x64xbf16>
    %22 = vector.shape_cast %21 : vector<1x32x64xbf16> to vector<32x64xbf16>
    %cst_20 = arith.constant dense<0.000000e+00> : vector<64x64xf32>
    %23 = tpu.matmul %20, %22, %cst_20 {dimension_numbers = #tpu.dot_dimension_numbers<[1], [0], [0], [1], [0, 0, 1, 1], [], []>} : vector<64x32xbf16>, vector<32x64xbf16>, vector<64x64xf32> -> vector<64x64xf32>
    %24 = arith.addf %16, %23 : vector<64x64xf32>
    %c0_21 = arith.constant 0 : index
    %c1_22 = arith.constant 1 : index
    %c0_23 = arith.constant 0 : index
    %c0_24 = arith.constant 0 : index
    %25 = vector.load %arg1[%c0_21, %c1_22, %c0_23, %c0_24] : memref<1x10x10x32xf32, #tpu.memory_space<vmem>>, vector<1x8x8x32xf32>
    %26 = vector.shape_cast %25 : vector<1x8x8x32xf32> to vector<8x8x32xf32>
    %27 = vector.shape_cast %26 : vector<8x8x32xf32> to vector<64x32xf32>
    %28 = arith.truncf %27 : vector<64x32xf32> to vector<64x32xbf16>
    %c3 = arith.constant 3 : index
    %c0_25 = arith.constant 0 : index
    %c0_26 = arith.constant 0 : index
    %29 = vector.load %arg2[%c3, %c0_25, %c0_26] : memref<9x32x64xbf16, #tpu.memory_space<vmem>>, vector<1x32x64xbf16>
    %30 = vector.shape_cast %29 : vector<1x32x64xbf16> to vector<32x64xbf16>
    %cst_27 = arith.constant dense<0.000000e+00> : vector<64x64xf32>
    %31 = tpu.matmul %28, %30, %cst_27 {dimension_numbers = #tpu.dot_dimension_numbers<[1], [0], [0], [1], [0, 0, 1, 1], [], []>} : vector<64x32xbf16>, vector<32x64xbf16>, vector<64x64xf32> -> vector<64x64xf32>
    %32 = arith.addf %24, %31 : vector<64x64xf32>
    %c0_28 = arith.constant 0 : index
    %c1_29 = arith.constant 1 : index
    %c1_30 = arith.constant 1 : index
    %c0_31 = arith.constant 0 : index
    %33 = vector.load %arg1[%c0_28, %c1_29, %c1_30, %c0_31] : memref<1x10x10x32xf32, #tpu.memory_space<vmem>>, vector<1x8x8x32xf32>
    %34 = vector.shape_cast %33 : vector<1x8x8x32xf32> to vector<8x8x32xf32>
    %35 = vector.shape_cast %34 : vector<8x8x32xf32> to vector<64x32xf32>
    %36 = arith.truncf %35 : vector<64x32xf32> to vector<64x32xbf16>
    %c4 = arith.constant 4 : index
    %c0_32 = arith.constant 0 : index
    %c0_33 = arith.constant 0 : index
    %37 = vector.load %arg2[%c4, %c0_32, %c0_33] : memref<9x32x64xbf16, #tpu.memory_space<vmem>>, vector<1x32x64xbf16>
    %38 = vector.shape_cast %37 : vector<1x32x64xbf16> to vector<32x64xbf16>
    %cst_34 = arith.constant dense<0.000000e+00> : vector<64x64xf32>
    %39 = tpu.matmul %36, %38, %cst_34 {dimension_numbers = #tpu.dot_dimension_numbers<[1], [0], [0], [1], [0, 0, 1, 1], [], []>} : vector<64x32xbf16>, vector<32x64xbf16>, vector<64x64xf32> -> vector<64x64xf32>
    %40 = arith.addf %32, %39 : vector<64x64xf32>
    %c0_35 = arith.constant 0 : index
    %c1_36 = arith.constant 1 : index
    %c2_37 = arith.constant 2 : index
    %c0_38 = arith.constant 0 : index
    %41 = vector.load %arg1[%c0_35, %c1_36, %c2_37, %c0_38] : memref<1x10x10x32xf32, #tpu.memory_space<vmem>>, vector<1x8x8x32xf32>
    %42 = vector.shape_cast %41 : vector<1x8x8x32xf32> to vector<8x8x32xf32>
    %43 = vector.shape_cast %42 : vector<8x8x32xf32> to vector<64x32xf32>
    %44 = arith.truncf %43 : vector<64x32xf32> to vector<64x32xbf16>
    %c5 = arith.constant 5 : index
    %c0_39 = arith.constant 0 : index
    %c0_40 = arith.constant 0 : index
    %45 = vector.load %arg2[%c5, %c0_39, %c0_40] : memref<9x32x64xbf16, #tpu.memory_space<vmem>>, vector<1x32x64xbf16>
    %46 = vector.shape_cast %45 : vector<1x32x64xbf16> to vector<32x64xbf16>
    %cst_41 = arith.constant dense<0.000000e+00> : vector<64x64xf32>
    %47 = tpu.matmul %44, %46, %cst_41 {dimension_numbers = #tpu.dot_dimension_numbers<[1], [0], [0], [1], [0, 0, 1, 1], [], []>} : vector<64x32xbf16>, vector<32x64xbf16>, vector<64x64xf32> -> vector<64x64xf32>
    %48 = arith.addf %40, %47 : vector<64x64xf32>
    %c0_42 = arith.constant 0 : index
    %c2_43 = arith.constant 2 : index
    %c0_44 = arith.constant 0 : index
    %c0_45 = arith.constant 0 : index
    %49 = vector.load %arg1[%c0_42, %c2_43, %c0_44, %c0_45] : memref<1x10x10x32xf32, #tpu.memory_space<vmem>>, vector<1x8x8x32xf32>
    %50 = vector.shape_cast %49 : vector<1x8x8x32xf32> to vector<8x8x32xf32>
    %51 = vector.shape_cast %50 : vector<8x8x32xf32> to vector<64x32xf32>
    %52 = arith.truncf %51 : vector<64x32xf32> to vector<64x32xbf16>
    %c6 = arith.constant 6 : index
    %c0_46 = arith.constant 0 : index
    %c0_47 = arith.constant 0 : index
    %53 = vector.load %arg2[%c6, %c0_46, %c0_47] : memref<9x32x64xbf16, #tpu.memory_space<vmem>>, vector<1x32x64xbf16>
    %54 = vector.shape_cast %53 : vector<1x32x64xbf16> to vector<32x64xbf16>
    %cst_48 = arith.constant dense<0.000000e+00> : vector<64x64xf32>
    %55 = tpu.matmul %52, %54, %cst_48 {dimension_numbers = #tpu.dot_dimension_numbers<[1], [0], [0], [1], [0, 0, 1, 1], [], []>} : vector<64x32xbf16>, vector<32x64xbf16>, vector<64x64xf32> -> vector<64x64xf32>
    %56 = arith.addf %48, %55 : vector<64x64xf32>
    %c0_49 = arith.constant 0 : index
    %c2_50 = arith.constant 2 : index
    %c1_51 = arith.constant 1 : index
    %c0_52 = arith.constant 0 : index
    %57 = vector.load %arg1[%c0_49, %c2_50, %c1_51, %c0_52] : memref<1x10x10x32xf32, #tpu.memory_space<vmem>>, vector<1x8x8x32xf32>
    %58 = vector.shape_cast %57 : vector<1x8x8x32xf32> to vector<8x8x32xf32>
    %59 = vector.shape_cast %58 : vector<8x8x32xf32> to vector<64x32xf32>
    %60 = arith.truncf %59 : vector<64x32xf32> to vector<64x32xbf16>
    %c7 = arith.constant 7 : index
    %c0_53 = arith.constant 0 : index
    %c0_54 = arith.constant 0 : index
    %61 = vector.load %arg2[%c7, %c0_53, %c0_54] : memref<9x32x64xbf16, #tpu.memory_space<vmem>>, vector<1x32x64xbf16>
    %62 = vector.shape_cast %61 : vector<1x32x64xbf16> to vector<32x64xbf16>
    %cst_55 = arith.constant dense<0.000000e+00> : vector<64x64xf32>
    %63 = tpu.matmul %60, %62, %cst_55 {dimension_numbers = #tpu.dot_dimension_numbers<[1], [0], [0], [1], [0, 0, 1, 1], [], []>} : vector<64x32xbf16>, vector<32x64xbf16>, vector<64x64xf32> -> vector<64x64xf32>
    %64 = arith.addf %56, %63 : vector<64x64xf32>
    %c0_56 = arith.constant 0 : index
    %c2_57 = arith.constant 2 : index
    %c2_58 = arith.constant 2 : index
    %c0_59 = arith.constant 0 : index
    %65 = vector.load %arg1[%c0_56, %c2_57, %c2_58, %c0_59] : memref<1x10x10x32xf32, #tpu.memory_space<vmem>>, vector<1x8x8x32xf32>
    %66 = vector.shape_cast %65 : vector<1x8x8x32xf32> to vector<8x8x32xf32>
    %67 = vector.shape_cast %66 : vector<8x8x32xf32> to vector<64x32xf32>
    %68 = arith.truncf %67 : vector<64x32xf32> to vector<64x32xbf16>
    %c8 = arith.constant 8 : index
    %c0_60 = arith.constant 0 : index
    %c0_61 = arith.constant 0 : index
    %69 = vector.load %arg2[%c8, %c0_60, %c0_61] : memref<9x32x64xbf16, #tpu.memory_space<vmem>>, vector<1x32x64xbf16>
    %70 = vector.shape_cast %69 : vector<1x32x64xbf16> to vector<32x64xbf16>
    %cst_62 = arith.constant dense<0.000000e+00> : vector<64x64xf32>
    %71 = tpu.matmul %68, %70, %cst_62 {dimension_numbers = #tpu.dot_dimension_numbers<[1], [0], [0], [1], [0, 0, 1, 1], [], []>} : vector<64x32xbf16>, vector<32x64xbf16>, vector<64x64xf32> -> vector<64x64xf32>
    %72 = arith.addf %64, %71 : vector<64x64xf32>
    %c0_63 = arith.constant 0 : index
    %c0_64 = arith.constant 0 : index
    %73 = vector.load %arg3[%c0_63, %c0_64] : memref<1x64xf32, #tpu.memory_space<vmem>>, vector<1x64xf32>
    %74 = vector.broadcast %73 : vector<1x64xf32> to vector<64x64xf32>
    %75 = arith.addf %72, %74 : vector<64x64xf32>
    %cst_65 = arith.constant 0.000000e+00 : f32
    %76 = vector.broadcast %cst_65 : f32 to vector<64x64xf32>
    %77 = arith.maximumf %75, %76 : vector<64x64xf32>
    %c0_66 = arith.constant 0 : index
    %c0_67 = arith.constant 0 : index
    %c0_68 = arith.constant 0 : index
    %78 = vector.load %arg4[%c0_66, %c0_67, %c0_68] : memref<1x64x64xf32, #tpu.memory_space<vmem>>, vector<1x64x64xf32>
    %79 = vector.shape_cast %78 : vector<1x64x64xf32> to vector<64x64xf32>
    %80 = vector.shape_cast %77 : vector<64x64xf32> to vector<1x64x64xf32>
    tpu.vector_store %arg4[%c0_66, %c0_67, %c0_68], %80 {strides = array<i32>} : memref<1x64x64xf32, #tpu.memory_space<vmem>>, vector<1x64x64xf32>,
    return
  }
  func.func @transform_0(%arg0: i32) -> (i32, i32, i32, i32) {
    %c0_i32 = arith.constant 0 : i32
    %c0_i32_0 = arith.constant 0 : i32
    %c0_i32_1 = arith.constant 0 : i32
    %c0_i32_2 = arith.constant 0 : i32
    return %arg0, %c0_i32, %c0_i32_0, %c0_i32_1 : i32, i32, i32, i32
  }
  func.func @transform_1(%arg0: i32) -> (i32, i32, i32) {
    %c0_i32 = arith.constant 0 : i32
    %c0_i32_0 = arith.constant 0 : i32
    %c0_i32_1 = arith.constant 0 : i32
    %c0_i32_2 = arith.constant 0 : i32
    return %c0_i32, %c0_i32_0, %c0_i32_1 : i32, i32, i32
  }
  func.func @transform_2(%arg0: i32) -> (i32, i32) {
    %c0_i32 = arith.constant 0 : i32
    %c0_i32_0 = arith.constant 0 : i32
    %c0_i32_1 = arith.constant 0 : i32
    return %c0_i32, %c0_i32_0 : i32, i32
  }
  func.func @transform_3(%arg0: i32) -> (i32, i32, i32) {
    %c0_i32 = arith.constant 0 : i32
    %c0_i32_0 = arith.constant 0 : i32
    %c0_i32_1 = arith.constant 0 : i32
    return %arg0, %c0_i32, %c0_i32_0 : i32, i32, i32
  }
}

module attributes {stable_mosaic.version = 11 : i64} {
  func.func @_bn_ffn_kernel(%arg0: i32, %arg1: memref<32x64xbf16, #tpu.memory_space<vmem>>, %arg2: memref<1x64xf32, #tpu.memory_space<vmem>>, %arg3: memref<1x64xf32, #tpu.memory_space<vmem>>, %arg4: memref<64x64xbf16, #tpu.memory_space<vmem>>, %arg5: memref<1x64xf32, #tpu.memory_space<vmem>>, %arg6: memref<64x64xbf16, #tpu.memory_space<vmem>>, %arg7: memref<1x64xf32, #tpu.memory_space<vmem>>, %arg8: memref<32x64xbf16, #tpu.memory_space<vmem>>, %arg9: memref<1x1x64xf32, #tpu.memory_space<vmem>>, %arg10: memref<1x1x64xf32, #tpu.memory_space<vmem>>) attributes {dimension_semantics = [#tpu.dimension_semantics<parallel>], iteration_bounds = array<i64: 1>, scalar_prefetch = 0 : i64, scratch_operands = 0 : i64, tpu.core_type = #tpu.core_type<tc>, window_params = [{transform_indices = @transform_0, window_bounds = array<i64: 32, 64>}, {pipeline_mode = #tpu.pipeline_mode<synchronous>, transform_indices = @transform_1, window_bounds = array<i64: 1, 64>}, {pipeline_mode = #tpu.pipeline_mode<synchronous>, transform_indices = @transform_2, window_bounds = array<i64: 1, 64>}, {pipeline_mode = #tpu.pipeline_mode<synchronous>, transform_indices = @transform_3, window_bounds = array<i64: 64, 64>}, {pipeline_mode = #tpu.pipeline_mode<synchronous>, transform_indices = @transform_4, window_bounds = array<i64: 1, 64>}, {pipeline_mode = #tpu.pipeline_mode<synchronous>, transform_indices = @transform_5, window_bounds = array<i64: 64, 64>}, {pipeline_mode = #tpu.pipeline_mode<synchronous>, transform_indices = @transform_6, window_bounds = array<i64: 1, 64>}, {transform_indices = @transform_7, window_bounds = array<i64: 32, 64>}, {transform_indices = @transform_8, window_bounds = array<i64: 1, 1, 64>}, {transform_indices = @transform_9, window_bounds = array<i64: 1, 1, 64>}]} {
    %c0 = arith.constant 0 : index
    %c0_0 = arith.constant 0 : index
    %0 = vector.load %arg1[%c0, %c0_0] : memref<32x64xbf16, #tpu.memory_space<vmem>>, vector<32x64xbf16>
    %1 = arith.extf %0 : vector<32x64xbf16> to vector<32x64xf32>
    %c0_1 = arith.constant 0 : index
    %c0_2 = arith.constant 0 : index
    %2 = vector.load %arg2[%c0_1, %c0_2] : memref<1x64xf32, #tpu.memory_space<vmem>>, vector<1x64xf32>
    %3 = vector.broadcast %2 : vector<1x64xf32> to vector<32x64xf32>
    %4 = arith.mulf %1, %3 : vector<32x64xf32>
    %c0_3 = arith.constant 0 : index
    %c0_4 = arith.constant 0 : index
    %5 = vector.load %arg3[%c0_3, %c0_4] : memref<1x64xf32, #tpu.memory_space<vmem>>, vector<1x64xf32>
    %6 = vector.broadcast %5 : vector<1x64xf32> to vector<32x64xf32>
    %7 = arith.addf %4, %6 : vector<32x64xf32>
    %8 = arith.truncf %7 : vector<32x64xf32> to vector<32x64xbf16>
    %c0_5 = arith.constant 0 : index
    %c0_6 = arith.constant 0 : index
    %9 = vector.load %arg4[%c0_5, %c0_6] : memref<64x64xbf16, #tpu.memory_space<vmem>>, vector<64x64xbf16>
    %cst = arith.constant dense<0.000000e+00> : vector<32x64xf32>
    %10 = tpu.matmul %8, %9, %cst {dimension_numbers = #tpu.dot_dimension_numbers<[1], [0], [0], [1], [0, 0, 1, 1], [], []>} : vector<32x64xbf16>, vector<64x64xbf16>, vector<32x64xf32> -> vector<32x64xf32>
    %c0_7 = arith.constant 0 : index
    %c0_8 = arith.constant 0 : index
    %11 = vector.load %arg5[%c0_7, %c0_8] : memref<1x64xf32, #tpu.memory_space<vmem>>, vector<1x64xf32>
    %12 = vector.broadcast %11 : vector<1x64xf32> to vector<32x64xf32>
    %13 = arith.addf %10, %12 : vector<32x64xf32>
    %cst_9 = arith.constant 0.000000e+00 : f32
    %14 = vector.broadcast %cst_9 : f32 to vector<32x64xf32>
    %15 = arith.maximumf %13, %14 : vector<32x64xf32>
    %16 = arith.truncf %15 : vector<32x64xf32> to vector<32x64xbf16>
    %c0_10 = arith.constant 0 : index
    %c0_11 = arith.constant 0 : index
    %17 = vector.load %arg6[%c0_10, %c0_11] : memref<64x64xbf16, #tpu.memory_space<vmem>>, vector<64x64xbf16>
    %cst_12 = arith.constant dense<0.000000e+00> : vector<32x64xf32>
    %18 = tpu.matmul %16, %17, %cst_12 {dimension_numbers = #tpu.dot_dimension_numbers<[1], [0], [0], [1], [0, 0, 1, 1], [], []>} : vector<32x64xbf16>, vector<64x64xbf16>, vector<32x64xf32> -> vector<32x64xf32>
    %c0_13 = arith.constant 0 : index
    %c0_14 = arith.constant 0 : index
    %19 = vector.load %arg7[%c0_13, %c0_14] : memref<1x64xf32, #tpu.memory_space<vmem>>, vector<1x64xf32>
    %20 = vector.broadcast %19 : vector<1x64xf32> to vector<32x64xf32>
    %21 = arith.addf %18, %20 : vector<32x64xf32>
    %22 = arith.addf %7, %21 : vector<32x64xf32>
    %23 = arith.truncf %22 : vector<32x64xf32> to vector<32x64xbf16>
    %c0_15 = arith.constant 0 : index
    %c0_16 = arith.constant 0 : index
    %24 = vector.load %arg8[%c0_15, %c0_16] : memref<32x64xbf16, #tpu.memory_space<vmem>>, vector<32x64xbf16>
    tpu.vector_store %arg8[%c0_15, %c0_16], %23 {strides = array<i32>} : memref<32x64xbf16, #tpu.memory_space<vmem>>, vector<32x64xbf16>,
    %c32_i32 = arith.constant 32 : i32
    %25 = arith.muli %arg0, %c32_i32 : i32
    %26 = tpu.iota {dimensions = array<i32: 0>} : vector<32x64xi32>
    %27 = vector.broadcast %25 : i32 to vector<32x64xi32>
    %28 = arith.addi %26, %27 : vector<32x64xi32>
    %c32_i32_17 = arith.constant 32 : i32
    %29 = vector.broadcast %c32_i32_17 : i32 to vector<32x64xi32>
    %30 = arith.cmpi slt, %28, %29 : vector<32x64xi32>
    %cst_18 = arith.constant 0.000000e+00 : f32
    %31 = vector.broadcast %cst_18 : f32 to vector<32x64xf32>
    %32 = arith.select %30, %22, %31 : vector<32x64xi1>, vector<32x64xf32>
    %cst_19 = arith.constant dense<0.000000e+00> : vector<64xf32>
    %33 = vector.multi_reduction <add>, %32, %cst_19 [0] : vector<32x64xf32> to vector<64xf32>
    %34 = vector.shape_cast %33 : vector<64xf32> to vector<1x64xf32>
    %c0_20 = arith.constant 0 : index
    %c0_21 = arith.constant 0 : index
    %c0_22 = arith.constant 0 : index
    %35 = vector.load %arg9[%c0_20, %c0_21, %c0_22] : memref<1x1x64xf32, #tpu.memory_space<vmem>>, vector<1x1x64xf32>
    %36 = vector.shape_cast %35 : vector<1x1x64xf32> to vector<1x64xf32>
    %37 = vector.shape_cast %34 : vector<1x64xf32> to vector<1x1x64xf32>
    tpu.vector_store %arg9[%c0_20, %c0_21, %c0_22], %37 {strides = array<i32>} : memref<1x1x64xf32, #tpu.memory_space<vmem>>, vector<1x1x64xf32>,
    %38 = arith.mulf %32, %32 : vector<32x64xf32>
    %cst_23 = arith.constant dense<0.000000e+00> : vector<64xf32>
    %39 = vector.multi_reduction <add>, %38, %cst_23 [0] : vector<32x64xf32> to vector<64xf32>
    %40 = vector.shape_cast %39 : vector<64xf32> to vector<1x64xf32>
    %c0_24 = arith.constant 0 : index
    %c0_25 = arith.constant 0 : index
    %c0_26 = arith.constant 0 : index
    %41 = vector.load %arg10[%c0_24, %c0_25, %c0_26] : memref<1x1x64xf32, #tpu.memory_space<vmem>>, vector<1x1x64xf32>
    %42 = vector.shape_cast %41 : vector<1x1x64xf32> to vector<1x64xf32>
    %43 = vector.shape_cast %40 : vector<1x64xf32> to vector<1x1x64xf32>
    tpu.vector_store %arg10[%c0_24, %c0_25, %c0_26], %43 {strides = array<i32>} : memref<1x1x64xf32, #tpu.memory_space<vmem>>, vector<1x1x64xf32>,
    return
  }
  func.func @transform_0(%arg0: i32) -> (i32, i32) {
    %c0_i32 = arith.constant 0 : i32
    %c0_i32_0 = arith.constant 0 : i32
    return %arg0, %c0_i32 : i32, i32
  }
  func.func @transform_1(%arg0: i32) -> (i32, i32) {
    %c0_i32 = arith.constant 0 : i32
    %c0_i32_0 = arith.constant 0 : i32
    %c0_i32_1 = arith.constant 0 : i32
    return %c0_i32, %c0_i32_0 : i32, i32
  }
  func.func @transform_2(%arg0: i32) -> (i32, i32) {
    %c0_i32 = arith.constant 0 : i32
    %c0_i32_0 = arith.constant 0 : i32
    %c0_i32_1 = arith.constant 0 : i32
    return %c0_i32, %c0_i32_0 : i32, i32
  }
  func.func @transform_3(%arg0: i32) -> (i32, i32) {
    %c0_i32 = arith.constant 0 : i32
    %c0_i32_0 = arith.constant 0 : i32
    %c0_i32_1 = arith.constant 0 : i32
    return %c0_i32, %c0_i32_0 : i32, i32
  }
  func.func @transform_4(%arg0: i32) -> (i32, i32) {
    %c0_i32 = arith.constant 0 : i32
    %c0_i32_0 = arith.constant 0 : i32
    %c0_i32_1 = arith.constant 0 : i32
    return %c0_i32, %c0_i32_0 : i32, i32
  }
  func.func @transform_5(%arg0: i32) -> (i32, i32) {
    %c0_i32 = arith.constant 0 : i32
    %c0_i32_0 = arith.constant 0 : i32
    %c0_i32_1 = arith.constant 0 : i32
    return %c0_i32, %c0_i32_0 : i32, i32
  }
  func.func @transform_6(%arg0: i32) -> (i32, i32) {
    %c0_i32 = arith.constant 0 : i32
    %c0_i32_0 = arith.constant 0 : i32
    %c0_i32_1 = arith.constant 0 : i32
    return %c0_i32, %c0_i32_0 : i32, i32
  }
  func.func @transform_7(%arg0: i32) -> (i32, i32) {
    %c0_i32 = arith.constant 0 : i32
    %c0_i32_0 = arith.constant 0 : i32
    return %arg0, %c0_i32 : i32, i32
  }
  func.func @transform_8(%arg0: i32) -> (i32, i32, i32) {
    %c0_i32 = arith.constant 0 : i32
    %c0_i32_0 = arith.constant 0 : i32
    %c0_i32_1 = arith.constant 0 : i32
    return %arg0, %c0_i32, %c0_i32_0 : i32, i32, i32
  }
  func.func @transform_9(%arg0: i32) -> (i32, i32, i32) {
    %c0_i32 = arith.constant 0 : i32
    %c0_i32_0 = arith.constant 0 : i32
    %c0_i32_1 = arith.constant 0 : i32
    return %arg0, %c0_i32, %c0_i32_0 : i32, i32, i32
  }
}

module attributes {stable_mosaic.version = 11 : i64} {
  func.func @_attn_block_kernel(%arg0: i32, %arg1: memref<1x16x64xf32, #tpu.memory_space<vmem>>, %arg2: memref<16x128xf32, #tpu.memory_space<vmem>>, %arg3: memref<64x192xbf16, #tpu.memory_space<vmem>>, %arg4: memref<64x64xbf16, #tpu.memory_space<vmem>>, %arg5: memref<1x16x64xbf16, #tpu.memory_space<vmem>>, %arg6: memref<1x1x64xf32, #tpu.memory_space<vmem>>, %arg7: memref<1x1x64xf32, #tpu.memory_space<vmem>>) attributes {dimension_semantics = [#tpu.dimension_semantics<parallel>], iteration_bounds = array<i64: 2>, scalar_prefetch = 0 : i64, scratch_operands = 0 : i64, tpu.core_type = #tpu.core_type<tc>, window_params = [{transform_indices = @transform_0, window_bounds = array<i64: 1, 16, 64>}, {pipeline_mode = #tpu.pipeline_mode<synchronous>, transform_indices = @transform_1, window_bounds = array<i64: 16, 128>}, {pipeline_mode = #tpu.pipeline_mode<synchronous>, transform_indices = @transform_2, window_bounds = array<i64: 64, 192>}, {pipeline_mode = #tpu.pipeline_mode<synchronous>, transform_indices = @transform_3, window_bounds = array<i64: 64, 64>}, {transform_indices = @transform_4, window_bounds = array<i64: 1, 16, 64>}, {transform_indices = @transform_5, window_bounds = array<i64: 1, 1, 64>}, {transform_indices = @transform_6, window_bounds = array<i64: 1, 1, 64>}]} {
    %c0 = arith.constant 0 : index
    %c0_0 = arith.constant 0 : index
    %c0_1 = arith.constant 0 : index
    %0 = vector.load %arg1[%c0, %c0_0, %c0_1] : memref<1x16x64xf32, #tpu.memory_space<vmem>>, vector<1x16x64xf32>
    %1 = vector.shape_cast %0 : vector<1x16x64xf32> to vector<16x64xf32>
    %2 = arith.truncf %1 : vector<16x64xf32> to vector<16x64xbf16>
    %c0_2 = arith.constant 0 : index
    %c0_3 = arith.constant 0 : index
    %3 = vector.load %arg3[%c0_2, %c0_3] : memref<64x192xbf16, #tpu.memory_space<vmem>>, vector<64x192xbf16>
    %cst = arith.constant dense<0.000000e+00> : vector<16x192xf32>
    %4 = tpu.matmul %2, %3, %cst {dimension_numbers = #tpu.dot_dimension_numbers<[1], [0], [0], [1], [0, 0, 1, 1], [], []>} : vector<16x64xbf16>, vector<64x192xbf16>, vector<16x192xf32> -> vector<16x192xf32>
    %c0_4 = arith.constant 0 : index
    %c0_5 = arith.constant 0 : index
    %5 = vector.load %arg2[%c0_4, %c0_5] : memref<16x128xf32, #tpu.memory_space<vmem>>, vector<16x128xf32>
    %6 = vector.extract_strided_slice %4 {offsets = [0, 0], sizes = [16, 64], strides = [1, 1]} : vector<16x192xf32> to vector<16x64xf32>
    %7 = vector.extract_strided_slice %5 {offsets = [0, 0], sizes = [16, 64], strides = [1, 1]} : vector<16x128xf32> to vector<16x64xf32>
    %8 = arith.addf %6, %7 : vector<16x64xf32>
    %9 = arith.truncf %8 : vector<16x64xf32> to vector<16x64xbf16>
    %10 = vector.extract_strided_slice %4 {offsets = [0, 64], sizes = [16, 64], strides = [1, 1]} : vector<16x192xf32> to vector<16x64xf32>
    %11 = vector.extract_strided_slice %5 {offsets = [0, 64], sizes = [16, 64], strides = [1, 1]} : vector<16x128xf32> to vector<16x64xf32>
    %12 = arith.addf %10, %11 : vector<16x64xf32>
    %13 = arith.truncf %12 : vector<16x64xf32> to vector<16x64xbf16>
    %14 = vector.extract_strided_slice %4 {offsets = [0, 128], sizes = [16, 64], strides = [1, 1]} : vector<16x192xf32> to vector<16x64xf32>
    %15 = arith.truncf %14 : vector<16x64xf32> to vector<16x64xbf16>
    %16 = vector.extract_strided_slice %9 {offsets = [0, 0], sizes = [16, 8], strides = [1, 1]} : vector<16x64xbf16> to vector<16x8xbf16>
    %17 = vector.extract_strided_slice %13 {offsets = [0, 0], sizes = [16, 8], strides = [1, 1]} : vector<16x64xbf16> to vector<16x8xbf16>
    %18 = vector.extract_strided_slice %15 {offsets = [0, 0], sizes = [16, 8], strides = [1, 1]} : vector<16x64xbf16> to vector<16x8xbf16>
    %cst_6 = arith.constant dense<0.000000e+00> : vector<16x16xf32>
    %19 = tpu.matmul %16, %17, %cst_6 {dimension_numbers = #tpu.dot_dimension_numbers<[1], [1], [0], [0], [0, 0, 1, 0], [], []>} : vector<16x8xbf16>, vector<16x8xbf16>, vector<16x16xf32> -> vector<16x16xf32>
    %cst_7 = arith.constant dense<0xFF800000> : vector<16xf32>
    %20 = vector.multi_reduction <maximumf>, %19, %cst_7 [1] : vector<16x16xf32> to vector<16xf32>
    %21 = vector.shape_cast %20 : vector<16xf32> to vector<16x1xf32>
    %22 = vector.broadcast %21 : vector<16x1xf32> to vector<16x16xf32>
    %23 = arith.subf %19, %22 : vector<16x16xf32>
    %24 = math.exp %23 : vector<16x16xf32>
    %cst_8 = arith.constant dense<0.000000e+00> : vector<16xf32>
    %25 = vector.multi_reduction <add>, %24, %cst_8 [1] : vector<16x16xf32> to vector<16xf32>
    %26 = vector.shape_cast %25 : vector<16xf32> to vector<16x1xf32>
    %27 = tpu.reciprocal %26 {approx = true} : vector<16x1xf32> -> vector<16x1xf32>
    %28 = vector.broadcast %27 : vector<16x1xf32> to vector<16x16xf32>
    %29 = arith.mulf %24, %28 : vector<16x16xf32>
    %30 = arith.truncf %29 : vector<16x16xf32> to vector<16x16xbf16>
    %cst_9 = arith.constant dense<0.000000e+00> : vector<16x8xf32>
    %31 = tpu.matmul %30, %18, %cst_9 {dimension_numbers = #tpu.dot_dimension_numbers<[1], [0], [0], [1], [0, 0, 1, 1], [], []>} : vector<16x16xbf16>, vector<16x8xbf16>, vector<16x8xf32> -> vector<16x8xf32>
    %32 = vector.extract_strided_slice %9 {offsets = [0, 8], sizes = [16, 8], strides = [1, 1]} : vector<16x64xbf16> to vector<16x8xbf16>
    %33 = vector.extract_strided_slice %13 {offsets = [0, 8], sizes = [16, 8], strides = [1, 1]} : vector<16x64xbf16> to vector<16x8xbf16>
    %34 = vector.extract_strided_slice %15 {offsets = [0, 8], sizes = [16, 8], strides = [1, 1]} : vector<16x64xbf16> to vector<16x8xbf16>
    %cst_10 = arith.constant dense<0.000000e+00> : vector<16x16xf32>
    %35 = tpu.matmul %32, %33, %cst_10 {dimension_numbers = #tpu.dot_dimension_numbers<[1], [1], [0], [0], [0, 0, 1, 0], [], []>} : vector<16x8xbf16>, vector<16x8xbf16>, vector<16x16xf32> -> vector<16x16xf32>
    %cst_11 = arith.constant dense<0xFF800000> : vector<16xf32>
    %36 = vector.multi_reduction <maximumf>, %35, %cst_11 [1] : vector<16x16xf32> to vector<16xf32>
    %37 = vector.shape_cast %36 : vector<16xf32> to vector<16x1xf32>
    %38 = vector.broadcast %37 : vector<16x1xf32> to vector<16x16xf32>
    %39 = arith.subf %35, %38 : vector<16x16xf32>
    %40 = math.exp %39 : vector<16x16xf32>
    %cst_12 = arith.constant dense<0.000000e+00> : vector<16xf32>
    %41 = vector.multi_reduction <add>, %40, %cst_12 [1] : vector<16x16xf32> to vector<16xf32>
    %42 = vector.shape_cast %41 : vector<16xf32> to vector<16x1xf32>
    %43 = tpu.reciprocal %42 {approx = true} : vector<16x1xf32> -> vector<16x1xf32>
    %44 = vector.broadcast %43 : vector<16x1xf32> to vector<16x16xf32>
    %45 = arith.mulf %40, %44 : vector<16x16xf32>
    %46 = arith.truncf %45 : vector<16x16xf32> to vector<16x16xbf16>
    %cst_13 = arith.constant dense<0.000000e+00> : vector<16x8xf32>
    %47 = tpu.matmul %46, %34, %cst_13 {dimension_numbers = #tpu.dot_dimension_numbers<[1], [0], [0], [1], [0, 0, 1, 1], [], []>} : vector<16x16xbf16>, vector<16x8xbf16>, vector<16x8xf32> -> vector<16x8xf32>
    %48 = vector.extract_strided_slice %9 {offsets = [0, 16], sizes = [16, 8], strides = [1, 1]} : vector<16x64xbf16> to vector<16x8xbf16>
    %49 = vector.extract_strided_slice %13 {offsets = [0, 16], sizes = [16, 8], strides = [1, 1]} : vector<16x64xbf16> to vector<16x8xbf16>
    %50 = vector.extract_strided_slice %15 {offsets = [0, 16], sizes = [16, 8], strides = [1, 1]} : vector<16x64xbf16> to vector<16x8xbf16>
    %cst_14 = arith.constant dense<0.000000e+00> : vector<16x16xf32>
    %51 = tpu.matmul %48, %49, %cst_14 {dimension_numbers = #tpu.dot_dimension_numbers<[1], [1], [0], [0], [0, 0, 1, 0], [], []>} : vector<16x8xbf16>, vector<16x8xbf16>, vector<16x16xf32> -> vector<16x16xf32>
    %cst_15 = arith.constant dense<0xFF800000> : vector<16xf32>
    %52 = vector.multi_reduction <maximumf>, %51, %cst_15 [1] : vector<16x16xf32> to vector<16xf32>
    %53 = vector.shape_cast %52 : vector<16xf32> to vector<16x1xf32>
    %54 = vector.broadcast %53 : vector<16x1xf32> to vector<16x16xf32>
    %55 = arith.subf %51, %54 : vector<16x16xf32>
    %56 = math.exp %55 : vector<16x16xf32>
    %cst_16 = arith.constant dense<0.000000e+00> : vector<16xf32>
    %57 = vector.multi_reduction <add>, %56, %cst_16 [1] : vector<16x16xf32> to vector<16xf32>
    %58 = vector.shape_cast %57 : vector<16xf32> to vector<16x1xf32>
    %59 = tpu.reciprocal %58 {approx = true} : vector<16x1xf32> -> vector<16x1xf32>
    %60 = vector.broadcast %59 : vector<16x1xf32> to vector<16x16xf32>
    %61 = arith.mulf %56, %60 : vector<16x16xf32>
    %62 = arith.truncf %61 : vector<16x16xf32> to vector<16x16xbf16>
    %cst_17 = arith.constant dense<0.000000e+00> : vector<16x8xf32>
    %63 = tpu.matmul %62, %50, %cst_17 {dimension_numbers = #tpu.dot_dimension_numbers<[1], [0], [0], [1], [0, 0, 1, 1], [], []>} : vector<16x16xbf16>, vector<16x8xbf16>, vector<16x8xf32> -> vector<16x8xf32>
    %64 = vector.extract_strided_slice %9 {offsets = [0, 24], sizes = [16, 8], strides = [1, 1]} : vector<16x64xbf16> to vector<16x8xbf16>
    %65 = vector.extract_strided_slice %13 {offsets = [0, 24], sizes = [16, 8], strides = [1, 1]} : vector<16x64xbf16> to vector<16x8xbf16>
    %66 = vector.extract_strided_slice %15 {offsets = [0, 24], sizes = [16, 8], strides = [1, 1]} : vector<16x64xbf16> to vector<16x8xbf16>
    %cst_18 = arith.constant dense<0.000000e+00> : vector<16x16xf32>
    %67 = tpu.matmul %64, %65, %cst_18 {dimension_numbers = #tpu.dot_dimension_numbers<[1], [1], [0], [0], [0, 0, 1, 0], [], []>} : vector<16x8xbf16>, vector<16x8xbf16>, vector<16x16xf32> -> vector<16x16xf32>
    %cst_19 = arith.constant dense<0xFF800000> : vector<16xf32>
    %68 = vector.multi_reduction <maximumf>, %67, %cst_19 [1] : vector<16x16xf32> to vector<16xf32>
    %69 = vector.shape_cast %68 : vector<16xf32> to vector<16x1xf32>
    %70 = vector.broadcast %69 : vector<16x1xf32> to vector<16x16xf32>
    %71 = arith.subf %67, %70 : vector<16x16xf32>
    %72 = math.exp %71 : vector<16x16xf32>
    %cst_20 = arith.constant dense<0.000000e+00> : vector<16xf32>
    %73 = vector.multi_reduction <add>, %72, %cst_20 [1] : vector<16x16xf32> to vector<16xf32>
    %74 = vector.shape_cast %73 : vector<16xf32> to vector<16x1xf32>
    %75 = tpu.reciprocal %74 {approx = true} : vector<16x1xf32> -> vector<16x1xf32>
    %76 = vector.broadcast %75 : vector<16x1xf32> to vector<16x16xf32>
    %77 = arith.mulf %72, %76 : vector<16x16xf32>
    %78 = arith.truncf %77 : vector<16x16xf32> to vector<16x16xbf16>
    %cst_21 = arith.constant dense<0.000000e+00> : vector<16x8xf32>
    %79 = tpu.matmul %78, %66, %cst_21 {dimension_numbers = #tpu.dot_dimension_numbers<[1], [0], [0], [1], [0, 0, 1, 1], [], []>} : vector<16x16xbf16>, vector<16x8xbf16>, vector<16x8xf32> -> vector<16x8xf32>
    %80 = vector.extract_strided_slice %9 {offsets = [0, 32], sizes = [16, 8], strides = [1, 1]} : vector<16x64xbf16> to vector<16x8xbf16>
    %81 = vector.extract_strided_slice %13 {offsets = [0, 32], sizes = [16, 8], strides = [1, 1]} : vector<16x64xbf16> to vector<16x8xbf16>
    %82 = vector.extract_strided_slice %15 {offsets = [0, 32], sizes = [16, 8], strides = [1, 1]} : vector<16x64xbf16> to vector<16x8xbf16>
    %cst_22 = arith.constant dense<0.000000e+00> : vector<16x16xf32>
    %83 = tpu.matmul %80, %81, %cst_22 {dimension_numbers = #tpu.dot_dimension_numbers<[1], [1], [0], [0], [0, 0, 1, 0], [], []>} : vector<16x8xbf16>, vector<16x8xbf16>, vector<16x16xf32> -> vector<16x16xf32>
    %cst_23 = arith.constant dense<0xFF800000> : vector<16xf32>
    %84 = vector.multi_reduction <maximumf>, %83, %cst_23 [1] : vector<16x16xf32> to vector<16xf32>
    %85 = vector.shape_cast %84 : vector<16xf32> to vector<16x1xf32>
    %86 = vector.broadcast %85 : vector<16x1xf32> to vector<16x16xf32>
    %87 = arith.subf %83, %86 : vector<16x16xf32>
    %88 = math.exp %87 : vector<16x16xf32>
    %cst_24 = arith.constant dense<0.000000e+00> : vector<16xf32>
    %89 = vector.multi_reduction <add>, %88, %cst_24 [1] : vector<16x16xf32> to vector<16xf32>
    %90 = vector.shape_cast %89 : vector<16xf32> to vector<16x1xf32>
    %91 = tpu.reciprocal %90 {approx = true} : vector<16x1xf32> -> vector<16x1xf32>
    %92 = vector.broadcast %91 : vector<16x1xf32> to vector<16x16xf32>
    %93 = arith.mulf %88, %92 : vector<16x16xf32>
    %94 = arith.truncf %93 : vector<16x16xf32> to vector<16x16xbf16>
    %cst_25 = arith.constant dense<0.000000e+00> : vector<16x8xf32>
    %95 = tpu.matmul %94, %82, %cst_25 {dimension_numbers = #tpu.dot_dimension_numbers<[1], [0], [0], [1], [0, 0, 1, 1], [], []>} : vector<16x16xbf16>, vector<16x8xbf16>, vector<16x8xf32> -> vector<16x8xf32>
    %96 = vector.extract_strided_slice %9 {offsets = [0, 40], sizes = [16, 8], strides = [1, 1]} : vector<16x64xbf16> to vector<16x8xbf16>
    %97 = vector.extract_strided_slice %13 {offsets = [0, 40], sizes = [16, 8], strides = [1, 1]} : vector<16x64xbf16> to vector<16x8xbf16>
    %98 = vector.extract_strided_slice %15 {offsets = [0, 40], sizes = [16, 8], strides = [1, 1]} : vector<16x64xbf16> to vector<16x8xbf16>
    %cst_26 = arith.constant dense<0.000000e+00> : vector<16x16xf32>
    %99 = tpu.matmul %96, %97, %cst_26 {dimension_numbers = #tpu.dot_dimension_numbers<[1], [1], [0], [0], [0, 0, 1, 0], [], []>} : vector<16x8xbf16>, vector<16x8xbf16>, vector<16x16xf32> -> vector<16x16xf32>
    %cst_27 = arith.constant dense<0xFF800000> : vector<16xf32>
    %100 = vector.multi_reduction <maximumf>, %99, %cst_27 [1] : vector<16x16xf32> to vector<16xf32>
    %101 = vector.shape_cast %100 : vector<16xf32> to vector<16x1xf32>
    %102 = vector.broadcast %101 : vector<16x1xf32> to vector<16x16xf32>
    %103 = arith.subf %99, %102 : vector<16x16xf32>
    %104 = math.exp %103 : vector<16x16xf32>
    %cst_28 = arith.constant dense<0.000000e+00> : vector<16xf32>
    %105 = vector.multi_reduction <add>, %104, %cst_28 [1] : vector<16x16xf32> to vector<16xf32>
    %106 = vector.shape_cast %105 : vector<16xf32> to vector<16x1xf32>
    %107 = tpu.reciprocal %106 {approx = true} : vector<16x1xf32> -> vector<16x1xf32>
    %108 = vector.broadcast %107 : vector<16x1xf32> to vector<16x16xf32>
    %109 = arith.mulf %104, %108 : vector<16x16xf32>
    %110 = arith.truncf %109 : vector<16x16xf32> to vector<16x16xbf16>
    %cst_29 = arith.constant dense<0.000000e+00> : vector<16x8xf32>
    %111 = tpu.matmul %110, %98, %cst_29 {dimension_numbers = #tpu.dot_dimension_numbers<[1], [0], [0], [1], [0, 0, 1, 1], [], []>} : vector<16x16xbf16>, vector<16x8xbf16>, vector<16x8xf32> -> vector<16x8xf32>
    %112 = vector.extract_strided_slice %9 {offsets = [0, 48], sizes = [16, 8], strides = [1, 1]} : vector<16x64xbf16> to vector<16x8xbf16>
    %113 = vector.extract_strided_slice %13 {offsets = [0, 48], sizes = [16, 8], strides = [1, 1]} : vector<16x64xbf16> to vector<16x8xbf16>
    %114 = vector.extract_strided_slice %15 {offsets = [0, 48], sizes = [16, 8], strides = [1, 1]} : vector<16x64xbf16> to vector<16x8xbf16>
    %cst_30 = arith.constant dense<0.000000e+00> : vector<16x16xf32>
    %115 = tpu.matmul %112, %113, %cst_30 {dimension_numbers = #tpu.dot_dimension_numbers<[1], [1], [0], [0], [0, 0, 1, 0], [], []>} : vector<16x8xbf16>, vector<16x8xbf16>, vector<16x16xf32> -> vector<16x16xf32>
    %cst_31 = arith.constant dense<0xFF800000> : vector<16xf32>
    %116 = vector.multi_reduction <maximumf>, %115, %cst_31 [1] : vector<16x16xf32> to vector<16xf32>
    %117 = vector.shape_cast %116 : vector<16xf32> to vector<16x1xf32>
    %118 = vector.broadcast %117 : vector<16x1xf32> to vector<16x16xf32>
    %119 = arith.subf %115, %118 : vector<16x16xf32>
    %120 = math.exp %119 : vector<16x16xf32>
    %cst_32 = arith.constant dense<0.000000e+00> : vector<16xf32>
    %121 = vector.multi_reduction <add>, %120, %cst_32 [1] : vector<16x16xf32> to vector<16xf32>
    %122 = vector.shape_cast %121 : vector<16xf32> to vector<16x1xf32>
    %123 = tpu.reciprocal %122 {approx = true} : vector<16x1xf32> -> vector<16x1xf32>
    %124 = vector.broadcast %123 : vector<16x1xf32> to vector<16x16xf32>
    %125 = arith.mulf %120, %124 : vector<16x16xf32>
    %126 = arith.truncf %125 : vector<16x16xf32> to vector<16x16xbf16>
    %cst_33 = arith.constant dense<0.000000e+00> : vector<16x8xf32>
    %127 = tpu.matmul %126, %114, %cst_33 {dimension_numbers = #tpu.dot_dimension_numbers<[1], [0], [0], [1], [0, 0, 1, 1], [], []>} : vector<16x16xbf16>, vector<16x8xbf16>, vector<16x8xf32> -> vector<16x8xf32>
    %128 = vector.extract_strided_slice %9 {offsets = [0, 56], sizes = [16, 8], strides = [1, 1]} : vector<16x64xbf16> to vector<16x8xbf16>
    %129 = vector.extract_strided_slice %13 {offsets = [0, 56], sizes = [16, 8], strides = [1, 1]} : vector<16x64xbf16> to vector<16x8xbf16>
    %130 = vector.extract_strided_slice %15 {offsets = [0, 56], sizes = [16, 8], strides = [1, 1]} : vector<16x64xbf16> to vector<16x8xbf16>
    %cst_34 = arith.constant dense<0.000000e+00> : vector<16x16xf32>
    %131 = tpu.matmul %128, %129, %cst_34 {dimension_numbers = #tpu.dot_dimension_numbers<[1], [1], [0], [0], [0, 0, 1, 0], [], []>} : vector<16x8xbf16>, vector<16x8xbf16>, vector<16x16xf32> -> vector<16x16xf32>
    %cst_35 = arith.constant dense<0xFF800000> : vector<16xf32>
    %132 = vector.multi_reduction <maximumf>, %131, %cst_35 [1] : vector<16x16xf32> to vector<16xf32>
    %133 = vector.shape_cast %132 : vector<16xf32> to vector<16x1xf32>
    %134 = vector.broadcast %133 : vector<16x1xf32> to vector<16x16xf32>
    %135 = arith.subf %131, %134 : vector<16x16xf32>
    %136 = math.exp %135 : vector<16x16xf32>
    %cst_36 = arith.constant dense<0.000000e+00> : vector<16xf32>
    %137 = vector.multi_reduction <add>, %136, %cst_36 [1] : vector<16x16xf32> to vector<16xf32>
    %138 = vector.shape_cast %137 : vector<16xf32> to vector<16x1xf32>
    %139 = tpu.reciprocal %138 {approx = true} : vector<16x1xf32> -> vector<16x1xf32>
    %140 = vector.broadcast %139 : vector<16x1xf32> to vector<16x16xf32>
    %141 = arith.mulf %136, %140 : vector<16x16xf32>
    %142 = arith.truncf %141 : vector<16x16xf32> to vector<16x16xbf16>
    %cst_37 = arith.constant dense<0.000000e+00> : vector<16x8xf32>
    %143 = tpu.matmul %142, %130, %cst_37 {dimension_numbers = #tpu.dot_dimension_numbers<[1], [0], [0], [1], [0, 0, 1, 1], [], []>} : vector<16x16xbf16>, vector<16x8xbf16>, vector<16x8xf32> -> vector<16x8xf32>
    %144 = tpu.concatenate %31, %47, %63, %79, %95, %111, %127, %143 in 1 : vector<16x8xf32>, vector<16x8xf32>, vector<16x8xf32>, vector<16x8xf32>, vector<16x8xf32>, vector<16x8xf32>, vector<16x8xf32>, vector<16x8xf32> -> vector<16x64xf32>
    %145 = arith.truncf %144 : vector<16x64xf32> to vector<16x64xbf16>
    %c0_38 = arith.constant 0 : index
    %c0_39 = arith.constant 0 : index
    %146 = vector.load %arg4[%c0_38, %c0_39] : memref<64x64xbf16, #tpu.memory_space<vmem>>, vector<64x64xbf16>
    %cst_40 = arith.constant dense<0.000000e+00> : vector<16x64xf32>
    %147 = tpu.matmul %145, %146, %cst_40 {dimension_numbers = #tpu.dot_dimension_numbers<[1], [0], [0], [1], [0, 0, 1, 1], [], []>} : vector<16x64xbf16>, vector<64x64xbf16>, vector<16x64xf32> -> vector<16x64xf32>
    %148 = arith.addf %147, %1 : vector<16x64xf32>
    %149 = arith.truncf %148 : vector<16x64xf32> to vector<16x64xbf16>
    %c0_41 = arith.constant 0 : index
    %c0_42 = arith.constant 0 : index
    %c0_43 = arith.constant 0 : index
    %150 = vector.load %arg5[%c0_41, %c0_42, %c0_43] : memref<1x16x64xbf16, #tpu.memory_space<vmem>>, vector<1x16x64xbf16>
    %151 = vector.shape_cast %150 : vector<1x16x64xbf16> to vector<16x64xbf16>
    %152 = vector.shape_cast %149 : vector<16x64xbf16> to vector<1x16x64xbf16>
    tpu.vector_store %arg5[%c0_41, %c0_42, %c0_43], %152 {strides = array<i32>} : memref<1x16x64xbf16, #tpu.memory_space<vmem>>, vector<1x16x64xbf16>,
    %cst_44 = arith.constant dense<0.000000e+00> : vector<64xf32>
    %153 = vector.multi_reduction <add>, %148, %cst_44 [0] : vector<16x64xf32> to vector<64xf32>
    %154 = vector.shape_cast %153 : vector<64xf32> to vector<1x64xf32>
    %c0_45 = arith.constant 0 : index
    %c0_46 = arith.constant 0 : index
    %c0_47 = arith.constant 0 : index
    %155 = vector.load %arg6[%c0_45, %c0_46, %c0_47] : memref<1x1x64xf32, #tpu.memory_space<vmem>>, vector<1x1x64xf32>
    %156 = vector.shape_cast %155 : vector<1x1x64xf32> to vector<1x64xf32>
    %157 = vector.shape_cast %154 : vector<1x64xf32> to vector<1x1x64xf32>
    tpu.vector_store %arg6[%c0_45, %c0_46, %c0_47], %157 {strides = array<i32>} : memref<1x1x64xf32, #tpu.memory_space<vmem>>, vector<1x1x64xf32>,
    %158 = arith.mulf %148, %148 : vector<16x64xf32>
    %cst_48 = arith.constant dense<0.000000e+00> : vector<64xf32>
    %159 = vector.multi_reduction <add>, %158, %cst_48 [0] : vector<16x64xf32> to vector<64xf32>
    %160 = vector.shape_cast %159 : vector<64xf32> to vector<1x64xf32>
    %c0_49 = arith.constant 0 : index
    %c0_50 = arith.constant 0 : index
    %c0_51 = arith.constant 0 : index
    %161 = vector.load %arg7[%c0_49, %c0_50, %c0_51] : memref<1x1x64xf32, #tpu.memory_space<vmem>>, vector<1x1x64xf32>
    %162 = vector.shape_cast %161 : vector<1x1x64xf32> to vector<1x64xf32>
    %163 = vector.shape_cast %160 : vector<1x64xf32> to vector<1x1x64xf32>
    tpu.vector_store %arg7[%c0_49, %c0_50, %c0_51], %163 {strides = array<i32>} : memref<1x1x64xf32, #tpu.memory_space<vmem>>, vector<1x1x64xf32>,
    return
  }
  func.func @transform_0(%arg0: i32) -> (i32, i32, i32) {
    %c0_i32 = arith.constant 0 : i32
    %c0_i32_0 = arith.constant 0 : i32
    %c0_i32_1 = arith.constant 0 : i32
    return %arg0, %c0_i32, %c0_i32_0 : i32, i32, i32
  }
  func.func @transform_1(%arg0: i32) -> (i32, i32) {
    %c0_i32 = arith.constant 0 : i32
    %c0_i32_0 = arith.constant 0 : i32
    %c0_i32_1 = arith.constant 0 : i32
    return %c0_i32, %c0_i32_0 : i32, i32
  }
  func.func @transform_2(%arg0: i32) -> (i32, i32) {
    %c0_i32 = arith.constant 0 : i32
    %c0_i32_0 = arith.constant 0 : i32
    %c0_i32_1 = arith.constant 0 : i32
    return %c0_i32, %c0_i32_0 : i32, i32
  }
  func.func @transform_3(%arg0: i32) -> (i32, i32) {
    %c0_i32 = arith.constant 0 : i32
    %c0_i32_0 = arith.constant 0 : i32
    %c0_i32_1 = arith.constant 0 : i32
    return %c0_i32, %c0_i32_0 : i32, i32
  }
  func.func @transform_4(%arg0: i32) -> (i32, i32, i32) {
    %c0_i32 = arith.constant 0 : i32
    %c0_i32_0 = arith.constant 0 : i32
    %c0_i32_1 = arith.constant 0 : i32
    return %arg0, %c0_i32, %c0_i32_0 : i32, i32, i32
  }
  func.func @transform_5(%arg0: i32) -> (i32, i32, i32) {
    %c0_i32 = arith.constant 0 : i32
    %c0_i32_0 = arith.constant 0 : i32
    %c0_i32_1 = arith.constant 0 : i32
    return %arg0, %c0_i32, %c0_i32_0 : i32, i32, i32
  }
  func.func @transform_6(%arg0: i32) -> (i32, i32, i32) {
    %c0_i32 = arith.constant 0 : i32
    %c0_i32_0 = arith.constant 0 : i32
    %c0_i32_1 = arith.constant 0 : i32
    return %arg0, %c0_i32, %c0_i32_0 : i32, i32, i32
  }
}

module attributes {stable_mosaic.version = 11 : i64} {
  func.func @_bn_proj_kernel(%arg0: i32, %arg1: memref<32x64xbf16, #tpu.memory_space<vmem>>, %arg2: memref<1x64xf32, #tpu.memory_space<vmem>>, %arg3: memref<1x64xf32, #tpu.memory_space<vmem>>, %arg4: memref<64x8xbf16, #tpu.memory_space<vmem>>, %arg5: memref<1x8xf32, #tpu.memory_space<vmem>>, %arg6: memref<32x8xf32, #tpu.memory_space<vmem>>) attributes {dimension_semantics = [#tpu.dimension_semantics<parallel>], iteration_bounds = array<i64: 1>, scalar_prefetch = 0 : i64, scratch_operands = 0 : i64, tpu.core_type = #tpu.core_type<tc>, window_params = [{transform_indices = @transform_0, window_bounds = array<i64: 32, 64>}, {pipeline_mode = #tpu.pipeline_mode<synchronous>, transform_indices = @transform_1, window_bounds = array<i64: 1, 64>}, {pipeline_mode = #tpu.pipeline_mode<synchronous>, transform_indices = @transform_2, window_bounds = array<i64: 1, 64>}, {pipeline_mode = #tpu.pipeline_mode<synchronous>, transform_indices = @transform_3, window_bounds = array<i64: 64, 8>}, {pipeline_mode = #tpu.pipeline_mode<synchronous>, transform_indices = @transform_4, window_bounds = array<i64: 1, 8>}, {transform_indices = @transform_5, window_bounds = array<i64: 32, 8>}]} {
    %c0 = arith.constant 0 : index
    %c0_0 = arith.constant 0 : index
    %0 = vector.load %arg1[%c0, %c0_0] : memref<32x64xbf16, #tpu.memory_space<vmem>>, vector<32x64xbf16>
    %1 = arith.extf %0 : vector<32x64xbf16> to vector<32x64xf32>
    %c0_1 = arith.constant 0 : index
    %c0_2 = arith.constant 0 : index
    %2 = vector.load %arg2[%c0_1, %c0_2] : memref<1x64xf32, #tpu.memory_space<vmem>>, vector<1x64xf32>
    %3 = vector.broadcast %2 : vector<1x64xf32> to vector<32x64xf32>
    %4 = arith.mulf %1, %3 : vector<32x64xf32>
    %c0_3 = arith.constant 0 : index
    %c0_4 = arith.constant 0 : index
    %5 = vector.load %arg3[%c0_3, %c0_4] : memref<1x64xf32, #tpu.memory_space<vmem>>, vector<1x64xf32>
    %6 = vector.broadcast %5 : vector<1x64xf32> to vector<32x64xf32>
    %7 = arith.addf %4, %6 : vector<32x64xf32>
    %8 = arith.truncf %7 : vector<32x64xf32> to vector<32x64xbf16>
    %c0_5 = arith.constant 0 : index
    %c0_6 = arith.constant 0 : index
    %9 = vector.load %arg4[%c0_5, %c0_6] : memref<64x8xbf16, #tpu.memory_space<vmem>>, vector<64x8xbf16>
    %cst = arith.constant dense<0.000000e+00> : vector<32x8xf32>
    %10 = tpu.matmul %8, %9, %cst {dimension_numbers = #tpu.dot_dimension_numbers<[1], [0], [0], [1], [0, 0, 1, 1], [], []>} : vector<32x64xbf16>, vector<64x8xbf16>, vector<32x8xf32> -> vector<32x8xf32>
    %c0_7 = arith.constant 0 : index
    %c0_8 = arith.constant 0 : index
    %11 = vector.load %arg5[%c0_7, %c0_8] : memref<1x8xf32, #tpu.memory_space<vmem>>, vector<1x8xf32>
    %12 = vector.broadcast %11 : vector<1x8xf32> to vector<32x8xf32>
    %13 = arith.addf %10, %12 : vector<32x8xf32>
    %c0_9 = arith.constant 0 : index
    %c0_10 = arith.constant 0 : index
    %14 = vector.load %arg6[%c0_9, %c0_10] : memref<32x8xf32, #tpu.memory_space<vmem>>, vector<32x8xf32>
    tpu.vector_store %arg6[%c0_9, %c0_10], %13 {strides = array<i32>} : memref<32x8xf32, #tpu.memory_space<vmem>>, vector<32x8xf32>,
    return
  }
  func.func @transform_0(%arg0: i32) -> (i32, i32) {
    %c0_i32 = arith.constant 0 : i32
    %c0_i32_0 = arith.constant 0 : i32
    return %arg0, %c0_i32 : i32, i32
  }
  func.func @transform_1(%arg0: i32) -> (i32, i32) {
    %c0_i32 = arith.constant 0 : i32
    %c0_i32_0 = arith.constant 0 : i32
    %c0_i32_1 = arith.constant 0 : i32
    return %c0_i32, %c0_i32_0 : i32, i32
  }
  func.func @transform_2(%arg0: i32) -> (i32, i32) {
    %c0_i32 = arith.constant 0 : i32
    %c0_i32_0 = arith.constant 0 : i32
    %c0_i32_1 = arith.constant 0 : i32
    return %c0_i32, %c0_i32_0 : i32, i32
  }
  func.func @transform_3(%arg0: i32) -> (i32, i32) {
    %c0_i32 = arith.constant 0 : i32
    %c0_i32_0 = arith.constant 0 : i32
    %c0_i32_1 = arith.constant 0 : i32
    return %c0_i32, %c0_i32_0 : i32, i32
  }
  func.func @transform_4(%arg0: i32) -> (i32, i32) {
    %c0_i32 = arith.constant 0 : i32
    %c0_i32_0 = arith.constant 0 : i32
    %c0_i32_1 = arith.constant 0 : i32
    return %c0_i32, %c0_i32_0 : i32, i32
  }
  func.func @transform_5(%arg0: i32) -> (i32, i32) {
    %c0_i32 = arith.constant 0 : i32
    %c0_i32_0 = arith.constant 0 : i32
    return %arg0, %c0_i32 : i32, i32
  }
}

</mosaic_0001>

<bundles_post_ra>
// kernel: transformer_encoder_unit.6
= control target key start
LH: loop header
LB: loop body
LE: loop exit
PB: predicated region body
PF: predicated region fallthrough
CT: control target
= control target key end

     0   :  { %s1702_s12 = smov 0   ;;  %s1930_s0 = inlined_call_operand.vmem [shape: f32[2,10,10,32], index: 0, kind: input, shape index: {}]   ;;  %s1931_s1 = inlined_call_operand.vmem [shape: bf16[9,32,64], index: 1, kind: input, shape index: {}]   ;;  %s1932_s2 = inlined_call_operand.vmem [shape: f32[1,64], index: 2, kind: input, shape index: {}]   ;;  %s1933_s3 = inlined_call_operand.vmem [shape: f32[2,64,64], index: 3, kind: output, shape index: {}]  }
   0x1 LB: > { %s1271_s13 = sadd.s32 4294967295, %s1680_s12   ;;  %p1275_p0 = scmp.ge.s32.totalorder %s1680_s12, 1  ;;  %s1680_s12 = sphi %s1702_s12, %s13_s12  }
   0x2   : > { %p137_p1 = scmp.lt.s32.totalorder %s1680_s12, 3 }
   0x4   : > { %p138_p2 = pnand %p1275_p0, %p137_p1 }
   0x5   : > { %v1656_v0 = vld [vmem:[%s1931_s1 + $0x10] sm:$0xff] (!%p138_p2)   ;;  %p161_p3 = scmp.lt.s32.totalorder (!%p138_p2), %s1271_s13, 1  ;;  %v1716_v1 = vld [vmem:[%s1931_s1 + $0x40] sm:$0xff] (!%p138_p2)   ;;  %v1658_v2 = vld [vmem:[%s1931_s1 + $0x18] sm:$0xff] (!%p138_p2)   ;;  %vm217_vm0 = vcmask (!%p138_p2), 261120   ;;  %vm1207_vm1 = vcmask (!%p138_p2), 523264  }
   0x6   : > { %141 = sbr.rel (%p138_p2) target bundleno = 312 (0x138), region = 32  ;;  %1471 = vmatprep.subr.bf16.mxu1 (!%p138_p2), %v1656_v0  ;;  %1519 = vmatprep.subr.bf16.mxu0 (!%p138_p2), %v1716_v1  ;;  %v1727_v3 = vld [vmem:[%s1931_s1 + $0x48] sm:$0xff] (!%p138_p2)   ;;  %v1660_v4 = vld [vmem:[%s1931_s1] sm:$0xff] (!%p138_p2)   ;;  %v1661_v5 = vld [vmem:[%s1931_s1 + $0x50] sm:$0xff] (!%p138_p2)  }
   0x7   : > { %1472 = vmatpush3.bf16.msra.mxu1 (!%p138_p2), %v1656_v0  ;;  %1520 = vmatpush3.bf16.msra.mxu0 (!%p138_p2), %v1716_v1  ;;  %v1662_v16 = vld [vmem:[%s1931_s1 + $0x58] sm:$0xff] (!%p138_p2)   ;;  %v1663_v18 = vld [vmem:[%s1931_s1 + $0x8] sm:$0xff] (!%p138_p2)   ;;  %v1664_v24 = vld [vmem:[%s1931_s1 + $0x60] sm:$0xff] (!%p138_p2)  }
   0x8   : > { %1473 = vmatprep.subr.bf16.mxu1 (!%p138_p2), %v1658_v2  ;;  %1521 = vmatprep.subr.bf16.mxu0 (!%p138_p2), %v1727_v3  ;;  %v1665_v28 = vld [vmem:[%s1931_s1 + $0x20] sm:$0xff] (!%p138_p2)   ;;  %v1666_v38 = vld [vmem:[%s1931_s1 + $0x68] sm:$0xff] (!%p138_p2)   ;;  %v1668_v46 = vld [vmem:[%s1931_s1 + $0x70] sm:$0xff] (!%p138_p2)  }
   0x9   : > { %v1667_v45 = vld [vmem:[%s1931_s1 + $0x28] sm:$0xff] (!%p138_p2)   ;;  %v1669_v51 = vld [vmem:[%s1931_s1 + $0x30] sm:$0xff] (!%p138_p2)   ;;  %v1670_v54 = vld [vmem:[%s1931_s1 + $0x78] sm:$0xff] (!%p138_p2)  }
   0xa   : > { %v1671_v59 = vld [vmem:[%s1931_s1 + $0x38] sm:$0xff] (!%p138_p2)   ;;  %v1672_v60 = vld [vmem:[%s1931_s1 + $0x80] sm:$0xff] (!%p138_p2)   ;;  %v1673_v0 = vld [vmem:[%s1931_s1 + $0x88] sm:$0xff] (!%p138_p2)  }
   0xb   : > { %1474 = vmatpush3.bf16.msra.mxu1 (!%p138_p2), %v1658_v2  ;;  %1522 = vmatpush3.bf16.msra.mxu0 (!%p138_p2), %v1727_v3 }
   0xc   : > { %1483 = vmatprep.subr.bf16.mxu1 (!%p138_p2), %v1660_v4  ;;  %1531 = vmatprep.subr.bf16.mxu0 (!%p138_p2), %v1661_v5 }
   0xd   : > { %s1935_s13 = smov (!%p161_p3, %s1271_s13), 1 }
   0xe   : > { %s1647_s22 = smul.u32 160, %s1935_s13  ;;  %s1416_s5 = sshll.u32 %s1935_s13, 6 }
   0xf   : > { %s1909_s7 = scalar_lea.vmem %s1933_s3, %s1416_s5 }
  0x10   : > { %s1741_s29 = scalar_lea.vmem %s1930_s0, %s1647_s22 }
  0x11   : > { %v188_v6 = vld [vmem:[%s1741_s29 + $0x1] sm:$0xff]  ;;  %v189_v7 = vld [vmem:[%s1741_s29 + $0x11] sm:$0xff] }
  0x12   : > { %v1324_v8 = vld [vmem:[%s1741_s29 + $0x21] sm:$0xff]  ;;  %v196_v9 = vpack.c.bf16 %v189_v7, %v188_v6  ;;  %v191_v11 = vld [vmem:[%s1741_s29 + $0x31] sm:$0xff] }
  0x13   : > { %v621_v10 = vpack.c.bf16 %v1324_v8, %v189_v7  ;;  %v1326_v12 = vld [vmem:[%s1741_s29 + $0x41] sm:$0xff]  ;;  %v1750_v13 = vld [vmem:[%s1741_s29 + $0x51] sm:$0xff]  ;;  %v1752_v14 = vpack.c.bf16 %v191_v11, %v1324_v8 }
  0x14   : > { %v622_v15 = vpack.c.bf16 %v1326_v12, %v191_v11  ;;  %v1758_v17 = vpack.c.bf16 %v1750_v13, %v1326_v12  ;;  %1475 = vmatprep.mubr.msk.bf16.mxu1 %vm217_vm0, %v196_v9  ;;  %v1766_v19 = vld [vmem:[%s1741_s29 + $0x12] sm:$0xff]  ;;  %v1772_v20 = vld [vmem:[%s1741_s29 + $0x61] sm:$0xff] }
  0x15   : > { %1523 = vmatprep.mubr.msk.bf16.mxu0 %vm217_vm0, %v621_v10  ;;  %1476 = vmatmul.mubr.msk.bf16.vlgmr.msra.gmra.mrb[0].mxu1 %vm217_vm0, %v1752_v14  ;;  %v1775_v21 = vld [vmem:[%s1741_s29 + $0x22] sm:$0xff]  ;;  %v1778_v22 = vld [vmem:[%s1741_s29 + $0x71] sm:$0xff]  ;;  %v623_v9 = vpack.c.bf16 %v1772_v20, %v1750_v13 }
  0x16   : > { %1524 = vmatmul.mubr.msk.bf16.vlgmr.msra.gmra.mrb[0].mxu0 %vm217_vm0, %v622_v15  ;;  %1484 = vmatpush3.bf16.msra.mxu1 %v1660_v4  ;;  %v735_v23 = vpack.c.bf16 %v1775_v21, %v1766_v19  ;;  %v172_v25 = vld [vmem:[%s1741_s29] sm:$0xff]  ;;  %v1789_v26 = vld [vmem:[%s1741_s29 + $0x10] sm:$0xff]  ;;  %v1794_v27 = vpack.c.bf16 %v1778_v22, %v1772_v20 }
  0x17   : > { %1532 = vmatpush3.bf16.msra.mxu0 %v1661_v5  ;;  %1479 = vmatprep.mubr.msk.bf16.mxu1 %vm217_vm0, %v1758_v17  ;;  %v1343_v29 = vld [vmem:[%s1741_s29 + $0x32] sm:$0xff]  ;;  %v1344_v30 = vld [vmem:[%s1741_s29 + $0x42] sm:$0xff]  ;;  %v180_v31 = vpack.c.bf16 %v1789_v26, %v172_v25 }
  0x18   : > { %1533 = vmatprep.subr.bf16.mxu0 %v1662_v16  ;;  %1485 = vmatprep.subr.bf16.mxu1 %v1663_v18  ;;  %v1345_v32 = vld [vmem:[%s1741_s29 + $0x52] sm:$0xff]  ;;  %v1346_v33 = vld [vmem:[%s1741_s29 + $0x62] sm:$0xff]  ;;  %v736_v34 = vpack.c.bf16 %v1344_v30, %v1343_v29  ;;  %v393_v55 = vpack.c.bf16 %v1343_v29, %v1775_v21 }
  0x19   : > { %1535 = vmatprep.mubr.msk.bf16.mxu0 %vm217_vm0, %v735_v23  ;;  %v174_v35 = vld [vmem:[%s1741_s29 + $0x20] sm:$0xff]  ;;  %v1809_v36 = vld [vmem:[%s1741_s29 + $0x30] sm:$0xff]  ;;  %v737_v37 = vpack.c.bf16 %v1346_v33, %v1345_v32  ;;  %v394_v58 = vpack.c.bf16 %v1345_v32, %v1344_v30 }
  0x1a   : > { %1486 = vmatpush3.bf16.msra.mxu1 %v1663_v18  ;;  %v1815_v39 = vld [vmem:[%s1741_s29 + $0x40] sm:$0xff]  ;;  %v1818_v40 = vld [vmem:[%s1741_s29 + $0x50] sm:$0xff]  ;;  %v181_v41 = vpack.c.bf16 %v1809_v36, %v174_v35  ;;  %v507_v63 = vpack.c.bf16 %v174_v35, %v1789_v26 }
  0x1b   : > { %1534 = vmatpush3.bf16.msra.mxu0 %v1662_v16  ;;  %1495 = vmatprep.subr.bf16.mxu1 %v1665_v28  ;;  %v1347_v42 = vld [vmem:[%s1741_s29 + $0x72] sm:$0xff]  ;;  %v1825_v43 = vld [vmem:[%s1741_s29 + $0x82] sm:$0xff]  ;;  %v182_v44 = vpack.c.bf16 %v1818_v40, %v1815_v39  ;;  %v508_v2 = vpack.c.bf16 %v1815_v39, %v1809_v36  ;;  %v1413_v16 = vld [vmem:[%s1932_s2] ss:$0 sm:$0xff] }
  0x1c   : > { %1543 = vmatprep.subr.bf16.mxu0 %v1664_v24  ;;  %v738_v47 = vpack.c.bf16 %v1825_v43, %v1347_v42  ;;  %v178_v48 = vld [vmem:[%s1741_s29 + $0x60] sm:$0xff]  ;;  %v179_v49 = vld [vmem:[%s1741_s29 + $0x70] sm:$0xff]  ;;  %v395_v62 = vpack.c.bf16 %v1347_v42, %v1346_v33 }
  0x1d   : > { %1480 = vmatmul.mubr.msk.bf16.gmra.mrb[4].mxu1 %vm217_vm0, %v1794_v27  ;;  %v384_v50 = vld [vmem:[%s1741_s29 + $0x2] sm:$0xff]  ;;  %v183_v52 = vpack.c.bf16 %v179_v49, %v178_v48  ;;  %v1366_v57 = vld [vmem:[%s1741_s29 + $0x90] sm:$0xff]  ;;  %v509_v6 = vpack.c.bf16 %v178_v48, %v1818_v40 }
  0x1e   : > { %1487 = vmatprep.mubr.msk.bf16.mxu1 %vm217_vm0, %v180_v31  ;;  %v392_v53 = vpack.c.bf16 %v1766_v19, %v384_v50  ;;  %v1365_v56 = vld [vmem:[%s1741_s29 + $0x80] sm:$0xff]  ;;  %v1384_v5 = vld [vmem:[%s1741_s29 + $0x91] sm:$0xff] }
  0x1f   : > { %v853_v61 = vpack.c.bf16 %v1366_v57, %v1365_v56  ;;  %v1383_v4 = vld [vmem:[%s1741_s29 + $0x81] sm:$0xff]  ;;  %v510_v8 = vpack.c.bf16 %v1365_v56, %v179_v49 }
  0x20   : > { %v967_v7 = vpack.c.bf16 %v1384_v5, %v1383_v4  ;;  %v624_v10 = vpack.c.bf16 %v1383_v4, %v1778_v22 }
  0x22   : > { %1536 = vmatmul.mubr.msk.bf16.vlgmr.msra.gmra.mrb[0].mxu0 %vm217_vm0, %v736_v34 }
  0x23   : > { %1544 = vmatpush3.bf16.msra.mxu0 %v1664_v24  ;;  %1539 = vmatprep.mubr.msk.bf16.mxu0 %vm217_vm0, %v737_v37 }
  0x24   : > { %1545 = vmatprep.subr.bf16.mxu0 %v1666_v38 }
  0x25   : > { %1488 = vmatmul.mubr.msk.bf16.vlgmr.msra.gmra.mrb[0].mxu1 %vm217_vm0, %v181_v41 }
  0x26   : > { %1496 = vmatpush3.bf16.msra.mxu1 %v1665_v28  ;;  %1491 = vmatprep.mubr.msk.bf16.mxu1 %vm217_vm0, %v182_v44 }
  0x27   : > { %1546 = vmatpush3.bf16.msra.mxu0 %v1666_v38  ;;  %1497 = vmatprep.subr.bf16.mxu1 %v1667_v45 }
  0x28   : > { %1555 = vmatprep.subr.bf16.mxu0 %v1668_v46 }
  0x2a   : > { %1540 = vmatmul.mubr.msk.bf16.gmra.mrb[4].mxu0 %vm217_vm0, %v738_v47  ;;  %1498 = vmatpush3.bf16.msra.mxu1 %v1667_v45 }
  0x2b   : > { %1547 = vmatprep.mubr.msk.bf16.mxu0 %vm217_vm0, %v181_v41  ;;  %1507 = vmatprep.subr.bf16.mxu1 %v1669_v51 }
  0x2d   : > { %1492 = vmatmul.mubr.msk.bf16.gmra.mrb[4].mxu1 %vm217_vm0, %v183_v52 }
  0x2e   : > { %1499 = vmatprep.mubr.msk.bf16.mxu1 %vm217_vm0, %v392_v53 }
  0x32   : > { %1548 = vmatmul.mubr.msk.bf16.vlgmr.msra.gmra.mrb[0].mxu0 %vm217_vm0, %v182_v44 }
  0x33   : > { %1556 = vmatpush3.bf16.msra.mxu0 %v1668_v46  ;;  %1551 = vmatprep.mubr.msk.bf16.mxu0 %vm217_vm0, %v183_v52 }
  0x34   : > { %1557 = vmatprep.subr.bf16.mxu0 %v1670_v54 }
  0x35   : > { %1500 = vmatmul.mubr.msk.bf16.vlgmr.msra.gmra.mrb[0].mxu1 %vm217_vm0, %v393_v55 }
  0x36   : > { %1508 = vmatpush3.bf16.msra.mxu1 %v1669_v51  ;;  %1503 = vmatprep.mubr.msk.bf16.mxu1 %vm217_vm0, %v394_v58 }
  0x37   : > { %1558 = vmatpush3.bf16.msra.mxu0 %v1670_v54  ;;  %1509 = vmatprep.subr.bf16.mxu1 %v1671_v59 }
  0x38   : > { %1567 = vmatprep.subr.bf16.mxu0 %v1672_v60 }
  0x3a   : > { %1552 = vmatmul.mubr.msk.bf16.gmra.mrb[4].mxu0 %vm217_vm0, %v853_v61  ;;  %1510 = vmatpush3.bf16.msra.mxu1 %v1671_v59 }
  0x3b   : > { %1559 = vmatprep.mubr.msk.bf16.mxu0 %vm217_vm0, %v1752_v14  ;;  %1579 = vmatprep.subr.bf16.mxu1 %v1716_v1 }
  0x3d   : > { %1504 = vmatmul.mubr.msk.bf16.gmra.mrb[4].mxu1 %vm217_vm0, %v395_v62 }
  0x3e   : > { %1511 = vmatprep.mubr.msk.bf16.mxu1 %vm217_vm0, %v507_v63 }
  0x42   : > { %1560 = vmatmul.mubr.msk.bf16.vlgmr.msra.gmra.mrb[0].mxu0 %vm217_vm0, %v1758_v17 }
  0x43   : > { %1568 = vmatpush3.bf16.msra.mxu0 %v1672_v60  ;;  %1563 = vmatprep.mubr.msk.bf16.mxu0 %vm217_vm0, %v1794_v27 }
  0x44   : > { %1569 = vmatprep.subr.bf16.mxu0 %v1673_v0 }
  0x45   : > { %1512 = vmatmul.mubr.msk.bf16.vlgmr.msra.gmra.mrb[0].mxu1 %vm217_vm0, %v508_v2 }
  0x46   : > { %1581 = vmatpush3.bf16.msra.mxu1 %v1716_v1  ;;  %1515 = vmatprep.mubr.msk.bf16.mxu1 %vm217_vm0, %v509_v6  ;;  %v1402_v1 = vld [vmem:[%s1741_s29 + $0x92] sm:$0xff] }
  0x47   : > { %1570 = vmatpush3.bf16.msra.mxu0 %v1673_v0  ;;  %1580 = vmatprep.subr.bf16.mxu1 %v1727_v3  ;;  %v1081_v11 = vpack.c.bf16 %v1402_v1, %v1825_v43 }
  0x4a   : > { %1564 = vmatmul.mubr.msk.bf16.gmra.mrb[4].mxu0 %vm217_vm0, %v967_v7  ;;  %1582 = vmatpush3.bf16.msra.mxu1 %v1727_v3 }
  0x4b   : > { %1571 = vmatprep.mubr.msk.bf16.mxu0 %vm217_vm0, %v393_v55 }
  0x4d   : > { %1516 = vmatmul.mubr.msk.bf16.gmra.mrb[4].mxu1 %vm217_vm0, %v510_v8 }
  0x4e   : > { %1527 = vmatprep.mubr.msk.bf16.mxu1 %vm217_vm0, %v623_v9 }
  0x52   : > { %1572 = vmatmul.mubr.msk.bf16.vlgmr.msra.gmra.mrb[0].mxu0 %vm217_vm0, %v394_v58 }
  0x53   : > { %1575 = vmatprep.mubr.msk.bf16.mxu0 %vm217_vm0, %v395_v62 }
  0x59   : > { %1528 = vmatmul.mubr.msk.bf16.vlgmr.msra.gmra.mrb[4].mxu1 %vm217_vm0, %v624_v10 }
  0x5a   : > { %1576 = vmatmul.mubr.msk.bf16.gmra.mrb[4].mxu0 %vm217_vm0, %v1081_v11 }
 0x118   : > { %v1513_v3 = vpop.f32.mrb[0].mxu1 }
 0x119   : > { %v574_v12 = vpop.f32.mrb[1].mxu1 }
 0x11a   : > { %v1514_v13 = vpop.f32.mrb[2].mxu1 }
 0x11b   : > { %v577_v14 = vpop.f32.mrb[3].mxu1 }
 0x125   : > { %v1573_v15 = vpop.f32.mrb[0].mxu0 }
 0x126   : > { %v1583_v17 = vadd.f32 %v1573_v15, %v1513_v3  ;;  %v1145_v18 = vpop.f32.mrb[1].mxu0 }
 0x127   : > { %v1584_v19 = vadd.f32 %v1145_v18, %v574_v12  ;;  %v1574_v20 = vpop.f32.mrb[2].mxu0 }
 0x128   : > { %v1193_v21 = vadd.f32 %v1583_v17, %v1413_v16  ;;  %v1585_v22 = vadd.f32 %v1574_v20, %v1514_v13  ;;  %v1148_v23 = vpop.f32.mrb[3].mxu0 }
 0x129   : > { %v1191_v24 = vadd.f32 %v1584_v19, %v1413_v16  ;;  %v1586_v25 = vadd.f32 %v1148_v23, %v577_v14 }
 0x12a   : > { %v1201_v26 = vmax.f32 %v1193_v21, 0.0  ;;  %v1194_v27 = vadd.f32 %v1585_v22, %v1413_v16 }
 0x12b   : > { %v1199_v28 = vmax.f32 %v1191_v24, 0.0  ;;  %v1192_v29 = vadd.f32 %v1586_v25, %v1413_v16 }
 0x12c   : > { %1210 = vst.msk [vmem:[%s1909_s7 + $0x10] sm:$0xff] %vm1207_vm1, %v1201_v26  ;;  %v1202_v30 = vmax.f32 %v1194_v27, 0.0  ;;  %v1529_v32 = vpop.f32.mrb[4].mxu1 }
 0x12d   : > { %1208 = vst.msk [vmem:[%s1909_s7] sm:$0xff] %vm1207_vm1, %v1199_v28  ;;  %v1200_v31 = vmax.f32 %v1192_v29, 0.0  ;;  %v1577_v33 = vpop.f32.mrb[4].mxu0  ;;  %v704_v35 = vpop.f32.mrb[5].mxu1 }
 0x12e   : > { %1211 = vst.msk [vmem:[%s1909_s7 + $0x18] sm:$0xff] %vm1207_vm1, %v1202_v30  ;;  %v1587_v34 = vadd.f32 %v1577_v33, %v1529_v32  ;;  %v1161_v36 = vpop.f32.mrb[5].mxu0  ;;  %v1530_v38 = vpop.f32.mrb[6].mxu1 }
 0x12f   : > { %1209 = vst.msk [vmem:[%s1909_s7 + $0x8] sm:$0xff] %vm1207_vm1, %v1200_v31  ;;  %v1588_v37 = vadd.f32 %v1161_v36, %v704_v35  ;;  %v1578_v39 = vpop.f32.mrb[6].mxu0  ;;  %v707_v42 = vpop.f32.mrb[7].mxu1 }
 0x130   : > { %v1197_v40 = vadd.f32 %v1587_v34, %v1413_v16  ;;  %v1589_v41 = vadd.f32 %v1578_v39, %v1530_v38  ;;  %v1164_v43 = vpop.f32.mrb[7].mxu0 }
 0x131   : > { %v1195_v44 = vadd.f32 %v1588_v37, %v1413_v16  ;;  %v1590_v45 = vadd.f32 %v1164_v43, %v707_v42 }
 0x132   : > { %v1205_v46 = vmax.f32 %v1197_v40, 0.0  ;;  %v1198_v47 = vadd.f32 %v1589_v41, %v1413_v16 }
 0x133   : > { %v1203_v48 = vmax.f32 %v1195_v44, 0.0  ;;  %v1196_v49 = vadd.f32 %v1590_v45, %v1413_v16 }
 0x134   : > { %1214 = vst.msk [vmem:[%s1909_s7 + $0x30] sm:$0xff] %vm1207_vm1, %v1205_v46  ;;  %v1206_v50 = vmax.f32 %v1198_v47, 0.0 }
 0x135   : > { %1212 = vst.msk [vmem:[%s1909_s7 + $0x20] sm:$0xff] %vm1207_vm1, %v1203_v48  ;;  %v1204_v51 = vmax.f32 %v1196_v49, 0.0 }
 0x136   : > { %1215 = vst.msk [vmem:[%s1909_s7 + $0x38] sm:$0xff] %vm1207_vm1, %v1206_v50 }
 0x137   : > { %1213 = vst.msk [vmem:[%s1909_s7 + $0x28] sm:$0xff] %vm1207_vm1, %v1204_v51 }
 0x138 PF: > { %s13_s12 = sadd.s32 1, %s1680_s12  }
 0x139   : > { %p10_p4 = scmp.ge.s32.totalorder %s13_s12, 4  }
 0x13b   :  { %12 = sbr.rel (!%p10_p4) target bundleno = 1 (0x1), region = 72 }

// kernel: transformer_encoder_unit.5
= control target key start
LH: loop header
LB: loop body
LE: loop exit
PB: predicated region body
PF: predicated region fallthrough
CT: control target
= control target key end

     0   :  { %s4031_s12 = smov 0   ;;  %s4707_s0 = inlined_call_operand.vmem [shape: f32[2,18,18,3], index: 0, kind: input, shape index: {}]   ;;  %s4708_s1 = inlined_call_operand.vmem [shape: bf16[9,3,32], index: 1, kind: input, shape index: {}]   ;;  %s4709_s2 = inlined_call_operand.vmem [shape: f32[1,32], index: 2, kind: input, shape index: {}]   ;;  %s4710_s3 = inlined_call_operand.vmem [shape: f32[2,256,32], index: 3, kind: output, shape index: {}]  }
   0x1 LB: > { %s2919_s13 = sadd.s32 4294967295, %s4008_s12   ;;  %p2923_p0 = scmp.ge.s32.totalorder %s4008_s12, 1  ;;  %s4008_s12 = sphi %s4031_s12, %s13_s12  }
   0x2   : > { %p137_p1 = scmp.lt.s32.totalorder %s4008_s12, 3 }
   0x4   : > { %p138_p2 = pnand %p2923_p0, %p137_p1 }
   0x5   : > { %v2927_v0 = vld [vmem:[%s4708_s1 + $0x2] sm:$0x3] (!%p138_p2)  ;;  %vm320_vm0 = vcmask (!%p138_p2), 1040384   ;;  %vm321_vm1 = vcmask (!%p138_p2), 1041408   ;;  %p161_p3 = scmp.lt.s32.totalorder (!%p138_p2), %s2919_s13, 1  ;;  %v4010_v1 = vmov (!%p138_p2), 65535  }
   0x6   : > { %141 = sbr.rel (%p138_p2) target bundleno = 524 (0x20c), region = 32  ;;  %v322_v2 = vsel (!%p138_p2), %vm320_vm0, 4294967295, %v4010_v1  ;;  %v3058_v3 = vld [vmem:[%s4708_s1 + $0x8] sm:$0x3] (!%p138_p2)  ;;  %v220_v4 = vld [vmem:[%s4708_s1] sm:$0x3] (!%p138_p2) }
   0x7   : > { %v4048_v5 = vsel (!%p138_p2), %vm321_vm1, %v322_v2, 0  ;;  %v3107_v6 = vld [vmem:[%s4708_s1 + $0xa] sm:$0x3] (!%p138_p2)  ;;  %v3156_v11 = vld [vmem:[%s4708_s1 + $0xc] sm:$0x3] (!%p138_p2)  ;;  %vm271_vm2 = vcmask (!%p138_p2), 23552  }
   0x8   : > { %v325_v7 = vand.u32 (!%p138_p2), %v2927_v0, %v4048_v5  ;;  %v4057_v8 = vand.u32 (!%p138_p2), %v3058_v3, %v4048_v5  ;;  %v537_v9 = vand.u32 (!%p138_p2), %v4048_v5, %v220_v4  ;;  %v1682_v10 = vand.u32 (!%p138_p2), %v3107_v6, %v4048_v5  ;;  %v2960_v12 = vld [vmem:[%s4708_s1 + $0x4] sm:$0x3] (!%p138_p2)  ;;  %v3205_v54 = vld [vmem:[%s4708_s1 + $0xe] sm:$0x3] (!%p138_p2) }
   0x9   : > { %v1977_v25 = vand.u32 (!%p138_p2), %v3156_v11, %v4048_v5  ;;  %v4092_v26 = vand.u32 (!%p138_p2), %v2960_v12, %v4048_v5  ;;  %v4169_v58 = vand.u32 (!%p138_p2), %v3205_v54, %v4048_v5  ;;  %vm2831_vm3 = vcmask (!%p138_p2), 261120  }
   0xa   : > { %3428 = vmatprep.subr.bf16.mxu1 (!%p138_p2), %v325_v7  ;;  %3564 = vmatprep.subr.bf16.mxu0 (!%p138_p2), %v4057_v8 }
   0xb   : > { %3429 = vmatpush3.bf16.msra.mxu1 (!%p138_p2), %v325_v7  ;;  %3565 = vmatpush3.bf16.msra.mxu0 (!%p138_p2), %v4057_v8 }
   0xc   : > { %3462 = vmatprep.subr.bf16.mxu1 (!%p138_p2), %v537_v9  ;;  %3598 = vmatprep.subr.bf16.mxu0 (!%p138_p2), %v1682_v10 }
   0xd   : > { %s4712_s13 = smov (!%p161_p3, %s2919_s13), 1 }
   0xe   : > { %s3992_s22 = smul.u32 432, %s4712_s13  ;;  %s3274_s11 = sshll.u32 %s4712_s13, 8 }
   0xf   : > { %s4603_s16 = scalar_lea.vmem %s4710_s3, %s3274_s11 }
  0x10   : > { %s4067_s25 = scalar_lea.vmem %s4707_s0, %s3992_s22 }
  0x11   : > { %v221_v13 = vld [vmem:[%s4067_s25 + $0x1] sm:$0xff]  ;;  %v222_v14 = vld [vmem:[%s4067_s25 + $0x9] sm:$0xff]  ;;  %v3026_v15 = vld [vmem:[%s4067_s25 + $0x19] sm:$0xff] }
  0x12   : > { %v253_v16 = vpack.c.bf16 %v222_v14, %v221_v13  ;;  %v3027_v17 = vld [vmem:[%s4067_s25 + $0x21] sm:$0xff]  ;;  %v3028_v18 = vld [vmem:[%s4067_s25 + $0x31] sm:$0xff]  ;;  %v3029_v19 = vld [vmem:[%s4067_s25 + $0x39] sm:$0xff] }
  0x13   : > { %v1321_v20 = vpack.c.bf16 %v3027_v17, %v3026_v15  ;;  %v4081_v21 = vpack.c.bf16 %v3029_v19, %v3028_v18  ;;  %v3030_v22 = vld [vmem:[%s4067_s25 + $0x49] sm:$0xff]  ;;  %v3031_v23 = vld [vmem:[%s4067_s25 + $0x51] sm:$0xff]  ;;  %v3032_v27 = vld [vmem:[%s4067_s25 + $0x61] sm:$0xff] }
  0x14   : > { %3430 = vmatprep.mubr.msk.bf16.mxu1 %vm271_vm2, %v253_v16  ;;  %v4086_v24 = vpack.c.bf16 %v3031_v23, %v3030_v22  ;;  %v3033_v28 = vld [vmem:[%s4067_s25 + $0x69] sm:$0xff]  ;;  %v3034_v29 = vld [vmem:[%s4067_s25 + $0x79] sm:$0xff]  ;;  %v3035_v30 = vld [vmem:[%s4067_s25 + $0x81] sm:$0xff] }
  0x15   : > { %3566 = vmatprep.mubr.msk.bf16.mxu0 %vm271_vm2, %v1321_v20  ;;  %3431 = vmatmul.mubr.msk.bf16.vlgmr.msra.gmra.mrb[0].mxu1 %vm271_vm2, %v1321_v20  ;;  %v4105_v31 = vpack.c.bf16 %v3033_v28, %v3032_v27  ;;  %v4107_v32 = vpack.c.bf16 %v3035_v30, %v3034_v29  ;;  %v3036_v33 = vld [vmem:[%s4067_s25 + $0x91] sm:$0xff]  ;;  %v3037_v34 = vld [vmem:[%s4067_s25 + $0x99] sm:$0xff]  ;;  %v3038_v35 = vld [vmem:[%s4067_s25 + $0xa9] sm:$0xff] }
  0x16   : > { %3463 = vmatpush3.bf16.msra.mxu1 %v537_v9  ;;  %3567 = vmatmul.mubr.msk.bf16.vlgmr.msra.gmra.mrb[0].mxu0 %vm271_vm2, %v4081_v21  ;;  %v3039_v36 = vld [vmem:[%s4067_s25 + $0xb1] sm:$0xff]  ;;  %v4121_v37 = vpack.c.bf16 %v3037_v34, %v3036_v33  ;;  %v3040_v39 = vld [vmem:[%s4067_s25 + $0xc1] sm:$0xff]  ;;  %v3041_v40 = vld [vmem:[%s4067_s25 + $0xc9] sm:$0xff] }
  0x17   : > { %3599 = vmatpush3.bf16.msra.mxu0 %v1682_v10  ;;  %3434 = vmatprep.mubr.msk.bf16.mxu1 %vm271_vm2, %v4081_v21  ;;  %v4123_v38 = vpack.c.bf16 %v3039_v36, %v3038_v35  ;;  %v3075_v41 = vld [vmem:[%s4067_s25 + $0x1a] sm:$0xff]  ;;  %v3076_v42 = vld [vmem:[%s4067_s25 + $0x22] sm:$0xff]  ;;  %v4137_v43 = vpack.c.bf16 %v3041_v40, %v3040_v39  ;;  %v3077_v47 = vld [vmem:[%s4067_s25 + $0x32] sm:$0xff] }
  0x18   : > { %3570 = vmatprep.mubr.msk.bf16.mxu0 %vm271_vm2, %v4086_v24  ;;  %3632 = vmatprep.subr.bf16.mxu0 %v1977_v25  ;;  %v4139_v44 = vpack.c.bf16 %v3076_v42, %v3075_v41  ;;  %v239_v45 = vld [vmem:[%s4067_s25 + $0xd9] sm:$0xff]  ;;  %v240_v46 = vld [vmem:[%s4067_s25 + $0xe1] sm:$0xff]  ;;  %v241_v49 = vld [vmem:[%s4067_s25 + $0xf1] sm:$0xff] }
  0x19   : > { %3496 = vmatprep.subr.bf16.mxu1 %v4092_v26  ;;  %v3078_v48 = vld [vmem:[%s4067_s25 + $0x3a] sm:$0xff]  ;;  %v3079_v51 = vld [vmem:[%s4067_s25 + $0x4a] sm:$0xff]  ;;  %v3080_v52 = vld [vmem:[%s4067_s25 + $0x52] sm:$0xff]  ;;  %v4157_v53 = vpack.c.bf16 %v240_v46, %v239_v45 }
  0x1a   : > { %v242_v50 = vld [vmem:[%s4067_s25 + $0xf9] sm:$0xff]  ;;  %v4162_v55 = vpack.c.bf16 %v3078_v48, %v3077_v47  ;;  %v4166_v57 = vpack.c.bf16 %v3080_v52, %v3079_v51  ;;  %v243_v59 = vld [vmem:[%s4067_s25 + $0x109] sm:$0xff]  ;;  %v244_v60 = vld [vmem:[%s4067_s25 + $0x111] sm:$0xff] }
  0x1b   : > { %v4164_v56 = vpack.c.bf16 %v242_v50, %v241_v49  ;;  %v3081_v61 = vld [vmem:[%s4067_s25 + $0x62] sm:$0xff]  ;;  %v3082_v62 = vld [vmem:[%s4067_s25 + $0x6a] sm:$0xff]  ;;  %v3083_v1 = vld [vmem:[%s4067_s25 + $0x7a] sm:$0xff]  ;;  %v4188_v3 = vpack.c.bf16 %v244_v60, %v243_v59 }
  0x1c   : > { %v245_v63 = vld [vmem:[%s4067_s25 + $0x121] sm:$0xff]  ;;  %v246_v0 = vld [vmem:[%s4067_s25 + $0x129] sm:$0xff]  ;;  %v4190_v4 = vpack.c.bf16 %v3082_v62, %v3081_v61  ;;  %v247_v9 = vld [vmem:[%s4067_s25 + $0x139] sm:$0xff] }
  0x1d   : > { %3435 = vmatmul.mubr.msk.bf16.gmra.mrb[4].mxu1 %vm271_vm2, %v4086_v24  ;;  %v3084_v2 = vld [vmem:[%s4067_s25 + $0x82] sm:$0xff]  ;;  %v4192_v6 = vpack.c.bf16 %v246_v0, %v245_v63  ;;  %v3085_v11 = vld [vmem:[%s4067_s25 + $0x92] sm:$0xff]  ;;  %v3086_v12 = vld [vmem:[%s4067_s25 + $0x9a] sm:$0xff] }
  0x1e   : > { %3571 = vmatmul.mubr.msk.bf16.gmra.mrb[4].mxu0 %vm271_vm2, %v4105_v31  ;;  %3438 = vmatprep.mubr.msk.bf16.mxu1 %vm271_vm2, %v4105_v31  ;;  %v4194_v7 = vpack.c.bf16 %v3084_v2, %v3083_v1  ;;  %v248_v10 = vld [vmem:[%s4067_s25 + $0x141] sm:$0xff]  ;;  %v249_v13 = vld [vmem:[%s4067_s25 + $0x151] sm:$0xff]  ;;  %v250_v14 = vld [vmem:[%s4067_s25 + $0x159] sm:$0xff]  ;;  %v4214_v18 = vpack.c.bf16 %v3086_v12, %v3085_v11 }
  0x1f   : > { %3574 = vmatprep.mubr.msk.bf16.mxu0 %vm271_vm2, %v4107_v32  ;;  %v3087_v15 = vld [vmem:[%s4067_s25 + $0xaa] sm:$0xff]  ;;  %v3088_v16 = vld [vmem:[%s4067_s25 + $0xb2] sm:$0xff]  ;;  %v4212_v17 = vpack.c.bf16 %v248_v10, %v247_v9  ;;  %v4216_v19 = vpack.c.bf16 %v250_v14, %v249_v13  ;;  %v172_v28 = vld [vmem:[%s4067_s25] sm:$0xff] }
  0x20   : > { %v4218_v20 = vpack.c.bf16 %v3088_v16, %v3087_v15  ;;  %v251_v22 = vld [vmem:[%s4067_s25 + $0x169] sm:$0xff]  ;;  %v252_v23 = vld [vmem:[%s4067_s25 + $0x171] sm:$0xff]  ;;  %v3091_v30 = vld [vmem:[%s4067_s25 + $0xda] sm:$0xff] }
  0x21   : > { %v3090_v27 = vld [vmem:[%s4067_s25 + $0xca] sm:$0xff]  ;;  %v3092_v33 = vld [vmem:[%s4067_s25 + $0xe2] sm:$0xff]  ;;  %v4236_v34 = vpack.c.bf16 %v252_v23, %v251_v22  ;;  %v174_v40 = vld [vmem:[%s4067_s25 + $0x18] sm:$0xff] }
  0x22   : > { %v173_v29 = vld [vmem:[%s4067_s25 + $0x8] sm:$0xff]  ;;  %v4240_v39 = vpack.c.bf16 %v3092_v33, %v3091_v30  ;;  %v175_v41 = vld [vmem:[%s4067_s25 + $0x20] sm:$0xff]  ;;  %v3093_v42 = vld [vmem:[%s4067_s25 + $0xf2] sm:$0xff] }
  0x23   : > { %v204_v36 = vpack.c.bf16 %v173_v29, %v172_v28  ;;  %v3094_v45 = vld [vmem:[%s4067_s25 + $0xfa] sm:$0xff]  ;;  %v176_v46 = vld [vmem:[%s4067_s25 + $0x30] sm:$0xff]  ;;  %v4257_v50 = vpack.c.bf16 %v175_v41, %v174_v40  ;;  %v3009_v51 = vld [vmem:[%s4708_s1 + $0x6] sm:$0x3] }
  0x24   : > { %v177_v47 = vld [vmem:[%s4067_s25 + $0x38] sm:$0xff]  ;;  %v3095_v48 = vld [vmem:[%s4067_s25 + $0x10a] sm:$0xff]  ;;  %v4262_v52 = vpack.c.bf16 %v3094_v45, %v3093_v42  ;;  %v4269_v60 = vand.u32 %v3009_v51, %v4048_v5  ;;  %v3097_v63 = vld [vmem:[%s4067_s25 + $0x122] sm:$0xff] }
  0x25   : > { %3439 = vmatmul.mubr.msk.bf16.gmra.mrb[8].mxu1 %vm271_vm2, %v4107_v32  ;;  %v3096_v49 = vld [vmem:[%s4067_s25 + $0x112] sm:$0xff]  ;;  %v4264_v54 = vpack.c.bf16 %v177_v47, %v176_v46  ;;  %v178_v61 = vld [vmem:[%s4067_s25 + $0x48] sm:$0xff]  ;;  %v180_v1 = vld [vmem:[%s4067_s25 + $0x60] sm:$0xff] }
  0x26   : > { %3575 = vmatmul.mubr.msk.bf16.gmra.mrb[8].mxu0 %vm271_vm2, %v4121_v37  ;;  %3442 = vmatprep.mubr.msk.bf16.mxu1 %vm271_vm2, %v4121_v37  ;;  %v4266_v59 = vpack.c.bf16 %v3096_v49, %v3095_v48  ;;  %v179_v62 = vld [vmem:[%s4067_s25 + $0x50] sm:$0xff]  ;;  %v181_v2 = vld [vmem:[%s4067_s25 + $0x68] sm:$0xff]  ;;  %v182_v14 = vld [vmem:[%s4067_s25 + $0x78] sm:$0xff] }
  0x27   : > { %3578 = vmatprep.mubr.msk.bf16.mxu0 %vm271_vm2, %v4123_v38  ;;  %v3098_v0 = vld [vmem:[%s4067_s25 + $0x12a] sm:$0xff]  ;;  %v3100_v9 = vld [vmem:[%s4067_s25 + $0x142] sm:$0xff]  ;;  %v4289_v10 = vpack.c.bf16 %v179_v62, %v178_v61  ;;  %v4293_v12 = vpack.c.bf16 %v181_v2, %v180_v1  ;;  %v3101_v16 = vld [vmem:[%s4067_s25 + $0x152] sm:$0xff] }
  0x28   : > { %v4291_v11 = vpack.c.bf16 %v3098_v0, %v3097_v63  ;;  %v183_v15 = vld [vmem:[%s4067_s25 + $0x80] sm:$0xff]  ;;  %v184_v23 = vld [vmem:[%s4067_s25 + $0x90] sm:$0xff]  ;;  %v186_v40 = vld [vmem:[%s4067_s25 + $0xa8] sm:$0xff] }
  0x29   : > { %v3102_v22 = vld [vmem:[%s4067_s25 + $0x15a] sm:$0xff]  ;;  %v3104_v28 = vld [vmem:[%s4067_s25 + $0x172] sm:$0xff]  ;;  %v4313_v29 = vpack.c.bf16 %v183_v15, %v182_v14  ;;  %v3105_v42 = vld [vmem:[%s4067_s25 + $0x182] sm:$0xff] }
  0x2a   : > { %v4315_v30 = vpack.c.bf16 %v3102_v22, %v3101_v16  ;;  %v187_v41 = vld [vmem:[%s4067_s25 + $0xb0] sm:$0xff]  ;;  %v188_v46 = vld [vmem:[%s4067_s25 + $0xc0] sm:$0xff]  ;;  %v189_v47 = vld [vmem:[%s4067_s25 + $0xc8] sm:$0xff] }
  0x2b   : > { %v3106_v45 = vld [vmem:[%s4067_s25 + $0x18a] sm:$0xff]  ;;  %v4335_v48 = vpack.c.bf16 %v187_v41, %v186_v40  ;;  %v4339_v51 = vpack.c.bf16 %v189_v47, %v188_v46  ;;  %v190_v61 = vld [vmem:[%s4067_s25 + $0xd8] sm:$0xff]  ;;  %v191_v62 = vld [vmem:[%s4067_s25 + $0xe0] sm:$0xff] }
  0x2c   : > { %v4337_v49 = vpack.c.bf16 %v3106_v45, %v3105_v42  ;;  %v192_v63 = vld [vmem:[%s4067_s25 + $0xf0] sm:$0xff]  ;;  %v193_v0 = vld [vmem:[%s4067_s25 + $0xf8] sm:$0xff]  ;;  %v4353_v1 = vpack.c.bf16 %v191_v62, %v190_v61  ;;  %v194_v14 = vld [vmem:[%s4067_s25 + $0x108] sm:$0xff] }
  0x2d   : > { %3443 = vmatmul.mubr.msk.bf16.gmra.mrb[12].mxu1 %vm271_vm2, %v4123_v38  ;;  %v3254_v2 = vld [vmem:[%s4708_s1 + $0x10] sm:$0x3]  ;;  %v197_v16 = vld [vmem:[%s4067_s25 + $0x128] sm:$0xff] }
  0x2e   : > { %3579 = vmatmul.mubr.msk.bf16.gmra.mrb[12].mxu0 %vm271_vm2, %v4137_v43  ;;  %3446 = vmatprep.mubr.msk.bf16.mxu1 %vm271_vm2, %v4137_v43  ;;  %v195_v15 = vld [vmem:[%s4067_s25 + $0x110] sm:$0xff]  ;;  %v202_v42 = vld [vmem:[%s4067_s25 + $0x168] sm:$0xff] }
  0x2f   : > { %3600 = vmatprep.mubr.msk.bf16.mxu0 %vm271_vm2, %v4139_v44  ;;  %v4377_v22 = vpack.c.bf16 %v195_v15, %v194_v14  ;;  %v203_v45 = vld [vmem:[%s4067_s25 + $0x170] sm:$0xff]  ;;  %v700_v46 = vld [vmem:[%s4067_s25 + $0x2] sm:$0xff] }
  0x30   : > { %v701_v47 = vld [vmem:[%s4067_s25 + $0xa] sm:$0xff]  ;;  %v4409_v61 = vpack.c.bf16 %v203_v45, %v202_v42 }
  0x31   : > { %v732_v62 = vpack.c.bf16 %v701_v47, %v700_v46 }
  0x35   : > { %3447 = vmatmul.mubr.msk.bf16.gmra.mrb[16].mxu1 %vm271_vm2, %v4157_v53 }
  0x36   : > { %3601 = vmatmul.mubr.msk.bf16.vlgmr.msra.gmra.mrb[0].mxu0 %vm271_vm2, %v4162_v55  ;;  %3450 = vmatprep.mubr.msk.bf16.mxu1 %vm271_vm2, %v4164_v56 }
  0x37   : > { %3633 = vmatpush3.bf16.msra.mxu0 %v1977_v25  ;;  %3604 = vmatprep.mubr.msk.bf16.mxu0 %vm271_vm2, %v4166_v57  ;;  %v3089_v25 = vld [vmem:[%s4067_s25 + $0xc2] sm:$0xff] }
  0x38   : > { %3666 = vmatprep.subr.bf16.mxu0 %v4169_v58  ;;  %v4238_v35 = vpack.c.bf16 %v3090_v27, %v3089_v25  ;;  %v185_v25 = vld [vmem:[%s4067_s25 + $0x98] sm:$0xff]  ;;  %v3103_v27 = vld [vmem:[%s4067_s25 + $0x16a] sm:$0xff] }
  0x39   : > { %v4317_v33 = vpack.c.bf16 %v185_v25, %v184_v23  ;;  %v199_v25 = vld [vmem:[%s4067_s25 + $0x140] sm:$0xff] }
  0x3d   : > { %3451 = vmatmul.mubr.msk.bf16.gmra.mrb[20].mxu1 %vm271_vm2, %v4188_v3 }
  0x3e   : > { %3605 = vmatmul.mubr.msk.bf16.gmra.mrb[4].mxu0 %vm271_vm2, %v4190_v4  ;;  %3454 = vmatprep.mubr.msk.bf16.mxu1 %vm271_vm2, %v4192_v6 }
  0x3f   : > { %3608 = vmatprep.mubr.msk.bf16.mxu0 %vm271_vm2, %v4194_v7 }
  0x45   : > { %3455 = vmatmul.mubr.msk.bf16.gmra.mrb[24].mxu1 %vm271_vm2, %v4212_v17 }
  0x46   : > { %3609 = vmatmul.mubr.msk.bf16.gmra.mrb[8].mxu0 %vm271_vm2, %v4214_v18  ;;  %3458 = vmatprep.mubr.msk.bf16.mxu1 %vm271_vm2, %v4216_v19 }
  0x47   : > { %3612 = vmatprep.mubr.msk.bf16.mxu0 %vm271_vm2, %v4218_v20 }
  0x4d   : > { %3459 = vmatmul.mubr.msk.bf16.gmra.mrb[28].mxu1 %vm271_vm2, %v4236_v34 }
  0x4e   : > { %3613 = vmatmul.mubr.msk.bf16.gmra.mrb[12].mxu0 %vm271_vm2, %v4238_v35  ;;  %3464 = vmatprep.mubr.msk.bf16.mxu1 %vm271_vm2, %v204_v36  ;;  %v4319_v36 = vpack.c.bf16 %v3104_v28, %v3103_v27  ;;  %v200_v27 = vld [vmem:[%s4067_s25 + $0x150] sm:$0xff]  ;;  %v201_v28 = vld [vmem:[%s4067_s25 + $0x158] sm:$0xff] }
  0x4f   : > { %3616 = vmatprep.mubr.msk.bf16.mxu0 %vm271_vm2, %v4240_v39  ;;  %v4395_v41 = vpack.c.bf16 %v201_v28, %v200_v27 }
  0x55   : > { %3465 = vmatmul.mubr.msk.bf16.vlgmr.msra.gmra.mrb[0].mxu1 %vm271_vm2, %v4257_v50 }
  0x56   : > { %3497 = vmatpush3.bf16.msra.mxu1 %v4092_v26  ;;  %3617 = vmatmul.mubr.msk.bf16.gmra.mrb[16].mxu0 %vm271_vm2, %v4262_v52  ;;  %v3099_v26 = vld [vmem:[%s4067_s25 + $0x13a] sm:$0xff] }
  0x57   : > { %3468 = vmatprep.mubr.msk.bf16.mxu1 %vm271_vm2, %v4264_v54  ;;  %3620 = vmatprep.mubr.msk.bf16.mxu0 %vm271_vm2, %v4266_v59  ;;  %v4295_v13 = vpack.c.bf16 %v3100_v9, %v3099_v26  ;;  %v4358_v26 = vpack.c.bf16 %v193_v0, %v192_v63  ;;  %v4361_v9 = vand.u32 %v3254_v2, %v4048_v5  ;;  %v196_v5 = vld [vmem:[%s4067_s25 + $0x120] sm:$0xff]  ;;  %v3154_v0 = vld [vmem:[%s4067_s25 + $0x198] sm:$0xff] }
  0x58   : > { %3530 = vmatprep.subr.bf16.mxu1 %v4269_v60  ;;  %v4379_v23 = vpack.c.bf16 %v197_v16, %v196_v5  ;;  %v3155_v2 = vld [vmem:[%s4067_s25 + $0x1a0] sm:$0xff] }
  0x59   : > { %v1925_v14 = vpack.c.bf16 %v3155_v2, %v3154_v0 }
  0x5d   : > { %3469 = vmatmul.mubr.msk.bf16.gmra.mrb[4].mxu1 %vm271_vm2, %v4289_v10 }
  0x5e   : > { %3621 = vmatmul.mubr.msk.bf16.gmra.mrb[20].mxu0 %vm271_vm2, %v4291_v11  ;;  %3472 = vmatprep.mubr.msk.bf16.mxu1 %vm271_vm2, %v4293_v12 }
  0x5f   : > { %3624 = vmatprep.mubr.msk.bf16.mxu0 %vm271_vm2, %v4295_v13 }
  0x65   : > { %3473 = vmatmul.mubr.msk.bf16.gmra.mrb[8].mxu1 %vm271_vm2, %v4313_v29 }
  0x66   : > { %3625 = vmatmul.mubr.msk.bf16.gmra.mrb[24].mxu0 %vm271_vm2, %v4315_v30  ;;  %3476 = vmatprep.mubr.msk.bf16.mxu1 %vm271_vm2, %v4317_v33 }
  0x67   : > { %3628 = vmatprep.mubr.msk.bf16.mxu0 %vm271_vm2, %v4319_v36 }
  0x6d   : > { %3477 = vmatmul.mubr.msk.bf16.gmra.mrb[12].mxu1 %vm271_vm2, %v4335_v48 }
  0x6e   : > { %3629 = vmatmul.mubr.msk.bf16.gmra.mrb[28].mxu0 %vm271_vm2, %v4337_v49  ;;  %3480 = vmatprep.mubr.msk.bf16.mxu1 %vm271_vm2, %v4339_v51 }
  0x6f   : > { %3634 = vmatprep.mubr.msk.bf16.mxu0 %vm271_vm2, %v4264_v54 }
  0x75   : > { %3481 = vmatmul.mubr.msk.bf16.gmra.mrb[16].mxu1 %vm271_vm2, %v4353_v1 }
  0x76   : > { %3635 = vmatmul.mubr.msk.bf16.vlgmr.msra.gmra.mrb[0].mxu0 %vm271_vm2, %v4289_v10  ;;  %3484 = vmatprep.mubr.msk.bf16.mxu1 %vm271_vm2, %v4358_v26 }
  0x77   : > { %3667 = vmatpush3.bf16.msra.mxu0 %v4169_v58  ;;  %3638 = vmatprep.mubr.msk.bf16.mxu0 %vm271_vm2, %v4293_v12  ;;  %v198_v58 = vld [vmem:[%s4067_s25 + $0x138] sm:$0xff] }
  0x78   : > { %3700 = vmatprep.subr.bf16.mxu0 %v4361_v9  ;;  %v4393_v40 = vpack.c.bf16 %v199_v25, %v198_v58 }
  0x7d   : > { %3485 = vmatmul.mubr.msk.bf16.gmra.mrb[20].mxu1 %vm271_vm2, %v4377_v22 }
  0x7e   : > { %3639 = vmatmul.mubr.msk.bf16.gmra.mrb[4].mxu0 %vm271_vm2, %v4313_v29  ;;  %3488 = vmatprep.mubr.msk.bf16.mxu1 %vm271_vm2, %v4379_v23 }
  0x7f   : > { %3642 = vmatprep.mubr.msk.bf16.mxu0 %vm271_vm2, %v4317_v33 }
  0x85   : > { %3489 = vmatmul.mubr.msk.bf16.gmra.mrb[24].mxu1 %vm271_vm2, %v4393_v40 }
  0x86   : > { %3643 = vmatmul.mubr.msk.bf16.gmra.mrb[8].mxu0 %vm271_vm2, %v4335_v48  ;;  %3492 = vmatprep.mubr.msk.bf16.mxu1 %vm271_vm2, %v4395_v41 }
  0x87   : > { %3646 = vmatprep.mubr.msk.bf16.mxu0 %vm271_vm2, %v4339_v51 }
  0x8d   : > { %3493 = vmatmul.mubr.msk.bf16.gmra.mrb[28].mxu1 %vm271_vm2, %v4409_v61 }
  0x8e   : > { %3647 = vmatmul.mubr.msk.bf16.gmra.mrb[12].mxu0 %vm271_vm2, %v4353_v1  ;;  %3498 = vmatprep.mubr.msk.bf16.mxu1 %vm271_vm2, %v732_v62 }
  0x8f   : > { %3650 = vmatprep.mubr.msk.bf16.mxu0 %vm271_vm2, %v4358_v26 }
  0x95   : > { %3499 = vmatmul.mubr.msk.bf16.vlgmr.msra.gmra.mrb[0].mxu1 %vm271_vm2, %v4139_v44  ;;  %v3152_v44 = vld [vmem:[%s4067_s25 + $0x180] sm:$0xff] }
  0x96   : > { %3531 = vmatpush3.bf16.msra.mxu1 %v4269_v60  ;;  %3651 = vmatmul.mubr.msk.bf16.gmra.mrb[16].mxu0 %vm271_vm2, %v4377_v22  ;;  %v3153_v60 = vld [vmem:[%s4067_s25 + $0x188] sm:$0xff] }
  0x97   : > { %3502 = vmatprep.mubr.msk.bf16.mxu1 %vm271_vm2, %v4162_v55  ;;  %3654 = vmatprep.mubr.msk.bf16.mxu0 %vm271_vm2, %v4379_v23  ;;  %v4438_v63 = vpack.c.bf16 %v3153_v60, %v3152_v44 }
  0x98   : > { %3734 = vmatprep.subr.bf16.mxu1 %v4057_v8 }
  0x9d   : > { %3503 = vmatmul.mubr.msk.bf16.gmra.mrb[4].mxu1 %vm271_vm2, %v4166_v57 }
  0x9e   : > { %3655 = vmatmul.mubr.msk.bf16.gmra.mrb[20].mxu0 %vm271_vm2, %v4393_v40  ;;  %3506 = vmatprep.mubr.msk.bf16.mxu1 %vm271_vm2, %v4190_v4 }
  0x9f   : > { %3658 = vmatprep.mubr.msk.bf16.mxu0 %vm271_vm2, %v4395_v41 }
  0xa5   : > { %3507 = vmatmul.mubr.msk.bf16.gmra.mrb[8].mxu1 %vm271_vm2, %v4194_v7 }
  0xa6   : > { %3659 = vmatmul.mubr.msk.bf16.gmra.mrb[24].mxu0 %vm271_vm2, %v4409_v61  ;;  %3510 = vmatprep.mubr.msk.bf16.mxu1 %vm271_vm2, %v4214_v18 }
  0xa7   : > { %3662 = vmatprep.mubr.msk.bf16.mxu0 %vm271_vm2, %v4438_v63 }
  0xad   : > { %3511 = vmatmul.mubr.msk.bf16.gmra.mrb[12].mxu1 %vm271_vm2, %v4218_v20 }
  0xae   : > { %3663 = vmatmul.mubr.msk.bf16.gmra.mrb[28].mxu0 %vm271_vm2, %v1925_v14  ;;  %3514 = vmatprep.mubr.msk.bf16.mxu1 %vm271_vm2, %v4238_v35 }
  0xaf   : > { %3668 = vmatprep.mubr.msk.bf16.mxu0 %vm271_vm2, %v4081_v21  ;;  %v3202_v21 = vld [vmem:[%s4067_s25 + $0x189] sm:$0xff] }
  0xb5   : > { %3515 = vmatmul.mubr.msk.bf16.gmra.mrb[16].mxu1 %vm271_vm2, %v4240_v39 }
  0xb6   : > { %3669 = vmatmul.mubr.msk.bf16.vlgmr.msra.gmra.mrb[0].mxu0 %vm271_vm2, %v4086_v24  ;;  %3518 = vmatprep.mubr.msk.bf16.mxu1 %vm271_vm2, %v4262_v52 }
  0xb7   : > { %3701 = vmatpush3.bf16.msra.mxu0 %v4361_v9  ;;  %3672 = vmatprep.mubr.msk.bf16.mxu0 %vm271_vm2, %v4105_v31  ;;  %v3203_v31 = vld [vmem:[%s4067_s25 + $0x199] sm:$0xff] }
  0xbd   : > { %3519 = vmatmul.mubr.msk.bf16.gmra.mrb[20].mxu1 %vm271_vm2, %v4266_v59 }
  0xbe   : > { %3673 = vmatmul.mubr.msk.bf16.gmra.mrb[4].mxu0 %vm271_vm2, %v4107_v32  ;;  %3522 = vmatprep.mubr.msk.bf16.mxu1 %vm271_vm2, %v4291_v11  ;;  %v3204_v32 = vld [vmem:[%s4067_s25 + $0x1a1] sm:$0xff] }
  0xbf   : > { %3676 = vmatprep.mubr.msk.bf16.mxu0 %vm271_vm2, %v4121_v37  ;;  %v2219_v37 = vpack.c.bf16 %v3204_v32, %v3203_v31 }
  0xc5   : > { %3523 = vmatmul.mubr.msk.bf16.gmra.mrb[24].mxu1 %vm271_vm2, %v4295_v13 }
  0xc6   : > { %3677 = vmatmul.mubr.msk.bf16.gmra.mrb[8].mxu0 %vm271_vm2, %v4123_v38  ;;  %3526 = vmatprep.mubr.msk.bf16.mxu1 %vm271_vm2, %v4315_v30  ;;  %v3252_v38 = vld [vmem:[%s4067_s25 + $0x19a] sm:$0xff] }
  0xc7   : > { %3680 = vmatprep.mubr.msk.bf16.mxu0 %vm271_vm2, %v4137_v43  ;;  %v3253_v43 = vld [vmem:[%s4067_s25 + $0x1a2] sm:$0xff] }
  0xcd   : > { %3527 = vmatmul.mubr.msk.bf16.gmra.mrb[28].mxu1 %vm271_vm2, %v4319_v36 }
  0xce   : > { %3681 = vmatmul.mubr.msk.bf16.gmra.mrb[12].mxu0 %vm271_vm2, %v4157_v53  ;;  %3532 = vmatprep.mubr.msk.bf16.mxu1 %vm271_vm2, %v4257_v50 }
  0xcf   : > { %3684 = vmatprep.mubr.msk.bf16.mxu0 %vm271_vm2, %v4164_v56 }
  0xd5   : > { %3533 = vmatmul.mubr.msk.bf16.vlgmr.msra.gmra.mrb[0].mxu1 %vm271_vm2, %v4264_v54 }
  0xd6   : > { %3735 = vmatpush3.bf16.msra.mxu1 %v4057_v8  ;;  %3685 = vmatmul.mubr.msk.bf16.gmra.mrb[16].mxu0 %vm271_vm2, %v4188_v3  ;;  %v3201_v8 = vld [vmem:[%s4067_s25 + $0x181] sm:$0xff] }
  0xd7   : > { %3536 = vmatprep.mubr.msk.bf16.mxu1 %vm271_vm2, %v4289_v10  ;;  %3688 = vmatprep.mubr.msk.bf16.mxu0 %vm271_vm2, %v4192_v6  ;;  %v2218_v24 = vpack.c.bf16 %v3202_v21, %v3201_v8 }
  0xdd   : > { %3537 = vmatmul.mubr.msk.bf16.gmra.mrb[4].mxu1 %vm271_vm2, %v4293_v12 }
  0xde   : > { %3689 = vmatmul.mubr.msk.bf16.gmra.mrb[20].mxu0 %vm271_vm2, %v4212_v17  ;;  %3540 = vmatprep.mubr.msk.bf16.mxu1 %vm271_vm2, %v4313_v29 }
  0xdf   : > { %3692 = vmatprep.mubr.msk.bf16.mxu0 %vm271_vm2, %v4216_v19 }
  0xe5   : > { %3541 = vmatmul.mubr.msk.bf16.gmra.mrb[8].mxu1 %vm271_vm2, %v4317_v33 }
  0xe6   : > { %3693 = vmatmul.mubr.msk.bf16.gmra.mrb[24].mxu0 %vm271_vm2, %v4236_v34  ;;  %3544 = vmatprep.mubr.msk.bf16.mxu1 %vm271_vm2, %v4335_v48 }
  0xe7   : > { %3696 = vmatprep.mubr.msk.bf16.mxu0 %vm271_vm2, %v2218_v24 }
  0xed   : > { %3545 = vmatmul.mubr.msk.bf16.gmra.mrb[12].mxu1 %vm271_vm2, %v4339_v51 }
  0xee   : > { %3697 = vmatmul.mubr.msk.bf16.gmra.mrb[28].mxu0 %vm271_vm2, %v2219_v37  ;;  %3548 = vmatprep.mubr.msk.bf16.mxu1 %vm271_vm2, %v4353_v1 }
  0xef   : > { %3702 = vmatprep.mubr.msk.bf16.mxu0 %vm271_vm2, %v4162_v55 }
  0xf5   : > { %3549 = vmatmul.mubr.msk.bf16.gmra.mrb[16].mxu1 %vm271_vm2, %v4358_v26 }
  0xf6   : > { %3703 = vmatmul.mubr.msk.bf16.vlgmr.msra.gmra.mrb[0].mxu0 %vm271_vm2, %v4166_v57  ;;  %3552 = vmatprep.mubr.msk.bf16.mxu1 %vm271_vm2, %v4377_v22 }
  0xf7   : > { %3706 = vmatprep.mubr.msk.bf16.mxu0 %vm271_vm2, %v4190_v4 }
  0xfd   : > { %3553 = vmatmul.mubr.msk.bf16.gmra.mrb[20].mxu1 %vm271_vm2, %v4379_v23 }
  0xfe   : > { %3707 = vmatmul.mubr.msk.bf16.gmra.mrb[4].mxu0 %vm271_vm2, %v4194_v7  ;;  %3556 = vmatprep.mubr.msk.bf16.mxu1 %vm271_vm2, %v4393_v40 }
  0xff   : > { %3710 = vmatprep.mubr.msk.bf16.mxu0 %vm271_vm2, %v4214_v18 }
 0x105   : > { %3557 = vmatmul.mubr.msk.bf16.gmra.mrb[24].mxu1 %vm271_vm2, %v4395_v41 }
 0x106   : > { %3711 = vmatmul.mubr.msk.bf16.gmra.mrb[8].mxu0 %vm271_vm2, %v4218_v20  ;;  %3560 = vmatprep.mubr.msk.bf16.mxu1 %vm271_vm2, %v4409_v61 }
 0x107   : > { %3714 = vmatprep.mubr.msk.bf16.mxu0 %vm271_vm2, %v4238_v35 }
 0x10d   : > { %3561 = vmatmul.mubr.msk.bf16.gmra.mrb[28].mxu1 %vm271_vm2, %v4438_v63 }
 0x10e   : > { %3715 = vmatmul.mubr.msk.bf16.gmra.mrb[12].mxu0 %vm271_vm2, %v4240_v39  ;;  %3582 = vmatprep.mubr.msk.bf16.mxu1 %vm271_vm2, %v4157_v53  ;;  %v2513_v53 = vpack.c.bf16 %v3253_v43, %v3252_v38 }
 0x10f   : > { %3718 = vmatprep.mubr.msk.bf16.mxu0 %vm271_vm2, %v4262_v52 }
 0x115   : > { %3583 = vmatmul.mubr.msk.bf16.vlgmr.msra.gmra.mrb[16].mxu1 %vm271_vm2, %v4164_v56 }
 0x116   : > { %3719 = vmatmul.mubr.msk.bf16.gmra.mrb[16].mxu0 %vm271_vm2, %v4266_v59  ;;  %3586 = vmatprep.mubr.msk.bf16.mxu1 %vm271_vm2, %v4188_v3  ;;  %v4596_v59 = vld [vmem:[%s4709_s2] ss:$0 sm:$0xff] }
 0x117   : > { %3722 = vmatprep.mubr.msk.bf16.mxu0 %vm271_vm2, %v4291_v11 }
 0x11d   : > { %3587 = vmatmul.mubr.msk.bf16.gmra.mrb[20].mxu1 %vm271_vm2, %v4192_v6 }
 0x11e   : > { %3723 = vmatmul.mubr.msk.bf16.gmra.mrb[20].mxu0 %vm271_vm2, %v4295_v13  ;;  %3590 = vmatprep.mubr.msk.bf16.mxu1 %vm271_vm2, %v4212_v17 }
 0x11f   : > { %3726 = vmatprep.mubr.msk.bf16.mxu0 %vm271_vm2, %v4315_v30 }
 0x125   : > { %3591 = vmatmul.mubr.msk.bf16.gmra.mrb[24].mxu1 %vm271_vm2, %v4216_v19 }
 0x126   : > { %3727 = vmatmul.mubr.msk.bf16.gmra.mrb[24].mxu0 %vm271_vm2, %v4319_v36  ;;  %3594 = vmatprep.mubr.msk.bf16.mxu1 %vm271_vm2, %v4236_v34 }
 0x127   : > { %3730 = vmatprep.mubr.msk.bf16.mxu0 %vm271_vm2, %v4337_v49 }
 0x12d   : > { %3595 = vmatmul.mubr.msk.bf16.gmra.mrb[28].mxu1 %vm271_vm2, %v2218_v24 }
 0x12e   : > { %3731 = vmatmul.mubr.msk.bf16.gmra.mrb[28].mxu0 %vm271_vm2, %v2513_v53 }
 0x1a8   : > { %v3534_v55 = vpop.f32.mrb[0].mxu1 }
 0x1a9   : > { %v1130_v56 = vpop.f32.mrb[1].mxu1 }
 0x1aa   : > { %v3535_v57 = vpop.f32.mrb[2].mxu1 }
 0x1ab   : > { %v1133_v3 = vpop.f32.mrb[3].mxu1 }
 0x1b0   : > { %v3538_v4 = vpop.f32.mrb[4].mxu1 }
 0x1b1   : > { %v1146_v6 = vpop.f32.mrb[5].mxu1 }
 0x1b2   : > { %v3539_v7 = vpop.f32.mrb[6].mxu1 }
 0x1b3   : > { %v1149_v17 = vpop.f32.mrb[7].mxu1 }
 0x1b8   : > { %v3542_v18 = vpop.f32.mrb[8].mxu1 }
 0x1b9   : > { %v1162_v19 = vpop.f32.mrb[9].mxu1 }
 0x1ba   : > { %v3543_v20 = vpop.f32.mrb[10].mxu1 }
 0x1bb   : > { %v1165_v34 = vpop.f32.mrb[11].mxu1 }
 0x1c0   : > { %v4585_v35 = vpop.f32.mrb[12].mxu1 }
 0x1c1   : > { %v4587_v39 = vpop.f32.mrb[13].mxu1 }
 0x1c2   : > { %v4589_v50 = vpop.f32.mrb[14].mxu1 }
 0x1c3   : > { %v4591_v52 = vpop.f32.mrb[15].mxu1 }
 0x1c9   : > { %v3704_v54 = vpop.f32.mrb[0].mxu0 }
 0x1ca   : > { %v3736_v10 = vadd.f32 %v3704_v54, %v3534_v55  ;;  %v2601_v11 = vpop.f32.mrb[1].mxu0 }
 0x1cb   : > { %v3737_v12 = vadd.f32 %v2601_v11, %v1130_v56  ;;  %v3705_v13 = vpop.f32.mrb[2].mxu0 }
 0x1cc   : > { %v2769_v29 = vadd.f32 %v3736_v10, %v4596_v59  ;;  %v3738_v30 = vadd.f32 %v3705_v13, %v3535_v57  ;;  %v2604_v33 = vpop.f32.mrb[3].mxu0 }
 0x1cd   : > { %v2767_v36 = vadd.f32 %v3737_v12, %v4596_v59  ;;  %v3739_v48 = vadd.f32 %v2604_v33, %v1133_v3 }
 0x1ce   : > { %v2801_v49 = vmax.f32 %v2769_v29, 0.0  ;;  %v2770_v51 = vadd.f32 %v3738_v30, %v4596_v59 }
 0x1cf   : > { %v2799_v1 = vmax.f32 %v2767_v36, 0.0  ;;  %v2768_v26 = vadd.f32 %v3739_v48, %v4596_v59 }
 0x1d0   : > { %2834 = vst.msk [vmem:[%s4603_s16 + $0x10] sm:$0xff] %vm2831_vm3, %v2801_v49  ;;  %v2802_v9 = vmax.f32 %v2770_v51, 0.0 }
 0x1d1   : > { %2832 = vst.msk [vmem:[%s4603_s16] sm:$0xff] %vm2831_vm3, %v2799_v1  ;;  %v2800_v15 = vmax.f32 %v2768_v26, 0.0  ;;  %v3708_v5 = vpop.f32.mrb[4].mxu0 }
 0x1d2   : > { %2835 = vst.msk [vmem:[%s4603_s16 + $0x18] sm:$0xff] %vm2831_vm3, %v2802_v9  ;;  %v3740_v16 = vadd.f32 %v3708_v5, %v3538_v4  ;;  %v2617_v22 = vpop.f32.mrb[5].mxu0 }
 0x1d3   : > { %2833 = vst.msk [vmem:[%s4603_s16 + $0x8] sm:$0xff] %vm2831_vm3, %v2800_v15  ;;  %v3741_v23 = vadd.f32 %v2617_v22, %v1146_v6  ;;  %v3709_v58 = vpop.f32.mrb[6].mxu0 }
 0x1d4   : > { %v2773_v25 = vadd.f32 %v3740_v16, %v4596_v59  ;;  %v3742_v27 = vadd.f32 %v3709_v58, %v3539_v7  ;;  %v2620_v28 = vpop.f32.mrb[7].mxu0 }
 0x1d5   : > { %v2771_v40 = vadd.f32 %v3741_v23, %v4596_v59  ;;  %v3743_v41 = vadd.f32 %v2620_v28, %v1149_v17 }
 0x1d6   : > { %v2805_v42 = vmax.f32 %v2773_v25, 0.0  ;;  %v2774_v45 = vadd.f32 %v3742_v27, %v4596_v59 }
 0x1d7   : > { %v2803_v46 = vmax.f32 %v2771_v40, 0.0  ;;  %v2772_v47 = vadd.f32 %v3743_v41, %v4596_v59 }
 0x1d8   : > { %2838 = vst.msk [vmem:[%s4603_s16 + $0x30] sm:$0xff] %vm2831_vm3, %v2805_v42  ;;  %v2806_v61 = vmax.f32 %v2774_v45, 0.0 }
 0x1d9   : > { %2836 = vst.msk [vmem:[%s4603_s16 + $0x20] sm:$0xff] %vm2831_vm3, %v2803_v46  ;;  %v2804_v62 = vmax.f32 %v2772_v47, 0.0  ;;  %v3712_v44 = vpop.f32.mrb[8].mxu0 }
 0x1da   : > { %2839 = vst.msk [vmem:[%s4603_s16 + $0x38] sm:$0xff] %vm2831_vm3, %v2806_v61  ;;  %v3744_v60 = vadd.f32 %v3712_v44, %v3542_v18  ;;  %v2633_v63 = vpop.f32.mrb[9].mxu0 }
 0x1db   : > { %2837 = vst.msk [vmem:[%s4603_s16 + $0x28] sm:$0xff] %vm2831_vm3, %v2804_v62  ;;  %v3745_v0 = vadd.f32 %v2633_v63, %v1162_v19  ;;  %v3713_v2 = vpop.f32.mrb[10].mxu0 }
 0x1dc   : > { %v2777_v14 = vadd.f32 %v3744_v60, %v4596_v59  ;;  %v3746_v8 = vadd.f32 %v3713_v2, %v3543_v20  ;;  %v2636_v21 = vpop.f32.mrb[11].mxu0 }
 0x1dd   : > { %v2775_v24 = vadd.f32 %v3745_v0, %v4596_v59  ;;  %v3747_v31 = vadd.f32 %v2636_v21, %v1165_v34 }
 0x1de   : > { %v2809_v32 = vmax.f32 %v2777_v14, 0.0  ;;  %v2778_v37 = vadd.f32 %v3746_v8, %v4596_v59 }
 0x1df   : > { %v2807_v38 = vmax.f32 %v2775_v24, 0.0  ;;  %v2776_v43 = vadd.f32 %v3747_v31, %v4596_v59 }
 0x1e0   : > { %2842 = vst.msk [vmem:[%s4603_s16 + $0x50] sm:$0xff] %vm2831_vm3, %v2809_v32  ;;  %v2810_v53 = vmax.f32 %v2778_v37, 0.0 }
 0x1e1   : > { %2840 = vst.msk [vmem:[%s4603_s16 + $0x40] sm:$0xff] %vm2831_vm3, %v2807_v38  ;;  %v2808_v55 = vmax.f32 %v2776_v43, 0.0  ;;  %v3716_v56 = vpop.f32.mrb[12].mxu0 }
 0x1e2   : > { %2843 = vst.msk [vmem:[%s4603_s16 + $0x58] sm:$0xff] %vm2831_vm3, %v2810_v53  ;;  %v3748_v57 = vadd.f32 %v3716_v56, %v4585_v35  ;;  %v2649_v3 = vpop.f32.mrb[13].mxu0 }
 0x1e3   : > { %2841 = vst.msk [vmem:[%s4603_s16 + $0x48] sm:$0xff] %vm2831_vm3, %v2808_v55  ;;  %v3749_v4 = vadd.f32 %v2649_v3, %v4587_v39  ;;  %v3717_v6 = vpop.f32.mrb[14].mxu0 }
 0x1e4   : > { %v2781_v7 = vadd.f32 %v3748_v57, %v4596_v59  ;;  %v3750_v17 = vadd.f32 %v3717_v6, %v4589_v50  ;;  %v2652_v18 = vpop.f32.mrb[15].mxu0 }
 0x1e5   : > { %v2779_v19 = vadd.f32 %v3749_v4, %v4596_v59  ;;  %v3751_v20 = vadd.f32 %v2652_v18, %v4591_v52 }
 0x1e6   : > { %v2813_v34 = vmax.f32 %v2781_v7, 0.0  ;;  %v2782_v35 = vadd.f32 %v3750_v17, %v4596_v59 }
 0x1e7   : > { %v2811_v54 = vmax.f32 %v2779_v19, 0.0  ;;  %v2780_v10 = vadd.f32 %v3751_v20, %v4596_v59 }
 0x1e8   : > { %2846 = vst.msk [vmem:[%s4603_s16 + $0x70] sm:$0xff] %vm2831_vm3, %v2813_v34  ;;  %v2814_v39 = vmax.f32 %v2782_v35, 0.0  ;;  %v3584_v11 = vpop.f32.mrb[16].mxu1 }
 0x1e9   : > { %2844 = vst.msk [vmem:[%s4603_s16 + $0x60] sm:$0xff] %vm2831_vm3, %v2811_v54  ;;  %v2812_v12 = vmax.f32 %v2780_v10, 0.0  ;;  %v3720_v50 = vpop.f32.mrb[16].mxu0  ;;  %v1488_v13 = vpop.f32.mrb[17].mxu1 }
 0x1ea   : > { %2847 = vst.msk [vmem:[%s4603_s16 + $0x78] sm:$0xff] %vm2831_vm3, %v2814_v39  ;;  %v3752_v29 = vadd.f32 %v3720_v50, %v3584_v11  ;;  %v2665_v52 = vpop.f32.mrb[17].mxu0  ;;  %v3585_v30 = vpop.f32.mrb[18].mxu1 }
 0x1eb   : > { %2845 = vst.msk [vmem:[%s4603_s16 + $0x68] sm:$0xff] %vm2831_vm3, %v2812_v12  ;;  %v3753_v33 = vadd.f32 %v2665_v52, %v1488_v13  ;;  %v3721_v36 = vpop.f32.mrb[18].mxu0  ;;  %v1491_v48 = vpop.f32.mrb[19].mxu1 }
 0x1ec   : > { %v2785_v49 = vadd.f32 %v3752_v29, %v4596_v59  ;;  %v3754_v51 = vadd.f32 %v3721_v36, %v3585_v30  ;;  %v2668_v1 = vpop.f32.mrb[19].mxu0 }
 0x1ed   : > { %v2783_v26 = vadd.f32 %v3753_v33, %v4596_v59  ;;  %v3755_v9 = vadd.f32 %v2668_v1, %v1491_v48 }
 0x1ee   : > { %v2817_v15 = vmax.f32 %v2785_v49, 0.0  ;;  %v2786_v5 = vadd.f32 %v3754_v51, %v4596_v59 }
 0x1ef   : > { %v2815_v16 = vmax.f32 %v2783_v26, 0.0  ;;  %v2784_v22 = vadd.f32 %v3755_v9, %v4596_v59 }
 0x1f0   : > { %2850 = vst.msk [vmem:[%s4603_s16 + $0x90] sm:$0xff] %vm2831_vm3, %v2817_v15  ;;  %v2818_v23 = vmax.f32 %v2786_v5, 0.0  ;;  %v3588_v58 = vpop.f32.mrb[20].mxu1 }
 0x1f1   : > { %2848 = vst.msk [vmem:[%s4603_s16 + $0x80] sm:$0xff] %vm2831_vm3, %v2815_v16  ;;  %v2816_v25 = vmax.f32 %v2784_v22, 0.0  ;;  %v3724_v27 = vpop.f32.mrb[20].mxu0  ;;  %v1504_v28 = vpop.f32.mrb[21].mxu1 }
 0x1f2   : > { %2851 = vst.msk [vmem:[%s4603_s16 + $0x98] sm:$0xff] %vm2831_vm3, %v2818_v23  ;;  %v3756_v40 = vadd.f32 %v3724_v27, %v3588_v58  ;;  %v2681_v41 = vpop.f32.mrb[21].mxu0  ;;  %v3589_v42 = vpop.f32.mrb[22].mxu1 }
 0x1f3   : > { %2849 = vst.msk [vmem:[%s4603_s16 + $0x88] sm:$0xff] %vm2831_vm3, %v2816_v25  ;;  %v3757_v45 = vadd.f32 %v2681_v41, %v1504_v28  ;;  %v3725_v46 = vpop.f32.mrb[22].mxu0  ;;  %v1507_v47 = vpop.f32.mrb[23].mxu1 }
 0x1f4   : > { %v2789_v61 = vadd.f32 %v3756_v40, %v4596_v59  ;;  %v3758_v62 = vadd.f32 %v3725_v46, %v3589_v42  ;;  %v2684_v44 = vpop.f32.mrb[23].mxu0 }
 0x1f5   : > { %v2787_v60 = vadd.f32 %v3757_v45, %v4596_v59  ;;  %v3759_v63 = vadd.f32 %v2684_v44, %v1507_v47 }
 0x1f6   : > { %v2821_v0 = vmax.f32 %v2789_v61, 0.0  ;;  %v2790_v2 = vadd.f32 %v3758_v62, %v4596_v59 }
 0x1f7   : > { %v2819_v14 = vmax.f32 %v2787_v60, 0.0  ;;  %v2788_v8 = vadd.f32 %v3759_v63, %v4596_v59 }
 0x1f8   : > { %2854 = vst.msk [vmem:[%s4603_s16 + $0xb0] sm:$0xff] %vm2831_vm3, %v2821_v0  ;;  %v2822_v21 = vmax.f32 %v2790_v2, 0.0  ;;  %v3592_v24 = vpop.f32.mrb[24].mxu1 }
 0x1f9   : > { %2852 = vst.msk [vmem:[%s4603_s16 + $0xa0] sm:$0xff] %vm2831_vm3, %v2819_v14  ;;  %v2820_v31 = vmax.f32 %v2788_v8, 0.0  ;;  %v3728_v32 = vpop.f32.mrb[24].mxu0  ;;  %v1520_v37 = vpop.f32.mrb[25].mxu1 }
 0x1fa   : > { %2855 = vst.msk [vmem:[%s4603_s16 + $0xb8] sm:$0xff] %vm2831_vm3, %v2822_v21  ;;  %v3760_v38 = vadd.f32 %v3728_v32, %v3592_v24  ;;  %v2697_v43 = vpop.f32.mrb[25].mxu0  ;;  %v3593_v53 = vpop.f32.mrb[26].mxu1 }
 0x1fb   : > { %2853 = vst.msk [vmem:[%s4603_s16 + $0xa8] sm:$0xff] %vm2831_vm3, %v2820_v31  ;;  %v3761_v55 = vadd.f32 %v2697_v43, %v1520_v37  ;;  %v3729_v56 = vpop.f32.mrb[26].mxu0  ;;  %v1523_v57 = vpop.f32.mrb[27].mxu1 }
 0x1fc   : > { %v2793_v3 = vadd.f32 %v3760_v38, %v4596_v59  ;;  %v3762_v4 = vadd.f32 %v3729_v56, %v3593_v53  ;;  %v2700_v6 = vpop.f32.mrb[27].mxu0 }
 0x1fd   : > { %v2791_v7 = vadd.f32 %v3761_v55, %v4596_v59  ;;  %v3763_v17 = vadd.f32 %v2700_v6, %v1523_v57 }
 0x1fe   : > { %v2825_v18 = vmax.f32 %v2793_v3, 0.0  ;;  %v2794_v19 = vadd.f32 %v3762_v4, %v4596_v59 }
 0x1ff   : > { %v2823_v20 = vmax.f32 %v2791_v7, 0.0  ;;  %v2792_v34 = vadd.f32 %v3763_v17, %v4596_v59 }
 0x200   : > { %2858 = vst.msk [vmem:[%s4603_s16 + $0xd0] sm:$0xff] %vm2831_vm3, %v2825_v18  ;;  %v2826_v35 = vmax.f32 %v2794_v19, 0.0  ;;  %v3596_v54 = vpop.f32.mrb[28].mxu1 }
 0x201   : > { %2856 = vst.msk [vmem:[%s4603_s16 + $0xc0] sm:$0xff] %vm2831_vm3, %v2823_v20  ;;  %v2824_v10 = vmax.f32 %v2792_v34, 0.0  ;;  %v3732_v39 = vpop.f32.mrb[28].mxu0  ;;  %v1536_v11 = vpop.f32.mrb[29].mxu1 }
 0x202   : > { %2859 = vst.msk [vmem:[%s4603_s16 + $0xd8] sm:$0xff] %vm2831_vm3, %v2826_v35  ;;  %v3764_v12 = vadd.f32 %v3732_v39, %v3596_v54  ;;  %v2713_v50 = vpop.f32.mrb[29].mxu0  ;;  %v3597_v13 = vpop.f32.mrb[30].mxu1 }
 0x203   : > { %2857 = vst.msk [vmem:[%s4603_s16 + $0xc8] sm:$0xff] %vm2831_vm3, %v2824_v10  ;;  %v3765_v29 = vadd.f32 %v2713_v50, %v1536_v11  ;;  %v3733_v52 = vpop.f32.mrb[30].mxu0  ;;  %v1539_v30 = vpop.f32.mrb[31].mxu1 }
 0x204   : > { %v2797_v33 = vadd.f32 %v3764_v12, %v4596_v59  ;;  %v3766_v36 = vadd.f32 %v3733_v52, %v3597_v13  ;;  %v2716_v48 = vpop.f32.mrb[31].mxu0 }
 0x205   : > { %v2795_v49 = vadd.f32 %v3765_v29, %v4596_v59  ;;  %v3767_v51 = vadd.f32 %v2716_v48, %v1539_v30 }
 0x206   : > { %v2829_v1 = vmax.f32 %v2797_v33, 0.0  ;;  %v2798_v26 = vadd.f32 %v3766_v36, %v4596_v59 }
 0x207   : > { %v2827_v9 = vmax.f32 %v2795_v49, 0.0  ;;  %v2796_v15 = vadd.f32 %v3767_v51, %v4596_v59 }
 0x208   : > { %2862 = vst.msk [vmem:[%s4603_s16 + $0xf0] sm:$0xff] %vm2831_vm3, %v2829_v1  ;;  %v2830_v5 = vmax.f32 %v2798_v26, 0.0 }
 0x209   : > { %2860 = vst.msk [vmem:[%s4603_s16 + $0xe0] sm:$0xff] %vm2831_vm3, %v2827_v9  ;;  %v2828_v16 = vmax.f32 %v2796_v15, 0.0 }
 0x20a   : > { %2863 = vst.msk [vmem:[%s4603_s16 + $0xf8] sm:$0xff] %vm2831_vm3, %v2830_v5 }
 0x20b   : > { %2861 = vst.msk [vmem:[%s4603_s16 + $0xe8] sm:$0xff] %vm2831_vm3, %v2828_v16 }
 0x20c PF: > { %s13_s12 = sadd.s32 1, %s4008_s12  }
 0x20d   : > { %p10_p4 = scmp.ge.s32.totalorder %s13_s12, 4  }
 0x20f   :  { %12 = sbr.rel (!%p10_p4) target bundleno = 1 (0x1), region = 72 }

// kernel: transformer_encoder_unit.8
= control target key start
LH: loop header
LB: loop body
LE: loop exit
PB: predicated region body
PF: predicated region fallthrough
CT: control target
= control target key end

     0   :  { %vm101_vm0 = vcmask 523264   ;;  %vm277_vm1 = vcmask 519168   ;;  %vm314_vm2 = vcmask 516096   ;;  %s549_s3 = inlined_call_operand.vmem [shape: bf16[64,64], index: 3, kind: input, shape index: {}]   ;;  %s550_s0 = inlined_call_operand.vmem [shape: bf16[32,64], index: 0, kind: input, shape index: {}]   ;;  %s551_s1 = inlined_call_operand.vmem [shape: f32[1,64], index: 1, kind: input, shape index: {}]   ;;  %s552_s2 = inlined_call_operand.vmem [shape: f32[1,64], index: 2, kind: input, shape index: {}]   ;;  %s553_s5 = inlined_call_operand.vmem [shape: bf16[64,64], index: 5, kind: input, shape index: {}]   ;;  %s554_s4 = inlined_call_operand.vmem [shape: f32[1,64], index: 4, kind: input, shape index: {}]   ;;  %s555_s6 = inlined_call_operand.vmem [shape: f32[1,64], index: 6, kind: input, shape index: {}]   ;;  %s556_s7 = inlined_call_operand.vmem [shape: bf16[32,64], index: 7, kind: output, shape index: {0}]   ;;  %s557_s8 = inlined_call_operand.vmem [shape: f32[1,1,64], index: 8, kind: output, shape index: {1}]   ;;  %s558_s9 = inlined_call_operand.vmem [shape: f32[1,1,64], index: 9, kind: output, shape index: {2}]  }
   0x1   :  { %v415_v0 = vld [vmem:[%s549_s3] sm:$0xff]   ;;  %v416_v1 = vld [vmem:[%s549_s3 + $0x8] sm:$0xff]   ;;  %v417_v2 = vld [vmem:[%s549_s3 + $0x10] sm:$0xff]  }
   0x2   :  { %391 = vmatprep.subr.bf16.mxu0 %v415_v0  ;;  %v371_v3 = vld [vmem:[%s550_s0] sm:$0xff]   ;;  %v378_v4 = vld [vmem:[%s550_s0 + $0x8] sm:$0xff]   ;;  %v418_v17 = vld [vmem:[%s549_s3 + $0x18] sm:$0xff]  }
   0x3   :  { %392 = vmatpush3.bf16.msra.mxu0 %v415_v0  ;;  %v346_v5 = vld [vmem:[%s551_s1] ss:$0 sm:$0xff]  ;;  %v372_v6 = vunpack.c.l.bf16 %v371_v3  ;;  %v373_v7 = vunpack.c.h.bf16 %v371_v3  ;;  %v376_v8 = vunpack.c.l.bf16 %v378_v4  ;;  %v377_v9 = vunpack.c.h.bf16 %v378_v4  ;;  %v420_v16 = vld [vmem:[%s553_s5 + $0x8] sm:$0xff]   ;;  %v421_v24 = vld [vmem:[%s553_s5 + $0x10] sm:$0xff]  }
   0x4   :  { %393 = vmatprep.subr.bf16.mxu0 %v416_v1  ;;  %v347_v10 = vld [vmem:[%s552_s2] ss:$0 sm:$0xff]  ;;  %v422_v25 = vld [vmem:[%s553_s5 + $0x18] sm:$0xff]  }
   0x5   :  { %v419_v11 = vld [vmem:[%s553_s5] sm:$0xff]   ;;  %v45_v12 = vmul.f32 %v372_v6, %v346_v5  ;;  %v46_v13 = vmul.f32 %v373_v7, %v346_v5  ;;  %v47_v14 = vmul.f32 %v376_v8, %v346_v5  ;;  %v48_v15 = vmul.f32 %v377_v9, %v346_v5 }
   0x6   :  { %403 = vmatprep.subr.bf16.mxu1 %v419_v11  ;;  %v348_v26 = vld [vmem:[%s554_s4] ss:$0 sm:$0xff] }
   0x7   :  { %394 = vmatpush3.bf16.msra.mxu0 %v416_v1  ;;  %v56_v18 = vadd.f32 %v347_v10, %v45_v12  ;;  %v57_v19 = vadd.f32 %v347_v10, %v46_v13  ;;  %404 = vmatpush3.bf16.msra.mxu1 %v419_v11  ;;  %v58_v20 = vadd.f32 %v347_v10, %v47_v14  ;;  %v355_v41 = vld [vmem:[%s555_s6] ss:$0 sm:$0xff] }
   0x8   :  { %395 = vmatprep.subr.bf16.mxu0 %v417_v2  ;;  %v59_v21 = vadd.f32 %v347_v10, %v48_v15  ;;  %405 = vmatprep.subr.bf16.mxu1 %v420_v16 }
   0x9   :  { %v60_v22 = vpack.c.bf16 %v57_v19, %v56_v18 }
   0xa   :  { %v61_v23 = vpack.c.bf16 %v59_v21, %v58_v20 }
   0xb   :  { %396 = vmatpush3.bf16.msra.mxu0 %v417_v2  ;;  %399 = vmatprep.mubr.msk.bf16.mxu0 %vm101_vm0, %v60_v22 }
   0xc   :  { %397 = vmatprep.subr.bf16.mxu0 %v418_v17  ;;  %406 = vmatpush3.bf16.msra.mxu1 %v420_v16 }
   0xd   :  { %407 = vmatprep.subr.bf16.mxu1 %v421_v24 }
   0xf   :  { %398 = vmatpush3.bf16.msra.mxu0 %v418_v17 }
  0x10   :  { %408 = vmatpush3.bf16.msra.mxu1 %v421_v24 }
  0x11   :  { %409 = vmatprep.subr.bf16.mxu1 %v422_v25 }
  0x12   :  { %400 = vmatmul.mubr.msk.bf16.vlgmr.msra.gmra.mrb[0].mxu0 %vm101_vm0, %v61_v23 }
  0x14   :  { %410 = vmatpush3.bf16.msra.mxu1 %v422_v25 }
  0xe5   :  { %v401_v27 = vpop.f32.mrb[0].mxu0 }
  0xe6   :  { %v151_v28 = vadd.f32 %v401_v27, %v348_v26  ;;  %v142_v29 = vpop.f32.mrb[1].mxu0 }
  0xe7   :  { %v143_v30 = vadd.f32 %v348_v26, %v142_v29  ;;  %v402_v31 = vpop.f32.mrb[2].mxu0 }
  0xe8   :  { %v154_v32 = vadd.f32 %v402_v31, %v348_v26  ;;  %v145_v33 = vpop.f32.mrb[3].mxu0  ;;  %v159_v35 = vmax.f32 %v151_v28, 0.0 }
  0xe9   :  { %v146_v34 = vadd.f32 %v348_v26, %v145_v33  ;;  %v157_v37 = vmax.f32 %v143_v30, 0.0 }
  0xea   :  { %v160_v36 = vmax.f32 %v154_v32, 0.0 }
  0xeb   :  { %v158_v38 = vmax.f32 %v146_v34, 0.0 }
  0xec   :  { %v162_v39 = vpack.c.bf16 %v160_v36, %v159_v35 }
  0xed   :  { %v161_v40 = vpack.c.bf16 %v158_v38, %v157_v37 }
  0xef   :  { %411 = vmatprep.mubr.msk.bf16.mxu1 %vm101_vm0, %v161_v40 }
  0xf0   :  { %412 = vmatmul.mubr.msk.bf16.vlgmr.msra.gmra.mrb[0].mxu1 %vm101_vm0, %v162_v39 }
 0x1c3   :  { %v413_v42 = vpop.f32.mrb[0].mxu1 }
 0x1c4   :  { %v251_v43 = vadd.f32 %v413_v42, %v355_v41  ;;  %v242_v44 = vpop.f32.mrb[1].mxu1 }
 0x1c5   :  { %v243_v45 = vadd.f32 %v355_v41, %v242_v44  ;;  %v414_v46 = vpop.f32.mrb[2].mxu1 }
 0x1c6   :  { %v259_v47 = vadd.f32 %v251_v43, %v58_v20  ;;  %v254_v48 = vadd.f32 %v414_v46, %v355_v41  ;;  %v245_v49 = vpop.f32.mrb[3].mxu1 }
 0x1c7   :  { %v257_v50 = vadd.f32 %v243_v45, %v56_v18  ;;  %v246_v51 = vadd.f32 %v355_v41, %v245_v49 }
 0x1c8   :  { %v368_v52 = vpack.c.bf16 %v259_v47, %v259_v47  ;;  %v260_v53 = vadd.f32 %v254_v48, %v59_v21  ;;  %v318_v57 = vmul.f32 %v259_v47, %v259_v47  ;;  %v304_v0 = vsel %vm101_vm0, %v259_v47, 0.0 }
 0x1c9   :  { %v366_v54 = vpack.c.bf16 %v257_v50, %v257_v50  ;;  %v316_v55 = vmul.f32 %v257_v50, %v257_v50  ;;  %v258_v56 = vadd.f32 %v246_v51, %v57_v19  ;;  %v301_v59 = vsel %vm101_vm0, %v257_v50, 0.0 }
 0x1ca   :  { %280 = vst.msk [vmem:[%s556_s7 + $0x8] sm:$0xf] %vm277_vm1, %v368_v52  ;;  %v369_v58 = vpack.c.bf16 %v260_v53, %v260_v53  ;;  %v319_v2 = vmul.f32 %v260_v53, %v260_v53  ;;  %v323_v6 = vsel %vm101_vm0, %v318_v57, 0.0  ;;  %v306_v7 = vsel %vm101_vm0, %v260_v53, 0.0 }
 0x1cb   :  { %278 = vst.msk [vmem:[%s556_s7] sm:$0xf] %vm277_vm1, %v366_v54  ;;  %v367_v60 = vpack.c.bf16 %v258_v56, %v258_v56  ;;  %v302_v61 = vsel %vm101_vm0, %v258_v56, 0.0  ;;  %v317_v62 = vmul.f32 %v258_v56, %v258_v56  ;;  %v320_v1 = vsel %vm101_vm0, %v316_v55, 0.0 }
 0x1cc   :  { %281 = vst.msk [vmem:[%s556_s7 + $0xc] sm:$0xf] %vm277_vm1, %v369_v58  ;;  %v303_v63 = vadd.f32 %v302_v61, %v301_v59  ;;  %v325_v10 = vsel %vm101_vm0, %v319_v2, 0.0 }
 0x1cd   :  { %279 = vst.msk [vmem:[%s556_s7 + $0x4] sm:$0xf] %vm277_vm1, %v367_v60  ;;  %v321_v3 = vsel %vm101_vm0, %v317_v62, 0.0 }
 0x1ce   :  { %v305_v4 = vadd.f32 %v304_v0, %v303_v63  ;;  %v322_v5 = vadd.f32 %v321_v3, %v320_v1 }
 0x1d0   :  { %v307_v8 = vadd.f32 %v306_v7, %v305_v4  ;;  %v324_v9 = vadd.f32 %v323_v6, %v322_v5 }
 0x1d2   :  { %v308_v11 = vrot.slane %v307_v8, 4  ;;  %v326_v12 = vadd.f32 %v325_v10, %v324_v9 }
 0x1d4   :  { %v309_v13 = vadd.f32 %v308_v11, %v307_v8  ;;  %v327_v14 = vrot.slane %v326_v12, 4 }
 0x1d6   :  { %v310_v15 = vrot.slane %v309_v13, 2  ;;  %v328_v16 = vadd.f32 %v327_v14, %v326_v12 }
 0x1d8   :  { %v311_v17 = vadd.f32 %v310_v15, %v309_v13  ;;  %v329_v18 = vrot.slane %v328_v16, 2 }
 0x1da   :  { %v312_v19 = vrot.slane %v311_v17, 1  ;;  %v330_v20 = vadd.f32 %v329_v18, %v328_v16 }
 0x1dc   :  { %v313_v21 = vadd.f32 %v312_v19, %v311_v17  ;;  %v331_v22 = vrot.slane %v330_v20, 1 }
 0x1de   :  { %315 = vst.msk [vmem:[%s557_s8] sm:$0x1] %vm314_vm2, %v313_v21  ;;  %v332_v23 = vadd.f32 %v331_v22, %v330_v20 }
 0x1e0   :  { %333 = vst.msk [vmem:[%s558_s9] sm:$0x1] %vm314_vm2, %v332_v23 }

// kernel: transformer_encoder_unit.9
= control target key start
LH: loop header
LB: loop body
LE: loop exit
PB: predicated region body
PF: predicated region fallthrough
CT: control target
= control target key end

     0   :  { %s309_s0 = inlined_call_operand.vmem [shape: bf16[32,64], index: 0, kind: input, shape index: {}]   ;;  %s310_s1 = inlined_call_operand.vmem [shape: f32[1,64], index: 1, kind: input, shape index: {}]   ;;  %s311_s2 = inlined_call_operand.vmem [shape: f32[1,64], index: 2, kind: input, shape index: {}]   ;;  %s312_s3 = inlined_call_operand.vmem [shape: bf16[64,8], index: 3, kind: input, shape index: {}]   ;;  %s313_s4 = inlined_call_operand.vmem [shape: f32[1,8], index: 4, kind: input, shape index: {}]   ;;  %s314_s5 = inlined_call_operand.hbm [shape: f32[32,8], index: 5, kind: output, shape index: {}]  }
   0x1   :  { %v209_v0 = vld [vmem:[%s312_s3] sm:$0xff]   ;;  %v210_v1 = vld [vmem:[%s312_s3 + $0x8] sm:$0xff]   ;;  %v211_v2 = vld [vmem:[%s312_s3 + $0x10] sm:$0xff]  }
   0x2   :  { %194 = vmatprep.subr.bf16.mxu0 %v209_v0  ;;  %v180_v3 = vld [vmem:[%s309_s0] sm:$0xff]   ;;  %v187_v7 = vld [vmem:[%s309_s0 + $0x8] sm:$0xff]  }
   0x3   :  { %195 = vmatpush3.bf16.msra.mxu0 %v209_v0  ;;  %v170_v4 = vld [vmem:[%s310_s1] ss:$0 sm:$0xff]  ;;  %v181_v5 = vunpack.c.l.bf16 %v180_v3  ;;  %v182_v6 = vunpack.c.h.bf16 %v180_v3 }
   0x4   :  { %196 = vmatprep.subr.bf16.mxu0 %v210_v1 }
   0x5   :  { %10 = vsyncpa [#allocation3], 0  ;;  %v171_v8 = vld [vmem:[%s311_s2] ss:$0 sm:$0xff]  ;;  %v185_v9 = vunpack.c.l.bf16 %v187_v7  ;;  %v186_v10 = vunpack.c.h.bf16 %v187_v7  ;;  %v37_v11 = vmul.f32 %v181_v5, %v170_v4  ;;  %v38_v12 = vmul.f32 %v182_v6, %v170_v4  ;;  %v212_v13 = vld [vmem:[%s312_s3 + $0x18] sm:$0xff]   ;;  %s237_s2 = smov [#allocation2]  }
   0x6   :  { %vm93_vm0 = vcmask 523264   ;;  %v172_v22 = vld [vmem:[%s313_s4] ss:$0 sm:$0xff]  ;;  %vm149_vm1 = vcmask 64512   ;;  %s159_s3 = sshll.u32 %s237_s2, 4  ;;  %s160_s3 = int_to_ptr.vmem [resolvable:$true] %s159_s3 }
   0x7   :  { %197 = vmatpush3.bf16.msra.mxu0 %v210_v1  ;;  %v39_v14 = vmul.f32 %v185_v9, %v170_v4  ;;  %v40_v15 = vmul.f32 %v186_v10, %v170_v4  ;;  %v48_v16 = vadd.f32 %v171_v8, %v37_v11  ;;  %v49_v17 = vadd.f32 %v171_v8, %v38_v12  ;;  %s213_s9 = scalar_lea.vmem %s160_s3, 512  ;;  %p218_p1 = scmp.lt.s32.totalorder %s160_s3, %s160_s3 }
   0x8   :  { %198 = vmatprep.subr.bf16.mxu0 %v211_v2  ;;  %p214_p0 = scmp.ne.s32.totalorder %s160_s3, %s213_s9  ;;  %p219_p2 = scmp.lt.s32.totalorder %s213_s9, %s213_s9 }
   0x9   :  { %v50_v18 = vadd.f32 %v171_v8, %v39_v14  ;;  %v51_v19 = vadd.f32 %v171_v8, %v40_v15  ;;  %v52_v20 = vpack.c.bf16 %v49_v17, %v48_v16 }
   0xa   :  { %p220_p3 = por %p219_p2, %p218_p1 }
   0xb   :  { %199 = vmatpush3.bf16.msra.mxu0 %v211_v2  ;;  %202 = vmatprep.mubr.msk.bf16.mxu0 %vm93_vm0, %v52_v20  ;;  %v53_v21 = vpack.c.bf16 %v51_v19, %v50_v18 }
   0xc   :  { %200 = vmatprep.subr.bf16.mxu0 %v212_v13  ;;  %p221_p4 = pnand %p220_p3, %p214_p0 }
   0xf   :  { %201 = vmatpush3.bf16.msra.mxu0 %v212_v13 }
  0x12   :  { %203 = vmatmul.mubr.msk.bf16.vlgmr.msra.gmra.mrb[0].mxu0 %vm93_vm0, %v53_v21 }
  0xe5   :  { %v204_v23 = vpop.f32.mrb[0].mxu0 }
  0xe6   :  { %v143_v24 = vadd.f32 %v204_v23, %v172_v22  ;;  %v134_v25 = vpop.f32.mrb[1].mxu0 }
  0xe7   :  { %v135_v26 = vadd.f32 %v172_v22, %v134_v25  ;;  %v205_v27 = vpop.f32.mrb[2].mxu0 }
  0xe8   :  { %152 = vst.msk [vmem:[#allocation2 + $0x10] sm:$0xff] %vm149_vm1, %v143_v24  ;;  %v146_v28 = vadd.f32 %v205_v27, %v172_v22  ;;  %v137_v29 = vpop.f32.mrb[3].mxu0 }
  0xe9   :  { %150 = vst.msk [vmem:[#allocation2] sm:$0xff] %vm149_vm1, %v135_v26  ;;  %v138_v30 = vadd.f32 %v172_v22, %v137_v29 }
  0xea   :  { %153 = vst.msk [vmem:[#allocation2 + $0x18] sm:$0xff] %vm149_vm1, %v146_v28 }
  0xeb   :  { %151 = vst.msk [vmem:[#allocation2 + $0x8] sm:$0xff] %vm149_vm1, %v138_v30 }
  0xec   :  { %224 = shalt.err (!%p221_p4)
}
  0xed   :  { %s225_s11 = scalar_lea.hbm %s314_s5, 512 }
  0xee   :  { %p226_p5 = scmp.ne.s32.totalorder %s314_s5, %s225_s11  ;;  %p229_p6 = scmp.lt.u32.totalorder %s225_s11, %s314_s5 }
  0xf0   :  { %p231_p7 = pnand %p229_p6, %p226_p5 }
  0xf2   :  { %234 = shalt.err (!%p231_p7)
}
  0xf3   :  { %s238_s16 = smov 128   ;;  %s239_s17 = smov 8  }
  0xf4   :  { %165 = dma.vmem_to_hbm [thread:$0]  %s160_s3, 512, %s314_s5, [#allocation3], %s238_s16, %s238_s16, %s239_s17  }
  0xf5   :  { %235 = dma.done.wait [#allocation3], 512  }
  0xf6   :  { %236 = vsyncadd [#allocation3], 4294966784 }
  0xf7   :  { %169 = vsyncpa [#allocation3], 1 }

// kernel: transformer_encoder_unit.7
= control target key start
LH: loop header
LB: loop body
LE: loop exit
PB: predicated region body
PF: predicated region fallthrough
CT: control target
= control target key end

     0   :  { %s2026_s21 = smov 0   ;;  %s2363_s0 = inlined_call_operand.vmem [shape: f32[2,16,64], index: 0, kind: input, shape index: {}]   ;;  %s2364_s1 = inlined_call_operand.vmem [shape: f32[16,128], index: 1, kind: input, shape index: {}]   ;;  %s2365_s2 = inlined_call_operand.vmem [shape: bf16[64,192], index: 2, kind: input, shape index: {}]   ;;  %s2366_s3 = inlined_call_operand.vmem [shape: bf16[64,64], index: 3, kind: input, shape index: {}]   ;;  %s2367_s4 = inlined_call_operand.vmem [shape: bf16[2,16,64], index: 4, kind: output, shape index: {0}]   ;;  %s2368_s5 = inlined_call_operand.vmem [shape: f32[2,1,64], index: 5, kind: output, shape index: {1}]   ;;  %s2369_s6 = inlined_call_operand.vmem [shape: f32[2,1,64], index: 6, kind: output, shape index: {2}]  }
   0x1 LB: > { %s1632_s22 = sadd.s32 4294967295, %s1971_s21   ;;  %p1636_p0 = scmp.ge.s32.totalorder %s1971_s21, 1  ;;  %s1971_s21 = sphi %s2026_s21, %s17_s21  }
   0x2   : > { %p217_p1 = scmp.lt.s32.totalorder %s1971_s21, 3 }
   0x4   : > { %p218_p2 = pnand %p1636_p0, %p217_p1 }
   0x5   : > { %v1885_v0 = vld [vmem:[%s2365_s2 + $0x4] ss:$8 sps:$4 sm:$0xff] (!%p218_p2)   ;;  %p253_p3 = scmp.lt.s32.totalorder (!%p218_p2), %s1632_s22, 1  ;;  %v1887_v1 = vld [vmem:[%s2365_s2] ss:$8 sps:$4 sm:$0xff] (!%p218_p2)   ;;  %v1973_v2 = vmov (!%p218_p2), 0  }
   0x6   : > { %221 = sbr.rel (%p218_p2) target bundleno = 2104 (0x838), region = 36  ;;  %357 = vmatprep.mubr.bf16.mxu0 (!%p218_p2), %v1973_v2  ;;  %325 = vmatprep.subr.bf16.mxu0 (!%p218_p2), %v1885_v0  ;;  %v1888_v3 = vld [vmem:[%s2365_s2 + $0x14] ss:$8 sps:$4 sm:$0xff] (!%p218_p2)   ;;  %v1890_v4 = vld [vmem:[%s2365_s2 + $0x10] ss:$8 sps:$4 sm:$0xff] (!%p218_p2)   ;;  %vm321_vm0 = vcmask (!%p218_p2), 523264  }
   0x7   : > { %326 = vmatpush1.bf16.msra.mxu0 (!%p218_p2), %v1887_v1  ;;  %v1891_v5 = vld [vmem:[%s2365_s2 + $0x24] ss:$8 sps:$4 sm:$0xff] (!%p218_p2)   ;;  %v1893_v6 = vld [vmem:[%s2365_s2 + $0x20] ss:$8 sps:$4 sm:$0xff] (!%p218_p2)   ;;  %v1894_v7 = vld [vmem:[%s2365_s2 + $0x34] ss:$8 sps:$4 sm:$0xff] (!%p218_p2)  }
   0x8   : > { %327 = vmatprep.subr.bf16.mxu0 (!%p218_p2), %v1888_v3  ;;  %v1896_v8 = vld [vmem:[%s2365_s2 + $0x30] ss:$8 sps:$4 sm:$0xff] (!%p218_p2)   ;;  %v1974_v12 = vmov (!%p218_p2), 0.0   ;;  %vm1975_vm1 = vmmov (!%p218_p2), 0   ;;  %v368_v14 = vld [vmem:[%s2364_s1] sm:$0xff] (!%p218_p2)  ;;  %v369_v15 = vld [vmem:[%s2364_s1 + $0x8] sm:$0xff] (!%p218_p2) }
   0x9   : > { %1716 = vmatprep.subr.bf16.mxu1 (!%p218_p2), %v1974_v12  ;;  %1718 = vmatprep.mubr.msk.bf16.mxu1 (!%p218_p2), %vm1975_vm1, %v1974_v12  ;;  %s1976_s25 = smov (!%p218_p2), 64   ;;  %vm377_vm2 = vcmask (!%p218_p2), 64512   ;;  %vm425_vm3 = vcmask (!%p218_p2), 130048   ;;  %s1977_s26 = smov (!%p218_p2), 56   ;;  %vm1401_vm4 = vcmask (!%p218_p2), 195584   ;;  %vm1404_vm5 = vcmask (!%p218_p2), 261120  }
   0xa   : > { %s1978_s27 = smov (!%p218_p2), 112   ;;  %s1979_s28 = smov (!%p218_p2), 88   ;;  %vm1407_vm6 = vcmask (!%p218_p2), 326656   ;;  %vm1410_vm7 = vcmask (!%p218_p2), 392192   ;;  %vm1413_vm8 = vcmask (!%p218_p2), 457728   ;;  %vm1501_vm9 = vcmask (!%p218_p2), 519168  }
   0xb   : > { %328 = vmatpush1.bf16.msra.mxu0 (!%p218_p2), %v1890_v4  ;;  %s1980_s29 = smov (!%p218_p2), 80   ;;  %s1981_s30 = smov (!%p218_p2), 72   ;;  %vm1513_vm10 = vcmask (!%p218_p2), 516096  }
   0xc   : > { %329 = vmatprep.subr.bf16.mxu0 (!%p218_p2), %v1891_v5  ;;  %s1982_s7 = smov (!%p218_p2), 120   ;;  %s1983_s8 = smov (!%p218_p2), 48  }
   0xd   : > { %s2371_s22 = smov (!%p253_p3, %s1632_s22), 1  ;;  %s1985_s10 = smov 104  }
   0xe   : > { %s1675_s9 = sshll.u32 %s2371_s22, 4  ;;  %s1986_s11 = smov 32  }
   0xf   : > { %s257_s16 = scalar_lea.vmem %s2363_s0, %s1675_s9  ;;  %330 = vmatpush1.bf16.msra.mxu0 %v1893_v6  ;;  %s1984_s9 = smov 40  }
  0x10   : > { %v2064_v9 = vld [vmem:[%s257_s16] sm:$0xff]  ;;  %v2066_v10 = vld [vmem:[%s257_s16 + $0x8] sm:$0xff]  ;;  %331 = vmatprep.subr.bf16.mxu0 %v1894_v7  ;;  %s1987_s12 = smov 96   ;;  %s1988_s13 = smov 24  }
  0x11   : > { %v272_v11 = vpack.c.bf16 %v2066_v10, %v2064_v9  ;;  %s1989_s14 = smov 16   ;;  %s1990_s15 = smov 8  }
  0x13   : > { %332 = vmatpush1.bf16.msra.mxu0 %v1896_v8 }
  0x14   : > { %1740 = vmatprep.subr.bf16.mxu0 %v1974_v12 }
  0x16   : > { %1649 = vmatmul.mubr.msk.bf16.vlgmr.msra.gmra.mrb[0].mxu0 %vm321_vm0, %v272_v11 }
  0x17   : > { %1742 = vmatprep.mubr.msk.bf16.mxu0 %vm1975_vm1, %v1974_v12 }
  0xe9   : > { %v359_v13 = vpop.f32.mrb[0].mxu0 }
  0xea   : > { %v361_v16 = vpop.f32.mrb[1].mxu0  ;;  %v370_v18 = vadd.f32 %v368_v14, %v359_v13 }
  0xeb   : > { %v363_v17 = vpop.f32.mrb[2].mxu0 }
  0xec   : > { %v371_v19 = vadd.f32 %v369_v15, %v363_v17  ;;  %v365_v20 = vpop.f32.mrb[3].mxu0 }
  0xed   : > { %v2083_v21 = vpack.c.bf16 %v365_v20, %v361_v16 }
  0xee   : > { %v372_v22 = vpack.c.bf16 %v371_v19, %v370_v18 }
  0xf0   : > { %375 = vrot.lane.b32.xlu0 %v372_v22, %s1976_s25 }
 0x162   : > { %v376_v23 = vpop.permute.xlu0 %375 }
 0x163   : > { %v382_v24 = vsel %vm377_vm2, %v376_v23, 0 }
 0x164   : > { %1717 = vmatpush3.bf16.xpose.msra.mxu1 %v382_v24 }
 0x165   : > { %1722 = vmatprep.subr.bf16.mxu1 %v1974_v12 }
 0x16b   : > { %1719 = vmatmul.mubr.msk.bf16.vlgmr.msra.gmra.mrb[0].mxu1 %vm377_vm2, %v372_v22 }
 0x16c   : > { %1723 = vmatpush3.bf16.msra.mxu1 %v2083_v21  ;;  %1724 = vmatprep.mubr.msk.bf16.mxu1 %vm1975_vm1, %v1974_v12 }
 0x16d   : > { %1728 = vmatprep.subr.bf16.mxu1 %v1974_v12 }
 0x23e   : > { %v418_v25 = vpop.f32.mrb[0].mxu1 }
 0x23f   : > { %v1720_v26 = vpop.f32.mrb[1].mxu1  ;;  %v426_v27 = vsel %vm425_vm3, %v418_v25, -inf }
 0x240   : > { %427 = vmax.xlane.f32.xlu0 %v426_v27  ;;  %v421_v28 = vpop.f32.mrb[2].mxu1 }
 0x241   : > { %v1721_v29 = vpop.f32.mrb[3].mxu1  ;;  %v429_v30 = vsel %vm425_vm3, %v421_v28, -inf }
 0x242   : > { %430 = vmax.xlane.f32.xlu1 %v429_v30 }
 0x253   : > { %495 = vrot.lane.b32.xlu1 %v372_v22, %s1977_s26 }
 0x256   : > { %615 = vrot.lane.b32.xlu0 %v372_v22, %s1978_s27 }
 0x25a   : > { %978 = vrot.lane.b32.xlu0 %v372_v22, %s1979_s28 }
 0x25e   : > { %1099 = vrot.lane.b32.xlu0 %v372_v22, %s1980_s29 }
 0x262   : > { %1220 = vrot.lane.b32.xlu0 %v372_v22, %s1981_s30 }
 0x2cd   : > { %v428_v31 = vpop.xlane.xlu0 %427 }
 0x2ce   : > { %v432_v32 = vsub.f32 %v418_v25, %v428_v31 }
 0x2cf   : > { %v431_v33 = vpop.xlane.xlu1 %430 }
 0x2d0   : > { %v434_v34 = vmul.f32 1.442695, %v432_v32  ;;  %v433_v35 = vsub.f32 %v421_v28, %v431_v33 }
 0x2d1   : > { %v616_v53 = vpop.permute.xlu0 %615 }
 0x2d2   : > { %1901 = vpow2.f32 %v434_v34  ;;  %v436_v36 = vmul.f32 1.442695, %v433_v35 }
 0x2d3   : > { %v496_v41 = vpop.permute.xlu1 %495 }
 0x2d4   : > { %1903 = vpow2.f32 %v436_v36  ;;  %v501_v54 = vsel %vm377_vm2, %v496_v41, 0 }
 0x2d5   : > { %v979_v63 = vpop.permute.xlu0 %978 }
 0x2d9   : > { %v1100_v2 = vpop.permute.xlu0 %1099 }
 0x2dc   : > { %v1902_v37 = vpop.eup %1901 }
 0x2dd   : > { %v438_v38 = vsel %vm425_vm3, %v1902_v37, 0.0  ;;  %v1221_v4 = vpop.permute.xlu0 %1220 }
 0x2de   : > { %v1904_v39 = vpop.eup %1903  ;;  %439 = vadd.xlane.f32.xlu1 %v438_v38 }
 0x2df   : > { %v441_v40 = vsel %vm425_vm3, %v1904_v39, 0.0 }
 0x2e2   : > { %442 = vadd.xlane.f32.xlu1 %v441_v40 }
 0x2f3   : > { %493 = vrot.lane.b32.xlu1 %v372_v22, %s1982_s7 }
 0x2f7   : > { %617 = vrot.lane.b32.xlu1 %v372_v22, %s1983_s8 }
 0x2fb   : > { %738 = vrot.lane.b32.xlu1 %v372_v22, %s1984_s9 }
 0x2ff   : > { %736 = vrot.lane.b32.xlu1 %v372_v22, %s1985_s10 }
 0x303   : > { %859 = vrot.lane.b32.xlu1 %v372_v22, %s1986_s11 }
 0x307   : > { %857 = vrot.lane.b32.xlu1 %v372_v22, %s1987_s12 }
 0x30b   : > { %980 = vrot.lane.b32.xlu1 %v372_v22, %s1988_s13 }
 0x30f   : > { %1101 = vrot.lane.b32.xlu1 %v372_v22, %s1989_s14 }
 0x313   : > { %1222 = vrot.lane.b32.xlu1 %v372_v22, %s1990_s15 }
 0x36b   : > { %v440_v42 = vpop.xlane.xlu1 %439 }
 0x36c   : > { %1905 = vrcp.f32 %v440_v42 }
 0x36f   : > { %v443_v43 = vpop.xlane.xlu1 %442 }
 0x370   : > { %1907 = vrcp.f32 %v443_v43 }
 0x373   : > { %v494_v44 = vpop.permute.xlu1 %493 }
 0x376   : > { %v1906_v46 = vpop.eup %1905 }
 0x377   : > { %v618_v45 = vpop.permute.xlu1 %617  ;;  %v446_v49 = vmul.f32 %v1906_v46, %v1902_v37 }
 0x378   : > { %v623_v47 = vsel %vm377_vm2, %v618_v45, 0 }
 0x379   : > { %1741 = vmatpush3.bf16.xpose.msra.mxu0 %v623_v47 }
 0x37a   : > { %v1908_v48 = vpop.eup %1907  ;;  %1752 = vmatprep.subr.bf16.mxu0 %v1974_v12 }
 0x37b   : > { %v447_v50 = vmul.f32 %v1908_v48, %v1904_v39  ;;  %v739_v51 = vpop.permute.xlu1 %738 }
 0x37c   : > { %v744_v56 = vsel %vm377_vm2, %v739_v51, 0 }
 0x37d   : > { %v448_v52 = vpack.c.bf16 %v447_v50, %v446_v49 }
 0x37f   : > { %v737_v55 = vpop.permute.xlu1 %736  ;;  %1725 = vmatmul.mubr.msk.bf16.vlgmr.msra.gmra.mrb[4].mxu1 %vm425_vm3, %v448_v52 }
 0x380   : > { %1729 = vmatpush3.bf16.xpose.msra.mxu1 %v501_v54  ;;  %1743 = vmatmul.mubr.msk.bf16.vlgmr.msra.gmra.mrb[4].mxu0 %vm377_vm2, %v616_v53 }
 0x381   : > { %1753 = vmatpush3.bf16.xpose.msra.mxu0 %v744_v56  ;;  %1730 = vmatprep.mubr.msk.bf16.mxu1 %vm1975_vm1, %v1974_v12 }
 0x382   : > { %1754 = vmatprep.mubr.msk.bf16.mxu0 %vm1975_vm1, %v1974_v12  ;;  %1764 = vmatprep.subr.bf16.mxu0 %v1974_v12 }
 0x383   : > { %v860_v57 = vpop.permute.xlu1 %859  ;;  %1734 = vmatprep.subr.bf16.mxu1 %v1974_v12 }
 0x384   : > { %v865_v59 = vsel %vm377_vm2, %v860_v57, 0 }
 0x387   : > { %v858_v58 = vpop.permute.xlu1 %857  ;;  %1731 = vmatmul.mubr.msk.bf16.vlgmr.msra.gmra.mrb[8].mxu1 %vm377_vm2, %v494_v44 }
 0x388   : > { %1755 = vmatmul.mubr.msk.bf16.vlgmr.msra.gmra.mrb[8].mxu0 %vm377_vm2, %v737_v55  ;;  %1736 = vmatprep.mubr.msk.bf16.mxu1 %vm1975_vm1, %v1974_v12 }
 0x389   : > { %1765 = vmatpush3.bf16.xpose.msra.mxu0 %v865_v59  ;;  %1766 = vmatprep.mubr.msk.bf16.mxu0 %vm1975_vm1, %v1974_v12 }
 0x38a   : > { %1776 = vmatprep.subr.bf16.mxu0 %v1974_v12 }
 0x38b   : > { %v981_v60 = vpop.permute.xlu1 %980 }
 0x38c   : > { %v986_v61 = vsel %vm377_vm2, %v981_v60, 0 }
 0x38f   : > { %v1102_v62 = vpop.permute.xlu1 %1101 }
 0x390   : > { %1767 = vmatmul.mubr.msk.bf16.vlgmr.msra.gmra.mrb[12].mxu0 %vm377_vm2, %v858_v58  ;;  %v1107_v0 = vsel %vm377_vm2, %v1102_v62, 0 }
 0x391   : > { %1777 = vmatpush3.bf16.xpose.msra.mxu0 %v986_v61  ;;  %1778 = vmatprep.mubr.msk.bf16.mxu0 %vm1975_vm1, %v1974_v12 }
 0x392   : > { %1788 = vmatprep.subr.bf16.mxu0 %v1974_v12 }
 0x393   : > { %v1223_v1 = vpop.permute.xlu1 %1222 }
 0x394   : > { %v1228_v3 = vsel %vm377_vm2, %v1223_v1, 0 }
 0x398   : > { %1779 = vmatmul.mubr.msk.bf16.vlgmr.msra.gmra.mrb[16].mxu0 %vm377_vm2, %v979_v63 }
 0x399   : > { %1789 = vmatpush3.bf16.xpose.msra.mxu0 %v1107_v0  ;;  %1790 = vmatprep.mubr.msk.bf16.mxu0 %vm1975_vm1, %v1974_v12 }
 0x39a   : > { %1800 = vmatprep.subr.bf16.mxu0 %v1974_v12 }
 0x3a0   : > { %1791 = vmatmul.mubr.msk.bf16.vlgmr.msra.gmra.mrb[20].mxu0 %vm377_vm2, %v1100_v2 }
 0x3a1   : > { %1801 = vmatpush3.bf16.xpose.msra.mxu0 %v1228_v3  ;;  %1802 = vmatprep.mubr.msk.bf16.mxu0 %vm1975_vm1, %v1974_v12 }
 0x3a2   : > { %1812 = vmatprep.subr.bf16.mxu0 %v1974_v12 }
 0x3a8   : > { %1803 = vmatmul.mubr.msk.bf16.vlgmr.msra.gmra.mrb[24].mxu0 %vm377_vm2, %v1221_v4 }
 0x3a9   : > { %1820 = vmatprep.mubr.msk.bf16.mxu0 %vm1975_vm1, %v1974_v12 }
 0x452   : > { %v2148_v5 = vpop.f32.mrb[4].mxu1 }
 0x453   : > { %v1726_v6 = vpop.f32.mrb[5].mxu1  ;;  %v2150_v7 = vpop.f32.mrb[4].mxu0 }
 0x454   : > { %v2152_v8 = vpop.f32.mrb[6].mxu1  ;;  %v1744_v11 = vpop.f32.mrb[5].mxu0  ;;  %v666_v28 = vsel %vm425_vm3, %v2150_v7, -inf }
 0x455   : > { %v1727_v13 = vpop.f32.mrb[7].mxu1  ;;  %v662_v14 = vpop.f32.mrb[6].mxu0 }
 0x456   : > { %v1745_v15 = vpop.f32.mrb[7].mxu0  ;;  %v669_v27 = vsel %vm425_vm3, %v662_v14, -inf }
 0x45a   : > { %v2154_v16 = vpop.f32.mrb[8].mxu1 }
 0x45b   : > { %v1732_v17 = vpop.f32.mrb[9].mxu1  ;;  %v2156_v18 = vpop.f32.mrb[8].mxu0  ;;  %v544_v19 = vsel %vm425_vm3, %v2154_v16, -inf }
 0x45c   : > { %v1756_v20 = vpop.f32.mrb[9].mxu0  ;;  %545 = vmax.xlane.f32.xlu1 %v544_v19  ;;  %v2160_v22 = vpop.f32.mrb[10].mxu1  ;;  %v787_v33 = vsel %vm425_vm3, %v2156_v18, -inf }
 0x45d   : > { %v1733_v23 = vpop.f32.mrb[11].mxu1  ;;  %v783_v24 = vpop.f32.mrb[10].mxu0  ;;  %v547_v25 = vsel %vm425_vm3, %v2160_v22, -inf }
 0x45e   : > { %v1757_v26 = vpop.f32.mrb[11].mxu0  ;;  %548 = vmax.xlane.f32.xlu0 %v547_v25  ;;  %v790_v30 = vsel %vm425_vm3, %v783_v24, -inf }
 0x460   : > { %670 = vmax.xlane.f32.xlu1 %v669_v27 }
 0x462   : > { %667 = vmax.xlane.f32.xlu0 %v666_v28 }
 0x463   : > { %v901_v29 = vpop.f32.mrb[12].mxu0 }
 0x464   : > { %v1768_v31 = vpop.f32.mrb[13].mxu0  ;;  %791 = vmax.xlane.f32.xlu1 %v790_v30  ;;  %v908_v36 = vsel %vm425_vm3, %v901_v29, -inf }
 0x465   : > { %v904_v32 = vpop.f32.mrb[14].mxu0 }
 0x466   : > { %v1769_v34 = vpop.f32.mrb[15].mxu0  ;;  %788 = vmax.xlane.f32.xlu0 %v787_v33  ;;  %v911_v35 = vsel %vm425_vm3, %v904_v32, -inf }
 0x468   : > { %912 = vmax.xlane.f32.xlu1 %v911_v35 }
 0x46a   : > { %909 = vmax.xlane.f32.xlu0 %v908_v36 }
 0x46b   : > { %v1022_v37 = vpop.f32.mrb[16].mxu0 }
 0x46c   : > { %v1780_v38 = vpop.f32.mrb[17].mxu0  ;;  %v1029_v39 = vsel %vm425_vm3, %v1022_v37, -inf }
 0x46d   : > { %v1025_v40 = vpop.f32.mrb[18].mxu0 }
 0x46e   : > { %v1781_v41 = vpop.f32.mrb[19].mxu0  ;;  %1030 = vmax.xlane.f32.xlu0 %v1029_v39  ;;  %v1032_v42 = vsel %vm425_vm3, %v1025_v40, -inf }
 0x46f   : > { %1033 = vmax.xlane.f32.xlu1 %v1032_v42 }
 0x473   : > { %v2174_v43 = vpop.f32.mrb[20].mxu0 }
 0x474   : > { %v1792_v44 = vpop.f32.mrb[21].mxu0  ;;  %v1150_v45 = vsel %vm425_vm3, %v2174_v43, -inf }
 0x475   : > { %v2178_v46 = vpop.f32.mrb[22].mxu0  ;;  %1151 = vmax.xlane.f32.xlu0 %v1150_v45 }
 0x476   : > { %v1793_v47 = vpop.f32.mrb[23].mxu0  ;;  %v1153_v48 = vsel %vm425_vm3, %v2178_v46, -inf }
 0x477   : > { %1154 = vmax.xlane.f32.xlu1 %v1153_v48 }
 0x47b   : > { %v2182_v49 = vpop.f32.mrb[24].mxu0 }
 0x47c   : > { %v1804_v50 = vpop.f32.mrb[25].mxu0  ;;  %v1271_v51 = vsel %vm425_vm3, %v2182_v49, -inf }
 0x47d   : > { %v2186_v52 = vpop.f32.mrb[26].mxu0  ;;  %1272 = vmax.xlane.f32.xlu0 %v1271_v51 }
 0x47e   : > { %v1805_v53 = vpop.f32.mrb[27].mxu0  ;;  %v1274_v54 = vsel %vm425_vm3, %v2186_v52, -inf }
 0x47f   : > { %1275 = vmax.xlane.f32.xlu1 %v1274_v54 }
 0x4e9   : > { %v546_v55 = vpop.xlane.xlu1 %545 }
 0x4ea   : > { %v550_v6 = vsub.f32 %v2154_v16, %v546_v55 }
 0x4eb   : > { %v549_v56 = vpop.xlane.xlu0 %548 }
 0x4ec   : > { %v551_v27 = vsub.f32 %v2160_v22, %v549_v56 }
 0x4ed   : > { %v671_v57 = vpop.xlane.xlu1 %670 }
 0x4ee   : > { %v673_v58 = vsub.f32 %v662_v14, %v671_v57  ;;  %v554_v34 = vmul.f32 1.442695, %v551_v27 }
 0x4ef   : > { %v668_v59 = vpop.xlane.xlu0 %667 }
 0x4f0   : > { %v676_v60 = vmul.f32 1.442695, %v673_v58  ;;  %v672_v61 = vsub.f32 %v2150_v7, %v668_v59  ;;  %v552_v7 = vmul.f32 1.442695, %v550_v6 }
 0x4f1   : > { %v792_v62 = vpop.xlane.xlu1 %791 }
 0x4f2   : > { %1909 = vpow2.f32 %v676_v60  ;;  %v674_v63 = vmul.f32 1.442695, %v672_v61  ;;  %v794_v0 = vsub.f32 %v783_v24, %v792_v62 }
 0x4f3   : > { %v789_v1 = vpop.xlane.xlu0 %788 }
 0x4f4   : > { %1911 = vpow2.f32 %v674_v63  ;;  %v797_v2 = vmul.f32 1.442695, %v794_v0  ;;  %v793_v3 = vsub.f32 %v2156_v18, %v789_v1 }
 0x4f5   : > { %v913_v4 = vpop.xlane.xlu1 %912 }
 0x4f6   : > { %1913 = vpow2.f32 %v797_v2  ;;  %v795_v11 = vmul.f32 1.442695, %v793_v3  ;;  %v915_v13 = vsub.f32 %v904_v32, %v913_v4 }
 0x4f7   : > { %v910_v14 = vpop.xlane.xlu0 %909 }
 0x4f8   : > { %1915 = vpow2.f32 %v795_v11  ;;  %v918_v15 = vmul.f32 1.442695, %v915_v13  ;;  %v914_v17 = vsub.f32 %v901_v29, %v910_v14 }
 0x4fa   : > { %1917 = vpow2.f32 %v918_v15  ;;  %v916_v19 = vmul.f32 1.442695, %v914_v17 }
 0x4fb   : > { %v1031_v20 = vpop.xlane.xlu0 %1030 }
 0x4fc   : > { %v2193_v23 = vpop.eup %1909  ;;  %1919 = vpow2.f32 %v916_v19  ;;  %v1035_v24 = vsub.f32 %v1022_v37, %v1031_v20  ;;  %v1034_v25 = vpop.xlane.xlu1 %1033 }
 0x4fd   : > { %v1036_v18 = vsub.f32 %v1025_v40, %v1034_v25  ;;  %v681_v16 = vsel %vm425_vm3, %v2193_v23, 0.0  ;;  %1921 = vpow2.f32 %v552_v7 }
 0x4fe   : > { %v2197_v26 = vpop.eup %1911  ;;  %v1037_v28 = vmul.f32 1.442695, %v1035_v24  ;;  %682 = vadd.xlane.f32.xlu1 %v681_v16 }
 0x4ff   : > { %v1039_v29 = vmul.f32 1.442695, %v1036_v18  ;;  %v678_v30 = vsel %vm425_vm3, %v2197_v26, 0.0 }
 0x500   : > { %v2202_v31 = vpop.eup %1913  ;;  %1923 = vpow2.f32 %v1037_v28  ;;  %679 = vadd.xlane.f32.xlu0 %v678_v30 }
 0x501   : > { %v802_v32 = vsel %vm425_vm3, %v2202_v31, 0.0  ;;  %1925 = vpow2.f32 %v1039_v29 }
 0x502   : > { %v2206_v33 = vpop.eup %1915  ;;  %803 = vadd.xlane.f32.xlu1 %v802_v32  ;;  %1927 = vpow2.f32 %v554_v34  ;;  %v1152_v50 = vpop.xlane.xlu0 %1151 }
 0x503   : > { %v799_v22 = vsel %vm425_vm3, %v2206_v33, 0.0  ;;  %v1156_v51 = vsub.f32 %v2174_v43, %v1152_v50 }
 0x504   : > { %v2210_v35 = vpop.eup %1917  ;;  %800 = vadd.xlane.f32.xlu0 %v799_v22  ;;  %v1155_v54 = vpop.xlane.xlu1 %1154 }
 0x505   : > { %v923_v36 = vsel %vm425_vm3, %v2210_v35, 0.0  ;;  %v1158_v53 = vmul.f32 1.442695, %v1156_v51  ;;  %v1157_v55 = vsub.f32 %v2178_v46, %v1155_v54 }
 0x506   : > { %v2214_v37 = vpop.eup %1919  ;;  %924 = vadd.xlane.f32.xlu1 %v923_v36 }
 0x507   : > { %v920_v38 = vsel %vm425_vm3, %v2214_v37, 0.0  ;;  %v2218_v39 = vpop.eup %1921  ;;  %1929 = vpow2.f32 %v1158_v53  ;;  %v1160_v57 = vmul.f32 1.442695, %v1157_v55 }
 0x508   : > { %921 = vadd.xlane.f32.xlu0 %v920_v38  ;;  %v556_v41 = vsel %vm425_vm3, %v2218_v39, 0.0 }
 0x509   : > { %1931 = vpow2.f32 %v1160_v57 }
 0x50a   : > { %v2220_v40 = vpop.eup %1923  ;;  %v1273_v56 = vpop.xlane.xlu0 %1272 }
 0x50b   : > { %v1041_v42 = vsel %vm425_vm3, %v2220_v40, 0.0  ;;  %v2226_v44 = vpop.eup %1925  ;;  %v1277_v58 = vsub.f32 %v2182_v49, %v1273_v56 }
 0x50c   : > { %557 = vadd.xlane.f32.xlu0 %v556_v41  ;;  %1042 = vadd.xlane.f32.xlu1 %v1041_v42  ;;  %v1044_v45 = vsel %vm425_vm3, %v2226_v44, 0.0  ;;  %v2230_v47 = vpop.eup %1927  ;;  %v1276_v59 = vpop.xlane.xlu1 %1275 }
 0x50d   : > { %v559_v48 = vsel %vm425_vm3, %v2230_v47, 0.0  ;;  %v1279_v60 = vmul.f32 1.442695, %v1277_v58  ;;  %v1278_v61 = vsub.f32 %v2186_v52, %v1276_v59 }
 0x50f   : > { %1933 = vpow2.f32 %v1279_v60  ;;  %v1281_v63 = vmul.f32 1.442695, %v1278_v61 }
 0x510   : > { %1045 = vadd.xlane.f32.xlu1 %v1044_v45 }
 0x511   : > { %v2242_v62 = vpop.eup %1929  ;;  %1935 = vpow2.f32 %v1281_v63 }
 0x512   : > { %v1162_v43 = vsel %vm425_vm3, %v2242_v62, 0.0 }
 0x513   : > { %v2246_v0 = vpop.eup %1931 }
 0x514   : > { %560 = vadd.xlane.f32.xlu1 %v559_v48  ;;  %v1165_v46 = vsel %vm425_vm3, %v2246_v0, 0.0 }
 0x519   : > { %v2250_v49 = vpop.eup %1933 }
 0x51a   : > { %v1283_v52 = vsel %vm425_vm3, %v2250_v49, 0.0 }
 0x51b   : > { %v2254_v1 = vpop.eup %1935 }
 0x51c   : > { %v1286_v2 = vsel %vm425_vm3, %v2254_v1, 0.0 }
 0x522   : > { %568 = vrot.lane.b32.xlu0 %v2083_v21, %s1982_s7 }
 0x525   : > { %689 = vrot.lane.b32.xlu1 %v2083_v21, %s1978_s27 }
 0x541   : > { %1163 = vadd.xlane.f32.xlu0 %v1162_v43 }
 0x549   : > { %1166 = vadd.xlane.f32.xlu1 %v1165_v46 }
 0x54d   : > { %1284 = vadd.xlane.f32.xlu1 %v1283_v52 }
 0x551   : > { %1287 = vadd.xlane.f32.xlu1 %v1286_v2 }
 0x557   : > { %810 = vrot.lane.b32.xlu0 %v2083_v21, %s1985_s10 }
 0x55b   : > { %1052 = vrot.lane.b32.xlu0 %v2083_v21, %s1979_s28 }
 0x55f   : > { %1173 = vrot.lane.b32.xlu0 %v2083_v21, %s1980_s29 }
 0x562   : > { %931 = vrot.lane.b32.xlu1 %v2083_v21, %s1987_s12 }
 0x563   : > { %1294 = vrot.lane.b32.xlu0 %v2083_v21, %s1981_s30 }
 0x58b   : > { %v683_v3 = vpop.xlane.xlu1 %682 }
 0x58d   : > { %v680_v4 = vpop.xlane.xlu0 %679 }
 0x58f   : > { %v804_v6 = vpop.xlane.xlu1 %803 }
 0x591   : > { %v801_v11 = vpop.xlane.xlu0 %800 }
 0x593   : > { %v925_v13 = vpop.xlane.xlu1 %924 }
 0x594   : > { %1937 = vrcp.f32 %v925_v13 }
 0x595   : > { %v922_v14 = vpop.xlane.xlu0 %921 }
 0x596   : > { %1939 = vrcp.f32 %v922_v14 }
 0x599   : > { %v1043_v15 = vpop.xlane.xlu1 %1042  ;;  %v558_v17 = vpop.xlane.xlu0 %557 }
 0x59a   : > { %1941 = vrcp.f32 %v1043_v15 }
 0x59d   : > { %v1046_v7 = vpop.xlane.xlu1 %1045  ;;  %v569_v19 = vpop.permute.xlu0 %568 }
 0x59e   : > { %v1938_v20 = vpop.eup %1937  ;;  %1943 = vrcp.f32 %v1046_v7  ;;  %1735 = vmatpush3.bf16.msra.mxu1 %v569_v19 }
 0x59f   : > { %1746 = vmatprep.subr.bf16.mxu1 %v1974_v12  ;;  %1945 = vrcp.f32 %v558_v17  ;;  %v929_v21 = vmul.f32 %v1938_v20, %v2210_v35 }
 0x5a0   : > { %v1940_v24 = vpop.eup %1939 }
 0x5a1   : > { %v928_v25 = vmul.f32 %v1940_v24, %v2214_v37  ;;  %v561_v18 = vpop.xlane.xlu1 %560 }
 0x5a2   : > { %1947 = vrcp.f32 %v561_v18 }
 0x5a3   : > { %v930_v16 = vpack.c.bf16 %v929_v21, %v928_v25  ;;  %1949 = vrcp.f32 %v680_v4 }
 0x5a4   : > { %v1942_v27 = vpop.eup %1941  ;;  %1951 = vrcp.f32 %v683_v3 }
 0x5a5   : > { %v1049_v29 = vmul.f32 %v1942_v27, %v2220_v40  ;;  %v690_v41 = vpop.permute.xlu1 %689  ;;  %1953 = vrcp.f32 %v801_v11 }
 0x5a6   : > { %1955 = vrcp.f32 %v804_v6 }
 0x5a8   : > { %v1944_v28 = vpop.eup %1943 }
 0x5a9   : > { %v1050_v30 = vmul.f32 %v1944_v28, %v2226_v44  ;;  %v1946_v32 = vpop.eup %1945 }
 0x5aa   : > { %v564_v36 = vmul.f32 %v1946_v32, %v2218_v39  ;;  %v1898_v32 = vld [vmem:[%s2366_s3 + $0x8] sm:$0xff]  }
 0x5ab   : > { %v1051_v34 = vpack.c.bf16 %v1050_v30, %v1049_v29 }
 0x5ac   : > { %v1948_v22 = vpop.eup %1947 }
 0x5ad   : > { %v565_v35 = vmul.f32 %v1948_v22, %v2230_v47  ;;  %v1950_v37 = vpop.eup %1949 }
 0x5ae   : > { %v1952_v42 = vpop.eup %1951  ;;  %v686_v40 = vmul.f32 %v1950_v37, %v2197_v26 }
 0x5af   : > { %v566_v38 = vpack.c.bf16 %v565_v35, %v564_v36  ;;  %v687_v44 = vmul.f32 %v1952_v42, %v2193_v23  ;;  %v1954_v39 = vpop.eup %1953  ;;  %v1899_v35 = vld [vmem:[%s2366_s3 + $0x10] sm:$0xff]  }
 0x5b0   : > { %v1956_v48 = vpop.eup %1955  ;;  %v807_v50 = vmul.f32 %v1954_v39, %v2206_v33 }
 0x5b1   : > { %1737 = vmatmul.mubr.msk.bf16.vlgmr.msra.gmra.mrb[12].mxu1 %vm425_vm3, %v566_v38  ;;  %v688_v45 = vpack.c.bf16 %v687_v44, %v686_v40  ;;  %v808_v51 = vmul.f32 %v1956_v48, %v2202_v31 }
 0x5b2   : > { %1747 = vmatpush3.bf16.msra.mxu1 %v690_v41  ;;  %1748 = vmatprep.mubr.msk.bf16.mxu1 %vm1975_vm1, %v1974_v12  ;;  %v1900_v41 = vld [vmem:[%s2366_s3 + $0x18] sm:$0xff]  }
 0x5b3   : > { %1758 = vmatprep.subr.bf16.mxu1 %v1974_v12  ;;  %v809_v53 = vpack.c.bf16 %v808_v51, %v807_v50 }
 0x5b9   : > { %1749 = vmatmul.mubr.msk.bf16.vlgmr.msra.gmra.mrb[16].mxu1 %vm425_vm3, %v688_v45 }
 0x5ba   : > { %1760 = vmatprep.mubr.msk.bf16.mxu1 %vm1975_vm1, %v1974_v12 }
 0x5ce   : > { %v1164_v47 = vpop.xlane.xlu0 %1163 }
 0x5d2   : > { %v811_v26 = vpop.permute.xlu0 %810 }
 0x5d3   : > { %1759 = vmatpush3.bf16.msra.mxu1 %v811_v26 }
 0x5d4   : > { %1770 = vmatprep.subr.bf16.mxu1 %v1974_v12 }
 0x5d6   : > { %v1167_v23 = vpop.xlane.xlu1 %1166  ;;  %1761 = vmatmul.mubr.msk.bf16.vlgmr.msra.gmra.mrb[20].mxu1 %vm425_vm3, %v809_v53  ;;  %v1053_v31 = vpop.permute.xlu0 %1052 }
 0x5d7   : > { %1772 = vmatprep.mubr.msk.bf16.mxu1 %vm1975_vm1, %v1974_v12  ;;  %1957 = vrcp.f32 %v1167_v23 }
 0x5d8   : > { %1959 = vrcp.f32 %v1164_v47 }
 0x5da   : > { %v1285_v54 = vpop.xlane.xlu1 %1284  ;;  %v1174_v57 = vpop.permute.xlu0 %1173 }
 0x5de   : > { %v1288_v55 = vpop.xlane.xlu1 %1287  ;;  %v1295_v43 = vpop.permute.xlu0 %1294 }
 0x5df   : > { %1961 = vrcp.f32 %v1288_v55 }
 0x5e0   : > { %1963 = vrcp.f32 %v1285_v54 }
 0x5e1   : > { %v1958_v33 = vpop.eup %1957 }
 0x5e2   : > { %v932_v56 = vpop.permute.xlu1 %931  ;;  %v1960_v58 = vpop.eup %1959  ;;  %v1171_v59 = vmul.f32 %v1958_v33, %v2246_v0 }
 0x5e3   : > { %1771 = vmatpush3.bf16.msra.mxu1 %v932_v56  ;;  %v1170_v60 = vmul.f32 %v1960_v58, %v2242_v62 }
 0x5e4   : > { %1782 = vmatprep.subr.bf16.mxu1 %v1974_v12 }
 0x5e5   : > { %v1172_v61 = vpack.c.bf16 %v1171_v59, %v1170_v60 }
 0x5e6   : > { %1773 = vmatmul.mubr.msk.bf16.vlgmr.msra.gmra.mrb[24].mxu1 %vm425_vm3, %v930_v16  ;;  %v1897_v16 = vld [vmem:[%s2366_s3] sm:$0xff]  }
 0x5e7   : > { %1783 = vmatpush3.bf16.msra.mxu1 %v1053_v31  ;;  %1784 = vmatprep.mubr.msk.bf16.mxu1 %vm1975_vm1, %v1974_v12 }
 0x5e8   : > { %1794 = vmatprep.subr.bf16.mxu1 %v1974_v12  ;;  %1813 = vmatpush3.bf16.msra.mxu0 %v1897_v16 }
 0x5e9   : > { %v1962_v63 = vpop.eup %1961  ;;  %1814 = vmatprep.subr.bf16.mxu0 %v1974_v12 }
 0x5ea   : > { %v1964_v46 = vpop.eup %1963  ;;  %v1292_v52 = vmul.f32 %v1962_v63, %v2254_v1 }
 0x5eb   : > { %v1291_v2 = vmul.f32 %v1964_v46, %v2250_v49 }
 0x5ec   : > { %1815 = vmatpush3.bf16.msra.mxu0 %v1898_v32 }
 0x5ed   : > { %v1293_v3 = vpack.c.bf16 %v1292_v52, %v1291_v2  ;;  %1816 = vmatprep.subr.bf16.mxu0 %v1974_v12 }
 0x5ee   : > { %1785 = vmatmul.mubr.msk.bf16.vlgmr.msra.gmra.mrb[28].mxu1 %vm425_vm3, %v1051_v34 }
 0x5ef   : > { %1795 = vmatpush3.bf16.msra.mxu1 %v1174_v57  ;;  %1796 = vmatprep.mubr.msk.bf16.mxu1 %vm1975_vm1, %v1974_v12 }
 0x5f0   : > { %1806 = vmatprep.subr.bf16.mxu1 %v1974_v12  ;;  %1817 = vmatpush3.bf16.msra.mxu0 %v1899_v35 }
 0x5f1   : > { %1818 = vmatprep.subr.bf16.mxu0 %v1974_v12 }
 0x5f4   : > { %1819 = vmatpush3.bf16.msra.mxu0 %v1900_v41 }
 0x5f6   : > { %1797 = vmatmul.mubr.msk.bf16.vlgmr.msra.gmra.mrb[32].mxu1 %vm425_vm3, %v1172_v61 }
 0x5f7   : > { %1807 = vmatpush3.bf16.msra.mxu1 %v1295_v43  ;;  %1808 = vmatprep.mubr.msk.bf16.mxu1 %vm1975_vm1, %v1974_v12 }
 0x5fe   : > { %1809 = vmatmul.mubr.msk.bf16.vlgmr.msra.gmra.mrb[36].mxu1 %vm425_vm3, %v1293_v3 }
 0x684   : > { %v608_v0 = vpop.f32.mrb[12].mxu1 }
 0x685   : > { %v1738_v4 = vpop.f32.mrb[13].mxu1 }
 0x686   : > { %v611_v62 = vpop.f32.mrb[14].mxu1 }
 0x687   : > { %v1850_v6 = vpack.i.bf16 %v611_v62, %v608_v0  ;;  %v1739_v11 = vpop.f32.mrb[15].mxu1 }
 0x689   : > { %1851 = vrot.lane.b32.xlu0 %v1850_v6, %s1990_s15 }
 0x68c   : > { %v729_v13 = vpop.f32.mrb[16].mxu1 }
 0x68d   : > { %v1750_v14 = vpop.f32.mrb[17].mxu1 }
 0x68e   : > { %v732_v15 = vpop.f32.mrb[18].mxu1 }
 0x68f   : > { %v1855_v17 = vpack.i.bf16 %v732_v15, %v729_v13  ;;  %v1751_v7 = vpop.f32.mrb[19].mxu1 }
 0x691   : > { %1856 = vrot.lane.b32.xlu1 %v1855_v17, %s1989_s14 }
 0x6a9   : > { %v850_v1 = vpop.f32.mrb[20].mxu1 }
 0x6aa   : > { %v1762_v19 = vpop.f32.mrb[21].mxu1 }
 0x6ab   : > { %v853_v49 = vpop.f32.mrb[22].mxu1 }
 0x6ac   : > { %v1860_v20 = vpack.i.bf16 %v853_v49, %v850_v1  ;;  %v1763_v24 = vpop.f32.mrb[23].mxu1 }
 0x6ae   : > { %1861 = vrot.lane.b32.xlu0 %v1860_v20, %s1988_s13 }
 0x6b9   : > { %v971_v21 = vpop.f32.mrb[24].mxu1 }
 0x6ba   : > { %v1774_v25 = vpop.f32.mrb[25].mxu1 }
 0x6bb   : > { %v974_v18 = vpop.f32.mrb[26].mxu1 }
 0x6bc   : > { %v1865_v27 = vpack.i.bf16 %v974_v18, %v971_v21  ;;  %v1775_v28 = vpop.f32.mrb[27].mxu1 }
 0x6be   : > { %1866 = vrot.lane.b32.xlu1 %v1865_v27, %s1986_s11  ;;  %s268_s11 = scalar_lea.vmem %s2369_s6, %s2371_s22 }
 0x6c1   : > { %v1092_v29 = vpop.f32.mrb[28].mxu1 }
 0x6c2   : > { %v1786_v30 = vpop.f32.mrb[29].mxu1 }
 0x6c3   : > { %v1095_v34 = vpop.f32.mrb[30].mxu1 }
 0x6c4   : > { %v1870_v22 = vpack.i.bf16 %v1095_v34, %v1092_v29  ;;  %v1787_v36 = vpop.f32.mrb[31].mxu1 }
 0x6c6   : > { %1871 = vrot.lane.b32.xlu0 %v1870_v22, %s1984_s9 }
 0x6c9   : > { %v1213_v38 = vpop.f32.mrb[32].mxu1 }
 0x6ca   : > { %v1798_v37 = vpop.f32.mrb[33].mxu1 }
 0x6cb   : > { %v1216_v42 = vpop.f32.mrb[34].mxu1 }
 0x6cc   : > { %v1875_v40 = vpack.i.bf16 %v1216_v42, %v1213_v38  ;;  %v1799_v44 = vpop.f32.mrb[35].mxu1 }
 0x6ce   : > { %1876 = vrot.lane.b32.xlu1 %v1875_v40, %s1983_s8  ;;  %s265_s8 = scalar_lea.vmem %s2368_s5, %s2371_s22 }
 0x6d1   : > { %v1334_v45 = vpop.f32.mrb[36].mxu1 }
 0x6d2   : > { %v1810_v39 = vpop.f32.mrb[37].mxu1 }
 0x6d3   : > { %v1337_v47 = vpop.f32.mrb[38].mxu1 }
 0x6d4   : > { %v1880_v48 = vpack.i.bf16 %v1337_v47, %v1334_v45  ;;  %v1811_v50 = vpop.f32.mrb[39].mxu1 }
 0x6d6   : > { %1881 = vrot.lane.b32.xlu0 %v1880_v48, %s1977_s26  ;;  %s1676_s26 = sshll.u32 %s2371_s22, 3 }
 0x6d7   : > { %s262_s29 = scalar_lea.vmem %s2367_s4, %s1676_s26 }
 0x6fb   : > { %v1852_v51 = vpop.permute.xlu0 %1851 }
 0x6fc   : > { %v1854_v23 = vunpack.i.h.bf16 %v1852_v51  ;;  %v1853_v54 = vunpack.i.l.bf16 %v1852_v51 }
 0x6fe   : > { %v1398_v61 = vsel %vm377_vm2, %v2152_v8, %v1854_v23  ;;  %v1397_v63 = vsel %vm377_vm2, %v2148_v5, %v1853_v54 }
 0x703   : > { %v1857_v12 = vpop.permute.xlu1 %1856 }
 0x704   : > { %v1859_v55 = vunpack.i.h.bf16 %v1857_v12  ;;  %v1858_v56 = vunpack.i.l.bf16 %v1857_v12 }
 0x706   : > { %v1400_v52 = vsel %vm425_vm3, %v1398_v61, %v1859_v55  ;;  %v1399_v2 = vsel %vm425_vm3, %v1397_v63, %v1858_v56 }
 0x720   : > { %v1862_v26 = vpop.permute.xlu0 %1861 }
 0x721   : > { %v1864_v33 = vunpack.i.h.bf16 %v1862_v26  ;;  %v1863_v57 = vunpack.i.l.bf16 %v1862_v26 }
 0x723   : > { %v1403_v4 = vsel %vm1401_vm4, %v1400_v52, %v1864_v33  ;;  %v1402_v62 = vsel %vm1401_vm4, %v1399_v2, %v1863_v57 }
 0x730   : > { %v1867_v53 = vpop.permute.xlu1 %1866 }
 0x731   : > { %v1869_v59 = vunpack.i.h.bf16 %v1867_v53  ;;  %v1868_v60 = vunpack.i.l.bf16 %v1867_v53 }
 0x733   : > { %v1406_v6 = vsel %vm1404_vm5, %v1403_v4, %v1869_v59  ;;  %v1405_v8 = vsel %vm1404_vm5, %v1402_v62, %v1868_v60 }
 0x738   : > { %v1872_v31 = vpop.permute.xlu0 %1871 }
 0x739   : > { %v1874_v43 = vunpack.i.h.bf16 %v1872_v31  ;;  %v1873_v46 = vunpack.i.l.bf16 %v1872_v31 }
 0x73b   : > { %v1409_v11 = vsel %vm1407_vm6, %v1406_v6, %v1874_v43  ;;  %v1408_v13 = vsel %vm1407_vm6, %v1405_v8, %v1873_v46 }
 0x740   : > { %v1877_v58 = vpop.permute.xlu1 %1876 }
 0x741   : > { %v1879_v3 = vunpack.i.h.bf16 %v1877_v58  ;;  %v1878_v0 = vunpack.i.l.bf16 %v1877_v58 }
 0x743   : > { %v1412_v17 = vsel %vm1410_vm7, %v1409_v11, %v1879_v3  ;;  %v1411_v7 = vsel %vm1410_vm7, %v1408_v13, %v1878_v0 }
 0x748   : > { %v1882_v5 = vpop.permute.xlu0 %1881 }
 0x749   : > { %v1884_v14 = vunpack.i.h.bf16 %v1882_v5  ;;  %v1883_v15 = vunpack.i.l.bf16 %v1882_v5 }
 0x74b   : > { %v1415_v1 = vsel %vm1413_vm8, %v1412_v17, %v1884_v14  ;;  %v1414_v19 = vsel %vm1413_vm8, %v1411_v7, %v1883_v15 }
 0x74c   : > { %v1416_v49 = vpack.c.bf16 %v1415_v1, %v1414_v19 }
 0x74e   : > { %1821 = vmatmul.mubr.msk.bf16.vlgmr.msra.gmra.mrb[28].mxu0 %vm321_vm0, %v1416_v49 }
 0x821   : > { %v1486_v20 = vpop.f32.mrb[28].mxu0 }
 0x822   : > { %v1487_v24 = vadd.f32 %v1486_v20, %v2064_v9  ;;  %v1822_v21 = vpop.f32.mrb[29].mxu0 }
 0x823   : > { %v1489_v25 = vpop.f32.mrb[30].mxu0 }
 0x824   : > { %v1677_v18 = vpack.c.bf16 %v1487_v24, %v1487_v24  ;;  %v1515_v16 = vmul.f32 %v1487_v24, %v1487_v24  ;;  %v1490_v27 = vadd.f32 %v1489_v25, %v2066_v10  ;;  %v1823_v28 = vpop.f32.mrb[31].mxu0  ;;  %v1504_v29 = vsel %vm321_vm0, %v1487_v24, 0.0 }
 0x826   : > { %1502 = vst.msk [vmem:[%s262_s29] sm:$0xf] %vm1501_vm9, %v1677_v18  ;;  %v1678_v30 = vpack.c.bf16 %v1490_v27, %v1490_v27  ;;  %v1505_v32 = vsel %vm321_vm0, %v1490_v27, 0.0  ;;  %v1516_v9 = vmul.f32 %v1490_v27, %v1490_v27  ;;  %v1517_v22 = vsel %vm321_vm0, %v1515_v16, 0.0 }
 0x827   : > { %v1506_v34 = vadd.f32 %v1505_v32, %v1504_v29 }
 0x828   : > { %1503 = vst.msk [vmem:[%s262_s29 + $0x4] sm:$0xf] %vm1501_vm9, %v1678_v30  ;;  %v1518_v36 = vsel %vm321_vm0, %v1516_v9, 0.0 }
 0x829   : > { %v1507_v35 = vrot.slane %v1506_v34, 4  ;;  %v1519_v38 = vadd.f32 %v1518_v36, %v1517_v22 }
 0x82b   : > { %v1508_v37 = vadd.f32 %v1507_v35, %v1506_v34  ;;  %v1520_v10 = vrot.slane %v1519_v38, 4 }
 0x82d   : > { %v1509_v41 = vrot.slane %v1508_v37, 2  ;;  %v1521_v42 = vadd.f32 %v1520_v10, %v1519_v38 }
 0x82f   : > { %v1510_v40 = vadd.f32 %v1509_v41, %v1508_v37  ;;  %v1522_v44 = vrot.slane %v1521_v42, 2 }
 0x831   : > { %v1511_v45 = vrot.slane %v1510_v40, 1  ;;  %v1523_v39 = vadd.f32 %v1522_v44, %v1521_v42 }
 0x833   : > { %v1512_v47 = vadd.f32 %v1511_v45, %v1510_v40  ;;  %v1524_v48 = vrot.slane %v1523_v39, 1 }
 0x835   : > { %1514 = vst.msk [vmem:[%s265_s8] sm:$0x1] %vm1513_vm10, %v1512_v47  ;;  %v1525_v50 = vadd.f32 %v1524_v48, %v1523_v39 }
 0x837   : > { %1526 = vst.msk [vmem:[%s268_s11] sm:$0x1] %vm1513_vm10, %v1525_v50 }
 0x838 PF: > { %s17_s21 = sadd.s32 1, %s1971_s21  }
 0x839   : > { %p14_p4 = scmp.ge.s32.totalorder %s17_s21, 4  }
 0x83b   :  { %16 = sbr.rel (!%p14_p4) target bundleno = 1 (0x1), region = 90 }

</bundles_post_ra>
